<compile_context>
chip_gen: v5e
topology: v5e:2x2
jax: 0.10.0
libtpu: 0.0.40
codegen_flags: <defaults>
</compile_context>

<pallas_src>
import functools
import numpy as np
import jax
import jax.numpy as jnp
from jax.experimental import pallas as pl
from jax.experimental.pallas import tpu as pltpu

EPS = 1e-6  # LayerNorm eps used everywhere in the reference model


# ----------------------------- tiling helpers -----------------------------

def _row_tile(n, target=256):
    """Largest multiple-of-8 divisor of n that is <= target (else n itself)."""
    if n <= target:
        return n
    for t in range(target - target % 8, 7, -8):
        if n % t == 0:
            return t
    return n


def _col_tile(n, target=512):
    """Largest multiple-of-128 divisor of n that is <= target (else n itself)."""
    if n <= target:
        return n
    for t in range(target - target % 128, 127, -128):
        if n % t == 0:
            return t
    return n


# ----------------------------- Pallas kernels -----------------------------

def _linear_kernel(x_ref, w_ref, *rest, relu, has_bias):
    """out = [relu](x @ w [+ b]); bf16 MXU inputs, f32 accumulate."""
    if has_bias:
        b_ref, o_ref = rest
    else:
        (o_ref,) = rest
    x = x_ref[...].astype(jnp.bfloat16)
    y = jnp.dot(x, w_ref[...], preferred_element_type=jnp.float32)
    if has_bias:
        y = y + b_ref[...]
    if relu:
        y = jnp.maximum(y, 0.0)
    o_ref[...] = y.astype(o_ref.dtype)


def _mm_add_ln_kernel(x_ref, w_ref, *rest, has_bias, eps):
    """out = LayerNorm(x @ w [+ b] + residual); LN statistics in f32."""
    if has_bias:
        b_ref, r_ref, g_ref, beta_ref, o_ref = rest
    else:
        r_ref, g_ref, beta_ref, o_ref = rest
    x = x_ref[...].astype(jnp.bfloat16)
    y = jnp.dot(x, w_ref[...], preferred_element_type=jnp.float32)
    if has_bias:
        y = y + b_ref[...]
    z = y + r_ref[...]
    mean = jnp.mean(z, axis=-1, keepdims=True)
    var = jnp.mean(jnp.square(z - mean), axis=-1, keepdims=True)
    o_ref[...] = (z - mean) * jax.lax.rsqrt(var + eps) * g_ref[...] + beta_ref[...]


def _pos_ln_kernel(x_ref, pos_ref, g_ref, b_ref, o_ref, *, scale, eps):
    """out = LayerNorm(scale * x + pos)."""
    z = x_ref[...] * scale + pos_ref[...]
    mean = jnp.mean(z, axis=-1, keepdims=True)
    var = jnp.mean(jnp.square(z - mean), axis=-1, keepdims=True)
    o_ref[...] = (z - mean) * jax.lax.rsqrt(var + eps) * g_ref[...] + b_ref[...]


def _attend_heads(get_qkv, mask, *, n_head, scale):
    """Softmax attention for all heads of one batch element -> [T, H*dv] f32."""
    masked = (mask == 0.0)                       # (Tq,S) or (1,S); broadcasts over rows
    outs = []
    for h in range(n_head):
        q_h, k_h, v_h = get_qkv(h)               # bf16 2-D tiles
        s = jax.lax.dot_general(q_h, k_h, (((1,), (1,)), ((), ())),
                                preferred_element_type=jnp.float32) * scale
        s = jnp.where(masked, -1e9, s)           # masked_fill(mask == 0, -1e9)
        s = s - jnp.max(s, axis=-1, keepdims=True)
        p = jnp.exp(s)
        p = p * pl.reciprocal(jnp.sum(p, axis=-1, keepdims=True), approx=True)
        outs.append(jnp.dot(p.astype(v_h.dtype), v_h,
                            preferred_element_type=jnp.float32))
    return jnp.concatenate(outs, axis=-1)        # lane-dense [T, H*dv]


def _self_attn_kernel(qkv_ref, m_ref, o_ref, *, n_head, d_k, d_v, scale):
    qkv = qkv_ref[0]                             # [T, H*(2dk+dv)] bf16
    h_dk = n_head * d_k

    def get_qkv(h):
        q = jax.lax.slice_in_dim(qkv, h * d_k, (h + 1) * d_k, axis=1)
        k = jax.lax.slice_in_dim(qkv, h_dk + h * d_k, h_dk + (h + 1) * d_k, axis=1)
        v = jax.lax.slice_in_dim(qkv, 2 * h_dk + h * d_v,
                                 2 * h_dk + (h + 1) * d_v, axis=1)
        return q, k, v

    o_ref[0] = _attend_heads(get_qkv, m_ref[0], n_head=n_head,
                             scale=scale).astype(o_ref.dtype)


def _cross_attn_kernel(q_ref, kv_ref, m_ref, o_ref, *, n_head, d_k, d_v, scale):
    qa = q_ref[0]                                # [Tq, H*dk]      bf16
    kva = kv_ref[0]                              # [S, H*(dk+dv)]  bf16
    h_dk = n_head * d_k

    def get_qkv(h):
        q = jax.lax.slice_in_dim(qa, h * d_k, (h + 1) * d_k, axis=1)
        k = jax.lax.slice_in_dim(kva, h * d_k, (h + 1) * d_k, axis=1)
        v = jax.lax.slice_in_dim(kva, h_dk + h * d_v, h_dk + (h + 1) * d_v, axis=1)
        return q, k, v

    o_ref[0] = _attend_heads(get_qkv, m_ref[0], n_head=n_head,
                             scale=scale).astype(o_ref.dtype)


# ----------------------------- kernel wrappers -----------------------------

def linear(x, w, b=None, relu=False, out_dtype=jnp.bfloat16):
    """Tiled x[N,K] @ w[K,M] (+b) (+relu). Output bf16 by default (feeds the next MXU)."""
    N, K = x.shape
    M = w.shape[1]
    tm, tn = _row_tile(N), _col_tile(M)
    in_specs = [pl.BlockSpec((tm, K), lambda i, j: (i, 0)),
                pl.BlockSpec((K, tn), lambda i, j: (0, j))]
    args = [x, w]
    if b is not None:
        in_specs.append(pl.BlockSpec((1, tn), lambda i, j: (0, j)))
        args.append(b.reshape(1, M))
    return pl.pallas_call(
        functools.partial(_linear_kernel, relu=relu, has_bias=b is not None),
        out_shape=jax.ShapeDtypeStruct((N, M), out_dtype),
        grid=(N // tm, M // tn),
        in_specs=in_specs,
        out_specs=pl.BlockSpec((tm, tn), lambda i, j: (i, j)),
        compiler_params=pltpu.CompilerParams(
            dimension_semantics=("parallel", "parallel")),
    )(*args)


def mm_add_ln(x, w, b, residual, gamma, beta, eps=EPS):
    """LayerNorm(x @ w [+ b] + residual); tiled over rows, full feature dim for LN."""
    N, K = x.shape
    D = w.shape[1]
    tm = _row_tile(N)
    in_specs = [pl.BlockSpec((tm, K), lambda i: (i, 0)),
                pl.BlockSpec((K, D), lambda i: (0, 0))]
    args = [x, w]
    if b is not None:
        in_specs.append(pl.BlockSpec((1, D), lambda i: (0, 0)))
        args.append(b.reshape(1, D))
    in_specs += [pl.BlockSpec((tm, D), lambda i: (i, 0)),
                 pl.BlockSpec((1, D), lambda i: (0, 0)),
                 pl.BlockSpec((1, D), lambda i: (0, 0))]
    args += [residual, gamma.reshape(1, D), beta.reshape(1, D)]
    return pl.pallas_call(
        functools.partial(_mm_add_ln_kernel, has_bias=b is not None, eps=eps),
        out_shape=jax.ShapeDtypeStruct((N, D), jnp.float32),
        grid=(N // tm,),
        in_specs=in_specs,
        out_specs=pl.BlockSpec((tm, D), lambda i: (i, 0)),
        compiler_params=pltpu.CompilerParams(dimension_semantics=("parallel",)),
    )(*args)


def pos_add_layernorm(x, pos, gamma, beta, scale, eps=EPS):
    """LayerNorm(scale * x + pos); pos [T,D] is re-used across the batch via index_map."""
    B, T, D = x.shape
    x2 = x.reshape(B * T, D)
    g2, b2 = gamma.reshape(1, D), beta.reshape(1, D)
    kernel = functools.partial(_pos_ln_kernel, scale=scale, eps=eps)
    if T % 8 == 0 or B == 1:
        out = pl.pallas_call(
            kernel,
            out_shape=jax.ShapeDtypeStruct((B * T, D), jnp.float32),
            grid=(B,),
            in_specs=[pl.BlockSpec((T, D), lambda b: (b, 0)),
                      pl.BlockSpec((T, D), lambda b: (0, 0)),   # same pos block every b
                      pl.BlockSpec((1, D), lambda b: (0, 0)),
                      pl.BlockSpec((1, D), lambda b: (0, 0))],
            out_specs=pl.BlockSpec((T, D), lambda b: (b, 0)),
            compiler_params=pltpu.CompilerParams(dimension_semantics=("parallel",)),
        )(x2, pos, g2, b2)
    else:  # fallback for row tiles that violate the (8,128) block rule
        pos_b = jnp.broadcast_to(pos[None], (B, T, D)).reshape(B * T, D)
        out = pl.pallas_call(
            kernel,
            out_shape=jax.ShapeDtypeStruct((B * T, D), jnp.float32),
            grid=(1,),
            in_specs=[pl.BlockSpec((B * T, D), lambda i: (0, 0)),
                      pl.BlockSpec((B * T, D), lambda i: (0, 0)),
                      pl.BlockSpec((1, D), lambda i: (0, 0)),
                      pl.BlockSpec((1, D), lambda i: (0, 0))],
            out_specs=pl.BlockSpec((B * T, D), lambda i: (0, 0)),
        )(x2, pos_b, g2, b2)
    return out.reshape(B, T, D)


def self_attention(qkv, mask, n_head, d_k, d_v):
    """qkv: [B,T,H*(2dk+dv)] bf16, mask: [B,T,T] f32 -> [B,T,H*dv] bf16 (lane-dense)."""
    B, T, F = qkv.shape
    h_dv = n_head * d_v
    scale = 1.0 / float(np.sqrt(d_k))
    return pl.pallas_call(
        functools.partial(_self_attn_kernel, n_head=n_head, d_k=d_k, d_v=d_v,
                          scale=scale),
        out_shape=jax.ShapeDtypeStruct((B, T, h_dv), jnp.bfloat16),
        grid=(B,),
        in_specs=[pl.BlockSpec((1, T, F), lambda b: (b, 0, 0)),
                  pl.BlockSpec((1, T, T), lambda b: (b, 0, 0))],
        out_specs=pl.BlockSpec((1, T, h_dv), lambda b: (b, 0, 0)),
        compiler_params=pltpu.CompilerParams(dimension_semantics=("parallel",)),
    )(qkv, mask)


def cross_attention(q, kv, mask, n_head, d_k, d_v):
    """q: [B,Tq,H*dk], kv: [B,S,H*(dk+dv)] bf16, mask: [B,1,S] -> [B,Tq,H*dv] bf16."""
    B, Tq, Fq = q.shape
    S, Fkv = kv.shape[1], kv.shape[2]
    Tm = mask.shape[1]
    h_dv = n_head * d_v
    scale = 1.0 / float(np.sqrt(d_k))
    return pl.pallas_call(
        functools.partial(_cross_attn_kernel, n_head=n_head, d_k=d_k, d_v=d_v,
                          scale=scale),
        out_shape=jax.ShapeDtypeStruct((B, Tq, h_dv), jnp.bfloat16),
        grid=(B,),
        in_specs=[pl.BlockSpec((1, Tq, Fq), lambda b: (b, 0, 0)),
                  pl.BlockSpec((1, S, Fkv), lambda b: (b, 0, 0)),
                  pl.BlockSpec((1, Tm, S), lambda b: (b, 0, 0))],
        out_specs=pl.BlockSpec((1, Tq, h_dv), lambda b: (b, 0, 0)),
        compiler_params=pltpu.CompilerParams(dimension_semantics=("parallel",)),
    )(q, kv, mask)


# ----------------------------- model pieces -----------------------------

def self_attention_block(p, x, mask, n_head, d_k, d_v):
    B, T, D = x.shape
    x2 = x.reshape(B * T, D)
    qkv = linear(x2, p['w_qkv'])                                   # fused Q|K|V matmul
    ctx = self_attention(qkv.reshape(B, T, -1), mask, n_head, d_k, d_v)
    out = mm_add_ln(ctx.reshape(B * T, n_head * d_v), p['fc'], None,
                    x2, p['ln_g'], p['ln_b'])                      # fc + residual + LN
    return out.reshape(B, T, D)


def cross_attention_block(p, x, enc, mask, n_head, d_k, d_v):
    B, T, D = x.shape
    S = enc.shape[1]
    x2 = x.reshape(B * T, D)
    q = linear(x2, p['w_q'])
    kv = linear(enc.reshape(B * S, D), p['w_kv'])                  # fused K|V matmul
    ctx = cross_attention(q.reshape(B, T, -1), kv.reshape(B, S, -1),
                          mask, n_head, d_k, d_v)
    out = mm_add_ln(ctx.reshape(B * T, n_head * d_v), p['fc'], None,
                    x2, p['ln_g'], p['ln_b'])
    return out.reshape(B, T, D)


def positionwise_ffn(p, x):
    B, T, D = x.shape
    x2 = x.reshape(B * T, D)
    h = linear(x2, p['w1'], p['b1'], relu=True)                    # w1 + bias + relu
    out = mm_add_ln(h, p['w2'], p['b2'], x2, p['ln_g'], p['ln_b']) # w2 + residual + LN
    return out.reshape(B, T, D)


def sinusoid_table(n_position, d_hid):
    pos = np.arange(n_position, dtype=np.float64)[:, None]
    hid = np.arange(d_hid, dtype=np.float64)[None, :]
    angle = pos / np.power(10000.0, 2.0 * np.floor(hid / 2.0) / d_hid)
    table = np.zeros((n_position, d_hid), dtype=np.float64)
    table[:, 0::2] = np.sin(angle[:, 0::2])
    table[:, 1::2] = np.cos(angle[:, 1::2])
    return jnp.asarray(table, dtype=jnp.float32)


def init_decoder_params(key, *, n_layers, n_head, d_k, d_v, d_model, d_inner,
                        n_position=200):
    keys = iter(jax.random.split(key, n_layers * 10 + 4))

    def w(shape):  # matmul weights stored bf16 (MXU-native); biases / LN params in f32
        return (jax.random.normal(next(keys), shape, jnp.float32) * 0.02
                ).astype(jnp.bfloat16)

    params = {
        'pos_table': sinusoid_table(n_position, d_model),
        'ln_g': jnp.ones((d_model,), jnp.float32),
        'ln_b': jnp.zeros((d_model,), jnp.float32),
        'layers': [],
    }
    for _ in range(n_layers):
        slf = {
            'w_qkv': jnp.concatenate([w((d_model, n_head * d_k)),
                                      w((d_model, n_head * d_k)),
                                      w((d_model, n_head * d_v))], axis=1),
            'fc': w((n_head * d_v, d_model)),
            'ln_g': jnp.ones((d_model,), jnp.float32),
            'ln_b': jnp.zeros((d_model,), jnp.float32),
        }
        enc = {
            'w_q': w((d_model, n_head * d_k)),
            'w_kv': jnp.concatenate([w((d_model, n_head * d_k)),
                                     w((d_model, n_head * d_v))], axis=1),
            'fc': w((n_head * d_v, d_model)),
            'ln_g': jnp.ones((d_model,), jnp.float32),
            'ln_b': jnp.zeros((d_model,), jnp.float32),
        }
        ffn = {
            'w1': w((d_model, d_inner)),
            'b1': jnp.zeros((d_inner,), jnp.float32),
            'w2': w((d_inner, d_model)),
            'b2': jnp.zeros((d_model,), jnp.float32),
            'ln_g': jnp.ones((d_model,), jnp.float32),
            'ln_b': jnp.zeros((d_model,), jnp.float32),
        }
        params['layers'].append({'slf': slf, 'enc': enc, 'ffn': ffn})
    return params


def decoder_forward(params, trg_seq, trg_mask, enc_output, src_mask, *,
                    n_head, d_k, d_v, d_model, scale_emb=False):
    """Matches Decoder.forward with return_attns=False (inference: dropout=identity)."""
    B, T, D = trg_seq.shape
    scale = float(d_model) ** 0.5 if scale_emb else 1.0

    dec = pos_add_layernorm(trg_seq, params['pos_table'][:T],
                            params['ln_g'], params['ln_b'], scale)

    slf_mask = trg_mask.astype(jnp.float32)       # [B, T, T]
    enc_mask = src_mask.astype(jnp.float32)       # [B, 1, S] (broadcast inside kernel)

    for layer in params['layers']:
        dec = self_attention_block(layer['slf'], dec, slf_mask, n_head, d_k, d_v)
        dec = cross_attention_block(layer['enc'], dec, enc_output, enc_mask,
                                    n_head, d_k, d_v)
        dec = positionwise_ffn(layer['ffn'], dec)
    return (dec,)


# ----------------------------- pure-JAX reference -----------------------------

def decoder_reference(params, trg_seq, trg_mask, enc_output, src_mask, *,
                      n_head, d_k, d_v, d_model, scale_emb=False):
    B, T, D = trg_seq.shape
    h_dk, h_dv = n_head * d_k, n_head * d_v

    def ln(x, g, b):
        m = jnp.mean(x, -1, keepdims=True)
        v = jnp.mean(jnp.square(x - m), -1, keepdims=True)
        return (x - m) / jnp.sqrt(v + EPS) * g + b

    def mha(wq, wk, wv, fc, g, b, q_in, kv_in, mask):
        Bq, Tq, _ = q_in.shape
        Tk = kv_in.shape[1]
        q = (q_in @ wq).reshape(Bq, Tq, n_head, d_k).transpose(0, 2, 1, 3)
        k = (kv_in @ wk).reshape(Bq, Tk, n_head, d_k).transpose(0, 2, 1, 3)
        v = (kv_in @ wv).reshape(Bq, Tk, n_head, d_v).transpose(0, 2, 1, 3)
        s = jnp.einsum('bhqd,bhkd->bhqk', q, k) / np.sqrt(d_k)
        s = jnp.where(mask[:, None] == 0, -1e9, s)
        p = jax.nn.softmax(s, axis=-1)
        o = jnp.einsum('bhqk,bhkd->bhqd', p, v)
        o = o.transpose(0, 2, 1, 3).reshape(Bq, Tq, h_dv)
        return ln(o @ fc + q_in, g, b)

    x = trg_seq * (d_model ** 0.5 if scale_emb else 1.0)
    x = ln(x + params['pos_table'][:T][None], params['ln_g'], params['ln_b'])
    for layer in params['layers']:
        sp, ep, fp = layer['slf'], layer['enc'], layer['ffn']
        wqkv = sp['w_qkv'].astype(jnp.float32)
        x = mha(wqkv[:, :h_dk], wqkv[:, h_dk:2 * h_dk], wqkv[:, 2 * h_dk:],
                sp['fc'].astype(jnp.float32), sp['ln_g'], sp['ln_b'],
                x, x, trg_mask)
        wkv = ep['w_kv'].astype(jnp.float32)
        x = mha(ep['w_q'].astype(jnp.float32), wkv[:, :h_dk], wkv[:, h_dk:],
                ep['fc'].astype(jnp.float32), ep['ln_g'], ep['ln_b'],
                x, enc_output, src_mask)
        h = jnp.maximum(x @ fp['w1'].astype(jnp.float32) + fp['b1'], 0.0)
        x = ln(h @ fp['w2'].astype(jnp.float32) + fp['b2'] + x,
               fp['ln_g'], fp['ln_b'])
    return x


# ----------------------------- demo / smoke test -----------------------------

if __name__ == "__main__":
    B, T, S = 2, 8, 8
    d_model, n_head, d_k, d_v, d_inner, n_layers = 32, 4, 8, 8, 64, 2

    key = jax.random.PRNGKey(0)
    k_params, k_trg, k_enc = jax.random.split(key, 3)

    params = init_decoder_params(k_params, n_layers=n_layers, n_head=n_head,
                                 d_k=d_k, d_v=d_v, d_model=d_model,
                                 d_inner=d_inner, n_position=200)

    trg_seq = jax.random.normal(k_trg, (B, T, d_model), jnp.float32)    # already embedded
    enc_output = jax.random.normal(k_enc, (B, S, d_model), jnp.float32)
    trg_mask = jnp.broadcast_to(jnp.tril(jnp.ones((T, T), jnp.float32))[None],
                                (B, T, T))                              # causal mask
    src_mask = jnp.ones((B, 1, S), jnp.float32)                         # no padding

    fwd = jax.jit(functools.partial(decoder_forward, n_head=n_head, d_k=d_k,
                                    d_v=d_v, d_model=d_model, scale_emb=False))
    (out,) = fwd(params, trg_seq, trg_mask, enc_output, src_mask)
    out = jax.block_until_ready(out)

    assert out.shape == (B, T, d_model)
    assert bool(jnp.all(jnp.isfinite(out)))

    ref = decoder_reference(params, trg_seq, trg_mask, enc_output, src_mask,
                            n_head=n_head, d_k=d_k, d_v=d_v, d_model=d_model,
                            scale_emb=False)
    max_err = float(jnp.max(jnp.abs(out - ref)))
    assert max_err < 0.2, f"kernel/reference mismatch: max_abs_err={max_err}"
    print("KERNEL_OK")
</pallas_src>

<mosaic_0001>
module attributes {stable_mosaic.version = 11 : i64} {
  func.func @_pos_ln_kernel(%arg0: i32, %arg1: memref<8x32xf32, #tpu.memory_space<vmem>>, %arg2: memref<8x32xf32, #tpu.memory_space<vmem>>, %arg3: memref<1x32xf32, #tpu.memory_space<vmem>>, %arg4: memref<1x32xf32, #tpu.memory_space<vmem>>, %arg5: memref<8x32xf32, #tpu.memory_space<vmem>>) attributes {dimension_semantics = [#tpu.dimension_semantics<parallel>], iteration_bounds = array<i64: 2>, scalar_prefetch = 0 : i64, scratch_operands = 0 : i64, tpu.core_type = #tpu.core_type<tc>, window_params = [{transform_indices = @transform_0, window_bounds = array<i64: 8, 32>}, {pipeline_mode = #tpu.pipeline_mode<synchronous>, transform_indices = @transform_1, window_bounds = array<i64: 8, 32>}, {pipeline_mode = #tpu.pipeline_mode<synchronous>, transform_indices = @transform_2, window_bounds = array<i64: 1, 32>}, {pipeline_mode = #tpu.pipeline_mode<synchronous>, transform_indices = @transform_3, window_bounds = array<i64: 1, 32>}, {transform_indices = @transform_4, window_bounds = array<i64: 8, 32>}]} {
    %c0 = arith.constant 0 : index
    %c0_0 = arith.constant 0 : index
    %0 = vector.load %arg1[%c0, %c0_0] : memref<8x32xf32, #tpu.memory_space<vmem>>, vector<8x32xf32>
    %cst = arith.constant 1.000000e+00 : f32
    %1 = vector.broadcast %cst : f32 to vector<8x32xf32>
    %2 = arith.mulf %0, %1 : vector<8x32xf32>
    %c0_1 = arith.constant 0 : index
    %c0_2 = arith.constant 0 : index
    %3 = vector.load %arg2[%c0_1, %c0_2] : memref<8x32xf32, #tpu.memory_space<vmem>>, vector<8x32xf32>
    %4 = arith.addf %2, %3 : vector<8x32xf32>
    %cst_3 = arith.constant dense<0.000000e+00> : vector<8xf32>
    %5 = vector.multi_reduction <add>, %4, %cst_3 [1] : vector<8x32xf32> to vector<8xf32>
    %6 = vector.shape_cast %5 : vector<8xf32> to vector<8x1xf32>
    %cst_4 = arith.constant 3.200000e+01 : f32
    %7 = vector.broadcast %cst_4 : f32 to vector<8x1xf32>
    %8 = arith.divf %6, %7 : vector<8x1xf32>
    %9 = vector.broadcast %8 : vector<8x1xf32> to vector<8x32xf32>
    %10 = arith.subf %4, %9 : vector<8x32xf32>
    %11 = arith.mulf %10, %10 : vector<8x32xf32>
    %cst_5 = arith.constant dense<0.000000e+00> : vector<8xf32>
    %12 = vector.multi_reduction <add>, %11, %cst_5 [1] : vector<8x32xf32> to vector<8xf32>
    %13 = vector.shape_cast %12 : vector<8xf32> to vector<8x1xf32>
    %cst_6 = arith.constant 3.200000e+01 : f32
    %14 = vector.broadcast %cst_6 : f32 to vector<8x1xf32>
    %15 = arith.divf %13, %14 : vector<8x1xf32>
    %16 = vector.broadcast %8 : vector<8x1xf32> to vector<8x32xf32>
    %17 = arith.subf %4, %16 : vector<8x32xf32>
    %cst_7 = arith.constant 9.99999997E-7 : f32
    %18 = vector.broadcast %cst_7 : f32 to vector<8x1xf32>
    %19 = arith.addf %15, %18 : vector<8x1xf32>
    %20 = math.rsqrt %19 : vector<8x1xf32>
    %21 = vector.broadcast %20 : vector<8x1xf32> to vector<8x32xf32>
    %22 = arith.mulf %17, %21 : vector<8x32xf32>
    %c0_8 = arith.constant 0 : index
    %c0_9 = arith.constant 0 : index
    %23 = vector.load %arg3[%c0_8, %c0_9] : memref<1x32xf32, #tpu.memory_space<vmem>>, vector<1x32xf32>
    %24 = vector.broadcast %23 : vector<1x32xf32> to vector<8x32xf32>
    %25 = arith.mulf %22, %24 : vector<8x32xf32>
    %c0_10 = arith.constant 0 : index
    %c0_11 = arith.constant 0 : index
    %26 = vector.load %arg4[%c0_10, %c0_11] : memref<1x32xf32, #tpu.memory_space<vmem>>, vector<1x32xf32>
    %27 = vector.broadcast %26 : vector<1x32xf32> to vector<8x32xf32>
    %28 = arith.addf %25, %27 : vector<8x32xf32>
    %c0_12 = arith.constant 0 : index
    %c0_13 = arith.constant 0 : index
    %29 = vector.load %arg5[%c0_12, %c0_13] : memref<8x32xf32, #tpu.memory_space<vmem>>, vector<8x32xf32>
    tpu.vector_store %arg5[%c0_12, %c0_13], %28 {strides = array<i32>} : memref<8x32xf32, #tpu.memory_space<vmem>>, vector<8x32xf32>,
    return
  }
  func.func @transform_0(%arg0: i32) -> (i32, i32) {
    %c0_i32 = arith.constant 0 : i32
    %c0_i32_0 = arith.constant 0 : i32
    return %arg0, %c0_i32 : i32, i32
  }
  func.func @transform_1(%arg0: i32) -> (i32, i32) {
    %c0_i32 = arith.constant 0 : i32
    %c0_i32_0 = arith.constant 0 : i32
    %c0_i32_1 = arith.constant 0 : i32
    return %c0_i32, %c0_i32_0 : i32, i32
  }
  func.func @transform_2(%arg0: i32) -> (i32, i32) {
    %c0_i32 = arith.constant 0 : i32
    %c0_i32_0 = arith.constant 0 : i32
    %c0_i32_1 = arith.constant 0 : i32
    return %c0_i32, %c0_i32_0 : i32, i32
  }
  func.func @transform_3(%arg0: i32) -> (i32, i32) {
    %c0_i32 = arith.constant 0 : i32
    %c0_i32_0 = arith.constant 0 : i32
    %c0_i32_1 = arith.constant 0 : i32
    return %c0_i32, %c0_i32_0 : i32, i32
  }
  func.func @transform_4(%arg0: i32) -> (i32, i32) {
    %c0_i32 = arith.constant 0 : i32
    %c0_i32_0 = arith.constant 0 : i32
    return %arg0, %c0_i32 : i32, i32
  }
}

module attributes {stable_mosaic.version = 11 : i64} {
  func.func @_self_attn_kernel(%arg0: i32, %arg1: memref<1x8x96xbf16, #tpu.memory_space<vmem>>, %arg2: memref<1x8x8xf32, #tpu.memory_space<vmem>>, %arg3: memref<1x8x32xbf16, #tpu.memory_space<vmem>>) attributes {dimension_semantics = [#tpu.dimension_semantics<parallel>], iteration_bounds = array<i64: 2>, scalar_prefetch = 0 : i64, scratch_operands = 0 : i64, tpu.core_type = #tpu.core_type<tc>, window_params = [{transform_indices = @transform_0, window_bounds = array<i64: 1, 8, 96>}, {transform_indices = @transform_1, window_bounds = array<i64: 1, 8, 8>}, {transform_indices = @transform_2, window_bounds = array<i64: 1, 8, 32>}]} {
    %c0 = arith.constant 0 : index
    %c0_0 = arith.constant 0 : index
    %c0_1 = arith.constant 0 : index
    %0 = vector.load %arg1[%c0, %c0_0, %c0_1] : memref<1x8x96xbf16, #tpu.memory_space<vmem>>, vector<1x8x96xbf16>
    %1 = vector.shape_cast %0 : vector<1x8x96xbf16> to vector<8x96xbf16>
    %c0_2 = arith.constant 0 : index
    %c0_3 = arith.constant 0 : index
    %c0_4 = arith.constant 0 : index
    %2 = vector.load %arg2[%c0_2, %c0_3, %c0_4] : memref<1x8x8xf32, #tpu.memory_space<vmem>>, vector<1x8x8xf32>
    %3 = vector.shape_cast %2 : vector<1x8x8xf32> to vector<8x8xf32>
    %cst = arith.constant 0.000000e+00 : f32
    %4 = vector.broadcast %cst : f32 to vector<8x8xf32>
    %5 = arith.cmpf oeq, %3, %4 : vector<8x8xf32>
    %6 = vector.extract_strided_slice %1 {offsets = [0, 0], sizes = [8, 8], strides = [1, 1]} : vector<8x96xbf16> to vector<8x8xbf16>
    %7 = vector.extract_strided_slice %1 {offsets = [0, 32], sizes = [8, 8], strides = [1, 1]} : vector<8x96xbf16> to vector<8x8xbf16>
    %8 = vector.extract_strided_slice %1 {offsets = [0, 64], sizes = [8, 8], strides = [1, 1]} : vector<8x96xbf16> to vector<8x8xbf16>
    %cst_5 = arith.constant dense<0.000000e+00> : vector<8x8xf32>
    %9 = tpu.matmul %6, %7, %cst_5 {dimension_numbers = #tpu.dot_dimension_numbers<[1], [1], [0], [0], [0, 0, 1, 0], [], []>} : vector<8x8xbf16>, vector<8x8xbf16>, vector<8x8xf32> -> vector<8x8xf32>
    %cst_6 = arith.constant 0.353553385 : f32
    %10 = vector.broadcast %cst_6 : f32 to vector<8x8xf32>
    %11 = arith.mulf %9, %10 : vector<8x8xf32>
    %cst_7 = arith.constant -1.000000e+09 : f32
    %12 = vector.broadcast %cst_7 : f32 to vector<8x8xf32>
    %13 = arith.select %5, %12, %11 : vector<8x8xi1>, vector<8x8xf32>
    %cst_8 = arith.constant dense<0xFF800000> : vector<8xf32>
    %14 = vector.multi_reduction <maximumf>, %13, %cst_8 [1] : vector<8x8xf32> to vector<8xf32>
    %15 = vector.shape_cast %14 : vector<8xf32> to vector<8x1xf32>
    %16 = vector.broadcast %15 : vector<8x1xf32> to vector<8x8xf32>
    %17 = arith.subf %13, %16 : vector<8x8xf32>
    %18 = math.exp %17 : vector<8x8xf32>
    %cst_9 = arith.constant dense<0.000000e+00> : vector<8xf32>
    %19 = vector.multi_reduction <add>, %18, %cst_9 [1] : vector<8x8xf32> to vector<8xf32>
    %20 = vector.shape_cast %19 : vector<8xf32> to vector<8x1xf32>
    %21 = tpu.reciprocal %20 {approx = true} : vector<8x1xf32> -> vector<8x1xf32>
    %22 = vector.broadcast %21 : vector<8x1xf32> to vector<8x8xf32>
    %23 = arith.mulf %18, %22 : vector<8x8xf32>
    %24 = arith.truncf %23 : vector<8x8xf32> to vector<8x8xbf16>
    %cst_10 = arith.constant dense<0.000000e+00> : vector<8x8xf32>
    %25 = tpu.matmul %24, %8, %cst_10 {dimension_numbers = #tpu.dot_dimension_numbers<[1], [0], [0], [1], [0, 0, 1, 1], [], []>} : vector<8x8xbf16>, vector<8x8xbf16>, vector<8x8xf32> -> vector<8x8xf32>
    %26 = vector.extract_strided_slice %1 {offsets = [0, 8], sizes = [8, 8], strides = [1, 1]} : vector<8x96xbf16> to vector<8x8xbf16>
    %27 = vector.extract_strided_slice %1 {offsets = [0, 40], sizes = [8, 8], strides = [1, 1]} : vector<8x96xbf16> to vector<8x8xbf16>
    %28 = vector.extract_strided_slice %1 {offsets = [0, 72], sizes = [8, 8], strides = [1, 1]} : vector<8x96xbf16> to vector<8x8xbf16>
    %cst_11 = arith.constant dense<0.000000e+00> : vector<8x8xf32>
    %29 = tpu.matmul %26, %27, %cst_11 {dimension_numbers = #tpu.dot_dimension_numbers<[1], [1], [0], [0], [0, 0, 1, 0], [], []>} : vector<8x8xbf16>, vector<8x8xbf16>, vector<8x8xf32> -> vector<8x8xf32>
    %cst_12 = arith.constant 0.353553385 : f32
    %30 = vector.broadcast %cst_12 : f32 to vector<8x8xf32>
    %31 = arith.mulf %29, %30 : vector<8x8xf32>
    %cst_13 = arith.constant -1.000000e+09 : f32
    %32 = vector.broadcast %cst_13 : f32 to vector<8x8xf32>
    %33 = arith.select %5, %32, %31 : vector<8x8xi1>, vector<8x8xf32>
    %cst_14 = arith.constant dense<0xFF800000> : vector<8xf32>
    %34 = vector.multi_reduction <maximumf>, %33, %cst_14 [1] : vector<8x8xf32> to vector<8xf32>
    %35 = vector.shape_cast %34 : vector<8xf32> to vector<8x1xf32>
    %36 = vector.broadcast %35 : vector<8x1xf32> to vector<8x8xf32>
    %37 = arith.subf %33, %36 : vector<8x8xf32>
    %38 = math.exp %37 : vector<8x8xf32>
    %cst_15 = arith.constant dense<0.000000e+00> : vector<8xf32>
    %39 = vector.multi_reduction <add>, %38, %cst_15 [1] : vector<8x8xf32> to vector<8xf32>
    %40 = vector.shape_cast %39 : vector<8xf32> to vector<8x1xf32>
    %41 = tpu.reciprocal %40 {approx = true} : vector<8x1xf32> -> vector<8x1xf32>
    %42 = vector.broadcast %41 : vector<8x1xf32> to vector<8x8xf32>
    %43 = arith.mulf %38, %42 : vector<8x8xf32>
    %44 = arith.truncf %43 : vector<8x8xf32> to vector<8x8xbf16>
    %cst_16 = arith.constant dense<0.000000e+00> : vector<8x8xf32>
    %45 = tpu.matmul %44, %28, %cst_16 {dimension_numbers = #tpu.dot_dimension_numbers<[1], [0], [0], [1], [0, 0, 1, 1], [], []>} : vector<8x8xbf16>, vector<8x8xbf16>, vector<8x8xf32> -> vector<8x8xf32>
    %46 = vector.extract_strided_slice %1 {offsets = [0, 16], sizes = [8, 8], strides = [1, 1]} : vector<8x96xbf16> to vector<8x8xbf16>
    %47 = vector.extract_strided_slice %1 {offsets = [0, 48], sizes = [8, 8], strides = [1, 1]} : vector<8x96xbf16> to vector<8x8xbf16>
    %48 = vector.extract_strided_slice %1 {offsets = [0, 80], sizes = [8, 8], strides = [1, 1]} : vector<8x96xbf16> to vector<8x8xbf16>
    %cst_17 = arith.constant dense<0.000000e+00> : vector<8x8xf32>
    %49 = tpu.matmul %46, %47, %cst_17 {dimension_numbers = #tpu.dot_dimension_numbers<[1], [1], [0], [0], [0, 0, 1, 0], [], []>} : vector<8x8xbf16>, vector<8x8xbf16>, vector<8x8xf32> -> vector<8x8xf32>
    %cst_18 = arith.constant 0.353553385 : f32
    %50 = vector.broadcast %cst_18 : f32 to vector<8x8xf32>
    %51 = arith.mulf %49, %50 : vector<8x8xf32>
    %cst_19 = arith.constant -1.000000e+09 : f32
    %52 = vector.broadcast %cst_19 : f32 to vector<8x8xf32>
    %53 = arith.select %5, %52, %51 : vector<8x8xi1>, vector<8x8xf32>
    %cst_20 = arith.constant dense<0xFF800000> : vector<8xf32>
    %54 = vector.multi_reduction <maximumf>, %53, %cst_20 [1] : vector<8x8xf32> to vector<8xf32>
    %55 = vector.shape_cast %54 : vector<8xf32> to vector<8x1xf32>
    %56 = vector.broadcast %55 : vector<8x1xf32> to vector<8x8xf32>
    %57 = arith.subf %53, %56 : vector<8x8xf32>
    %58 = math.exp %57 : vector<8x8xf32>
    %cst_21 = arith.constant dense<0.000000e+00> : vector<8xf32>
    %59 = vector.multi_reduction <add>, %58, %cst_21 [1] : vector<8x8xf32> to vector<8xf32>
    %60 = vector.shape_cast %59 : vector<8xf32> to vector<8x1xf32>
    %61 = tpu.reciprocal %60 {approx = true} : vector<8x1xf32> -> vector<8x1xf32>
    %62 = vector.broadcast %61 : vector<8x1xf32> to vector<8x8xf32>
    %63 = arith.mulf %58, %62 : vector<8x8xf32>
    %64 = arith.truncf %63 : vector<8x8xf32> to vector<8x8xbf16>
    %cst_22 = arith.constant dense<0.000000e+00> : vector<8x8xf32>
    %65 = tpu.matmul %64, %48, %cst_22 {dimension_numbers = #tpu.dot_dimension_numbers<[1], [0], [0], [1], [0, 0, 1, 1], [], []>} : vector<8x8xbf16>, vector<8x8xbf16>, vector<8x8xf32> -> vector<8x8xf32>
    %66 = vector.extract_strided_slice %1 {offsets = [0, 24], sizes = [8, 8], strides = [1, 1]} : vector<8x96xbf16> to vector<8x8xbf16>
    %67 = vector.extract_strided_slice %1 {offsets = [0, 56], sizes = [8, 8], strides = [1, 1]} : vector<8x96xbf16> to vector<8x8xbf16>
    %68 = vector.extract_strided_slice %1 {offsets = [0, 88], sizes = [8, 8], strides = [1, 1]} : vector<8x96xbf16> to vector<8x8xbf16>
    %cst_23 = arith.constant dense<0.000000e+00> : vector<8x8xf32>
    %69 = tpu.matmul %66, %67, %cst_23 {dimension_numbers = #tpu.dot_dimension_numbers<[1], [1], [0], [0], [0, 0, 1, 0], [], []>} : vector<8x8xbf16>, vector<8x8xbf16>, vector<8x8xf32> -> vector<8x8xf32>
    %cst_24 = arith.constant 0.353553385 : f32
    %70 = vector.broadcast %cst_24 : f32 to vector<8x8xf32>
    %71 = arith.mulf %69, %70 : vector<8x8xf32>
    %cst_25 = arith.constant -1.000000e+09 : f32
    %72 = vector.broadcast %cst_25 : f32 to vector<8x8xf32>
    %73 = arith.select %5, %72, %71 : vector<8x8xi1>, vector<8x8xf32>
    %cst_26 = arith.constant dense<0xFF800000> : vector<8xf32>
    %74 = vector.multi_reduction <maximumf>, %73, %cst_26 [1] : vector<8x8xf32> to vector<8xf32>
    %75 = vector.shape_cast %74 : vector<8xf32> to vector<8x1xf32>
    %76 = vector.broadcast %75 : vector<8x1xf32> to vector<8x8xf32>
    %77 = arith.subf %73, %76 : vector<8x8xf32>
    %78 = math.exp %77 : vector<8x8xf32>
    %cst_27 = arith.constant dense<0.000000e+00> : vector<8xf32>
    %79 = vector.multi_reduction <add>, %78, %cst_27 [1] : vector<8x8xf32> to vector<8xf32>
    %80 = vector.shape_cast %79 : vector<8xf32> to vector<8x1xf32>
    %81 = tpu.reciprocal %80 {approx = true} : vector<8x1xf32> -> vector<8x1xf32>
    %82 = vector.broadcast %81 : vector<8x1xf32> to vector<8x8xf32>
    %83 = arith.mulf %78, %82 : vector<8x8xf32>
    %84 = arith.truncf %83 : vector<8x8xf32> to vector<8x8xbf16>
    %cst_28 = arith.constant dense<0.000000e+00> : vector<8x8xf32>
    %85 = tpu.matmul %84, %68, %cst_28 {dimension_numbers = #tpu.dot_dimension_numbers<[1], [0], [0], [1], [0, 0, 1, 1], [], []>} : vector<8x8xbf16>, vector<8x8xbf16>, vector<8x8xf32> -> vector<8x8xf32>
    %86 = tpu.concatenate %25, %45, %65, %85 in 1 : vector<8x8xf32>, vector<8x8xf32>, vector<8x8xf32>, vector<8x8xf32> -> vector<8x32xf32>
    %87 = arith.truncf %86 : vector<8x32xf32> to vector<8x32xbf16>
    %c0_29 = arith.constant 0 : index
    %c0_30 = arith.constant 0 : index
    %c0_31 = arith.constant 0 : index
    %88 = vector.load %arg3[%c0_29, %c0_30, %c0_31] : memref<1x8x32xbf16, #tpu.memory_space<vmem>>, vector<1x8x32xbf16>
    %89 = vector.shape_cast %88 : vector<1x8x32xbf16> to vector<8x32xbf16>
    %90 = vector.shape_cast %87 : vector<8x32xbf16> to vector<1x8x32xbf16>
    tpu.vector_store %arg3[%c0_29, %c0_30, %c0_31], %90 {strides = array<i32>} : memref<1x8x32xbf16, #tpu.memory_space<vmem>>, vector<1x8x32xbf16>,
    return
  }
  func.func @transform_0(%arg0: i32) -> (i32, i32, i32) {
    %c0_i32 = arith.constant 0 : i32
    %c0_i32_0 = arith.constant 0 : i32
    %c0_i32_1 = arith.constant 0 : i32
    return %arg0, %c0_i32, %c0_i32_0 : i32, i32, i32
  }
  func.func @transform_1(%arg0: i32) -> (i32, i32, i32) {
    %c0_i32 = arith.constant 0 : i32
    %c0_i32_0 = arith.constant 0 : i32
    %c0_i32_1 = arith.constant 0 : i32
    return %arg0, %c0_i32, %c0_i32_0 : i32, i32, i32
  }
  func.func @transform_2(%arg0: i32) -> (i32, i32, i32) {
    %c0_i32 = arith.constant 0 : i32
    %c0_i32_0 = arith.constant 0 : i32
    %c0_i32_1 = arith.constant 0 : i32
    return %arg0, %c0_i32, %c0_i32_0 : i32, i32, i32
  }
}

module attributes {stable_mosaic.version = 11 : i64} {
  func.func @_linear_kernel(%arg0: i32, %arg1: i32, %arg2: memref<16x32xf32, #tpu.memory_space<vmem>>, %arg3: memref<32x96xbf16, #tpu.memory_space<vmem>>, %arg4: memref<16x96xbf16, #tpu.memory_space<vmem>>) attributes {dimension_semantics = [#tpu.dimension_semantics<parallel>, #tpu.dimension_semantics<parallel>], iteration_bounds = array<i64: 1, 1>, scalar_prefetch = 0 : i64, scratch_operands = 0 : i64, tpu.core_type = #tpu.core_type<tc>, window_params = [{transform_indices = @transform_0, window_bounds = array<i64: 16, 32>}, {transform_indices = @transform_1, window_bounds = array<i64: 32, 96>}, {transform_indices = @transform_2, window_bounds = array<i64: 16, 96>}]} {
    %c0 = arith.constant 0 : index
    %c0_0 = arith.constant 0 : index
    %0 = vector.load %arg2[%c0, %c0_0] : memref<16x32xf32, #tpu.memory_space<vmem>>, vector<16x32xf32>
    %1 = arith.truncf %0 : vector<16x32xf32> to vector<16x32xbf16>
    %c0_1 = arith.constant 0 : index
    %c0_2 = arith.constant 0 : index
    %2 = vector.load %arg3[%c0_1, %c0_2] : memref<32x96xbf16, #tpu.memory_space<vmem>>, vector<32x96xbf16>
    %cst = arith.constant dense<0.000000e+00> : vector<16x96xf32>
    %3 = tpu.matmul %1, %2, %cst {dimension_numbers = #tpu.dot_dimension_numbers<[1], [0], [0], [1], [0, 0, 1, 1], [], []>} : vector<16x32xbf16>, vector<32x96xbf16>, vector<16x96xf32> -> vector<16x96xf32>
    %4 = arith.truncf %3 : vector<16x96xf32> to vector<16x96xbf16>
    %c0_3 = arith.constant 0 : index
    %c0_4 = arith.constant 0 : index
    %5 = vector.load %arg4[%c0_3, %c0_4] : memref<16x96xbf16, #tpu.memory_space<vmem>>, vector<16x96xbf16>
    tpu.vector_store %arg4[%c0_3, %c0_4], %4 {strides = array<i32>} : memref<16x96xbf16, #tpu.memory_space<vmem>>, vector<16x96xbf16>,
    return
  }
  func.func @transform_0(%arg0: i32, %arg1: i32) -> (i32, i32) {
    %c0_i32 = arith.constant 0 : i32
    %c0_i32_0 = arith.constant 0 : i32
    return %arg0, %c0_i32 : i32, i32
  }
  func.func @transform_1(%arg0: i32, %arg1: i32) -> (i32, i32) {
    %c0_i32 = arith.constant 0 : i32
    %c0_i32_0 = arith.constant 0 : i32
    return %c0_i32, %arg1 : i32, i32
  }
  func.func @transform_2(%arg0: i32, %arg1: i32) -> (i32, i32) {
    %c0_i32 = arith.constant 0 : i32
    return %arg0, %arg1 : i32, i32
  }
}

module attributes {stable_mosaic.version = 11 : i64} {
  func.func @_mm_add_ln_kernel(%arg0: i32, %arg1: memref<16x32xbf16, #tpu.memory_space<vmem>>, %arg2: memref<32x32xbf16, #tpu.memory_space<vmem>>, %arg3: memref<16x32xf32, #tpu.memory_space<vmem>>, %arg4: memref<1x32xf32, #tpu.memory_space<vmem>>, %arg5: memref<1x32xf32, #tpu.memory_space<vmem>>, %arg6: memref<16x32xf32, #tpu.memory_space<vmem>>) attributes {dimension_semantics = [#tpu.dimension_semantics<parallel>], iteration_bounds = array<i64: 1>, scalar_prefetch = 0 : i64, scratch_operands = 0 : i64, tpu.core_type = #tpu.core_type<tc>, window_params = [{transform_indices = @transform_0, window_bounds = array<i64: 16, 32>}, {pipeline_mode = #tpu.pipeline_mode<synchronous>, transform_indices = @transform_1, window_bounds = array<i64: 32, 32>}, {transform_indices = @transform_2, window_bounds = array<i64: 16, 32>}, {pipeline_mode = #tpu.pipeline_mode<synchronous>, transform_indices = @transform_3, window_bounds = array<i64: 1, 32>}, {pipeline_mode = #tpu.pipeline_mode<synchronous>, transform_indices = @transform_4, window_bounds = array<i64: 1, 32>}, {transform_indices = @transform_5, window_bounds = array<i64: 16, 32>}]} {
    %c0 = arith.constant 0 : index
    %c0_0 = arith.constant 0 : index
    %0 = vector.load %arg1[%c0, %c0_0] : memref<16x32xbf16, #tpu.memory_space<vmem>>, vector<16x32xbf16>
    %c0_1 = arith.constant 0 : index
    %c0_2 = arith.constant 0 : index
    %1 = vector.load %arg2[%c0_1, %c0_2] : memref<32x32xbf16, #tpu.memory_space<vmem>>, vector<32x32xbf16>
    %cst = arith.constant dense<0.000000e+00> : vector<16x32xf32>
    %2 = tpu.matmul %0, %1, %cst {dimension_numbers = #tpu.dot_dimension_numbers<[1], [0], [0], [1], [0, 0, 1, 1], [], []>} : vector<16x32xbf16>, vector<32x32xbf16>, vector<16x32xf32> -> vector<16x32xf32>
    %c0_3 = arith.constant 0 : index
    %c0_4 = arith.constant 0 : index
    %3 = vector.load %arg3[%c0_3, %c0_4] : memref<16x32xf32, #tpu.memory_space<vmem>>, vector<16x32xf32>
    %4 = arith.addf %2, %3 : vector<16x32xf32>
    %cst_5 = arith.constant dense<0.000000e+00> : vector<16xf32>
    %5 = vector.multi_reduction <add>, %4, %cst_5 [1] : vector<16x32xf32> to vector<16xf32>
    %6 = vector.shape_cast %5 : vector<16xf32> to vector<16x1xf32>
    %cst_6 = arith.constant 3.200000e+01 : f32
    %7 = vector.broadcast %cst_6 : f32 to vector<16x1xf32>
    %8 = arith.divf %6, %7 : vector<16x1xf32>
    %9 = vector.broadcast %8 : vector<16x1xf32> to vector<16x32xf32>
    %10 = arith.subf %4, %9 : vector<16x32xf32>
    %11 = arith.mulf %10, %10 : vector<16x32xf32>
    %cst_7 = arith.constant dense<0.000000e+00> : vector<16xf32>
    %12 = vector.multi_reduction <add>, %11, %cst_7 [1] : vector<16x32xf32> to vector<16xf32>
    %13 = vector.shape_cast %12 : vector<16xf32> to vector<16x1xf32>
    %cst_8 = arith.constant 3.200000e+01 : f32
    %14 = vector.broadcast %cst_8 : f32 to vector<16x1xf32>
    %15 = arith.divf %13, %14 : vector<16x1xf32>
    %16 = vector.broadcast %8 : vector<16x1xf32> to vector<16x32xf32>
    %17 = arith.subf %4, %16 : vector<16x32xf32>
    %cst_9 = arith.constant 9.99999997E-7 : f32
    %18 = vector.broadcast %cst_9 : f32 to vector<16x1xf32>
    %19 = arith.addf %15, %18 : vector<16x1xf32>
    %20 = math.rsqrt %19 : vector<16x1xf32>
    %21 = vector.broadcast %20 : vector<16x1xf32> to vector<16x32xf32>
    %22 = arith.mulf %17, %21 : vector<16x32xf32>
    %c0_10 = arith.constant 0 : index
    %c0_11 = arith.constant 0 : index
    %23 = vector.load %arg4[%c0_10, %c0_11] : memref<1x32xf32, #tpu.memory_space<vmem>>, vector<1x32xf32>
    %24 = vector.broadcast %23 : vector<1x32xf32> to vector<16x32xf32>
    %25 = arith.mulf %22, %24 : vector<16x32xf32>
    %c0_12 = arith.constant 0 : index
    %c0_13 = arith.constant 0 : index
    %26 = vector.load %arg5[%c0_12, %c0_13] : memref<1x32xf32, #tpu.memory_space<vmem>>, vector<1x32xf32>
    %27 = vector.broadcast %26 : vector<1x32xf32> to vector<16x32xf32>
    %28 = arith.addf %25, %27 : vector<16x32xf32>
    %c0_14 = arith.constant 0 : index
    %c0_15 = arith.constant 0 : index
    %29 = vector.load %arg6[%c0_14, %c0_15] : memref<16x32xf32, #tpu.memory_space<vmem>>, vector<16x32xf32>
    tpu.vector_store %arg6[%c0_14, %c0_15], %28 {strides = array<i32>} : memref<16x32xf32, #tpu.memory_space<vmem>>, vector<16x32xf32>,
    return
  }
  func.func @transform_0(%arg0: i32) -> (i32, i32) {
    %c0_i32 = arith.constant 0 : i32
    %c0_i32_0 = arith.constant 0 : i32
    return %arg0, %c0_i32 : i32, i32
  }
  func.func @transform_1(%arg0: i32) -> (i32, i32) {
    %c0_i32 = arith.constant 0 : i32
    %c0_i32_0 = arith.constant 0 : i32
    %c0_i32_1 = arith.constant 0 : i32
    return %c0_i32, %c0_i32_0 : i32, i32
  }
  func.func @transform_2(%arg0: i32) -> (i32, i32) {
    %c0_i32 = arith.constant 0 : i32
    %c0_i32_0 = arith.constant 0 : i32
    return %arg0, %c0_i32 : i32, i32
  }
  func.func @transform_3(%arg0: i32) -> (i32, i32) {
    %c0_i32 = arith.constant 0 : i32
    %c0_i32_0 = arith.constant 0 : i32
    %c0_i32_1 = arith.constant 0 : i32
    return %c0_i32, %c0_i32_0 : i32, i32
  }
  func.func @transform_4(%arg0: i32) -> (i32, i32) {
    %c0_i32 = arith.constant 0 : i32
    %c0_i32_0 = arith.constant 0 : i32
    %c0_i32_1 = arith.constant 0 : i32
    return %c0_i32, %c0_i32_0 : i32, i32
  }
  func.func @transform_5(%arg0: i32) -> (i32, i32) {
    %c0_i32 = arith.constant 0 : i32
    %c0_i32_0 = arith.constant 0 : i32
    return %arg0, %c0_i32 : i32, i32
  }
}

module attributes {stable_mosaic.version = 11 : i64} {
  func.func @_linear_kernel(%arg0: i32, %arg1: i32, %arg2: memref<16x32xf32, #tpu.memory_space<vmem>>, %arg3: memref<32x64xbf16, #tpu.memory_space<vmem>>, %arg4: memref<16x64xbf16, #tpu.memory_space<vmem>>) attributes {dimension_semantics = [#tpu.dimension_semantics<parallel>, #tpu.dimension_semantics<parallel>], iteration_bounds = array<i64: 1, 1>, scalar_prefetch = 0 : i64, scratch_operands = 0 : i64, tpu.core_type = #tpu.core_type<tc>, window_params = [{transform_indices = @transform_0, window_bounds = array<i64: 16, 32>}, {transform_indices = @transform_1, window_bounds = array<i64: 32, 64>}, {transform_indices = @transform_2, window_bounds = array<i64: 16, 64>}]} {
    %c0 = arith.constant 0 : index
    %c0_0 = arith.constant 0 : index
    %0 = vector.load %arg2[%c0, %c0_0] : memref<16x32xf32, #tpu.memory_space<vmem>>, vector<16x32xf32>
    %1 = arith.truncf %0 : vector<16x32xf32> to vector<16x32xbf16>
    %c0_1 = arith.constant 0 : index
    %c0_2 = arith.constant 0 : index
    %2 = vector.load %arg3[%c0_1, %c0_2] : memref<32x64xbf16, #tpu.memory_space<vmem>>, vector<32x64xbf16>
    %cst = arith.constant dense<0.000000e+00> : vector<16x64xf32>
    %3 = tpu.matmul %1, %2, %cst {dimension_numbers = #tpu.dot_dimension_numbers<[1], [0], [0], [1], [0, 0, 1, 1], [], []>} : vector<16x32xbf16>, vector<32x64xbf16>, vector<16x64xf32> -> vector<16x64xf32>
    %4 = arith.truncf %3 : vector<16x64xf32> to vector<16x64xbf16>
    %c0_3 = arith.constant 0 : index
    %c0_4 = arith.constant 0 : index
    %5 = vector.load %arg4[%c0_3, %c0_4] : memref<16x64xbf16, #tpu.memory_space<vmem>>, vector<16x64xbf16>
    tpu.vector_store %arg4[%c0_3, %c0_4], %4 {strides = array<i32>} : memref<16x64xbf16, #tpu.memory_space<vmem>>, vector<16x64xbf16>,
    return
  }
  func.func @transform_0(%arg0: i32, %arg1: i32) -> (i32, i32) {
    %c0_i32 = arith.constant 0 : i32
    %c0_i32_0 = arith.constant 0 : i32
    return %arg0, %c0_i32 : i32, i32
  }
  func.func @transform_1(%arg0: i32, %arg1: i32) -> (i32, i32) {
    %c0_i32 = arith.constant 0 : i32
    %c0_i32_0 = arith.constant 0 : i32
    return %c0_i32, %arg1 : i32, i32
  }
  func.func @transform_2(%arg0: i32, %arg1: i32) -> (i32, i32) {
    %c0_i32 = arith.constant 0 : i32
    return %arg0, %arg1 : i32, i32
  }
}

module attributes {stable_mosaic.version = 11 : i64} {
  func.func @_linear_kernel(%arg0: i32, %arg1: i32, %arg2: memref<16x32xf32, #tpu.memory_space<vmem>>, %arg3: memref<32x32xbf16, #tpu.memory_space<vmem>>, %arg4: memref<16x32xbf16, #tpu.memory_space<vmem>>) attributes {dimension_semantics = [#tpu.dimension_semantics<parallel>, #tpu.dimension_semantics<parallel>], iteration_bounds = array<i64: 1, 1>, scalar_prefetch = 0 : i64, scratch_operands = 0 : i64, tpu.core_type = #tpu.core_type<tc>, window_params = [{transform_indices = @transform_0, window_bounds = array<i64: 16, 32>}, {transform_indices = @transform_1, window_bounds = array<i64: 32, 32>}, {transform_indices = @transform_2, window_bounds = array<i64: 16, 32>}]} {
    %c0 = arith.constant 0 : index
    %c0_0 = arith.constant 0 : index
    %0 = vector.load %arg2[%c0, %c0_0] : memref<16x32xf32, #tpu.memory_space<vmem>>, vector<16x32xf32>
    %1 = arith.truncf %0 : vector<16x32xf32> to vector<16x32xbf16>
    %c0_1 = arith.constant 0 : index
    %c0_2 = arith.constant 0 : index
    %2 = vector.load %arg3[%c0_1, %c0_2] : memref<32x32xbf16, #tpu.memory_space<vmem>>, vector<32x32xbf16>
    %cst = arith.constant dense<0.000000e+00> : vector<16x32xf32>
    %3 = tpu.matmul %1, %2, %cst {dimension_numbers = #tpu.dot_dimension_numbers<[1], [0], [0], [1], [0, 0, 1, 1], [], []>} : vector<16x32xbf16>, vector<32x32xbf16>, vector<16x32xf32> -> vector<16x32xf32>
    %4 = arith.truncf %3 : vector<16x32xf32> to vector<16x32xbf16>
    %c0_3 = arith.constant 0 : index
    %c0_4 = arith.constant 0 : index
    %5 = vector.load %arg4[%c0_3, %c0_4] : memref<16x32xbf16, #tpu.memory_space<vmem>>, vector<16x32xbf16>
    tpu.vector_store %arg4[%c0_3, %c0_4], %4 {strides = array<i32>} : memref<16x32xbf16, #tpu.memory_space<vmem>>, vector<16x32xbf16>,
    return
  }
  func.func @transform_0(%arg0: i32, %arg1: i32) -> (i32, i32) {
    %c0_i32 = arith.constant 0 : i32
    %c0_i32_0 = arith.constant 0 : i32
    return %arg0, %c0_i32 : i32, i32
  }
  func.func @transform_1(%arg0: i32, %arg1: i32) -> (i32, i32) {
    %c0_i32 = arith.constant 0 : i32
    %c0_i32_0 = arith.constant 0 : i32
    return %c0_i32, %arg1 : i32, i32
  }
  func.func @transform_2(%arg0: i32, %arg1: i32) -> (i32, i32) {
    %c0_i32 = arith.constant 0 : i32
    return %arg0, %arg1 : i32, i32
  }
}

module attributes {stable_mosaic.version = 11 : i64} {
  func.func @_cross_attn_kernel(%arg0: i32, %arg1: memref<1x8x32xbf16, #tpu.memory_space<vmem>>, %arg2: memref<1x8x64xbf16, #tpu.memory_space<vmem>>, %arg3: memref<1x1x8xf32, #tpu.memory_space<vmem>>, %arg4: memref<1x8x32xbf16, #tpu.memory_space<vmem>>) attributes {dimension_semantics = [#tpu.dimension_semantics<parallel>], iteration_bounds = array<i64: 2>, scalar_prefetch = 0 : i64, scratch_operands = 0 : i64, tpu.core_type = #tpu.core_type<tc>, window_params = [{transform_indices = @transform_0, window_bounds = array<i64: 1, 8, 32>}, {transform_indices = @transform_1, window_bounds = array<i64: 1, 8, 64>}, {transform_indices = @transform_2, window_bounds = array<i64: 1, 1, 8>}, {transform_indices = @transform_3, window_bounds = array<i64: 1, 8, 32>}]} {
    %c0 = arith.constant 0 : index
    %c0_0 = arith.constant 0 : index
    %c0_1 = arith.constant 0 : index
    %0 = vector.load %arg1[%c0, %c0_0, %c0_1] : memref<1x8x32xbf16, #tpu.memory_space<vmem>>, vector<1x8x32xbf16>
    %1 = vector.shape_cast %0 : vector<1x8x32xbf16> to vector<8x32xbf16>
    %c0_2 = arith.constant 0 : index
    %c0_3 = arith.constant 0 : index
    %c0_4 = arith.constant 0 : index
    %2 = vector.load %arg2[%c0_2, %c0_3, %c0_4] : memref<1x8x64xbf16, #tpu.memory_space<vmem>>, vector<1x8x64xbf16>
    %3 = vector.shape_cast %2 : vector<1x8x64xbf16> to vector<8x64xbf16>
    %c0_5 = arith.constant 0 : index
    %c0_6 = arith.constant 0 : index
    %c0_7 = arith.constant 0 : index
    %4 = vector.load %arg3[%c0_5, %c0_6, %c0_7] : memref<1x1x8xf32, #tpu.memory_space<vmem>>, vector<1x1x8xf32>
    %5 = vector.shape_cast %4 : vector<1x1x8xf32> to vector<1x8xf32>
    %cst = arith.constant 0.000000e+00 : f32
    %6 = vector.broadcast %cst : f32 to vector<1x8xf32>
    %7 = arith.cmpf oeq, %5, %6 : vector<1x8xf32>
    %8 = vector.extract_strided_slice %1 {offsets = [0, 0], sizes = [8, 8], strides = [1, 1]} : vector<8x32xbf16> to vector<8x8xbf16>
    %9 = vector.extract_strided_slice %3 {offsets = [0, 0], sizes = [8, 8], strides = [1, 1]} : vector<8x64xbf16> to vector<8x8xbf16>
    %10 = vector.extract_strided_slice %3 {offsets = [0, 32], sizes = [8, 8], strides = [1, 1]} : vector<8x64xbf16> to vector<8x8xbf16>
    %cst_8 = arith.constant dense<0.000000e+00> : vector<8x8xf32>
    %11 = tpu.matmul %8, %9, %cst_8 {dimension_numbers = #tpu.dot_dimension_numbers<[1], [1], [0], [0], [0, 0, 1, 0], [], []>} : vector<8x8xbf16>, vector<8x8xbf16>, vector<8x8xf32> -> vector<8x8xf32>
    %cst_9 = arith.constant 0.353553385 : f32
    %12 = vector.broadcast %cst_9 : f32 to vector<8x8xf32>
    %13 = arith.mulf %11, %12 : vector<8x8xf32>
    %cst_10 = arith.constant -1.000000e+09 : f32
    %14 = vector.shape_cast %7 : vector<1x8xi1> to vector<1x8xi1>
    %15 = vector.broadcast %14 : vector<1x8xi1> to vector<8x8xi1>
    %16 = vector.broadcast %cst_10 : f32 to vector<8x8xf32>
    %17 = arith.select %15, %16, %13 : vector<8x8xi1>, vector<8x8xf32>
    %cst_11 = arith.constant dense<0xFF800000> : vector<8xf32>
    %18 = vector.multi_reduction <maximumf>, %17, %cst_11 [1] : vector<8x8xf32> to vector<8xf32>
    %19 = vector.shape_cast %18 : vector<8xf32> to vector<8x1xf32>
    %20 = vector.broadcast %19 : vector<8x1xf32> to vector<8x8xf32>
    %21 = arith.subf %17, %20 : vector<8x8xf32>
    %22 = math.exp %21 : vector<8x8xf32>
    %cst_12 = arith.constant dense<0.000000e+00> : vector<8xf32>
    %23 = vector.multi_reduction <add>, %22, %cst_12 [1] : vector<8x8xf32> to vector<8xf32>
    %24 = vector.shape_cast %23 : vector<8xf32> to vector<8x1xf32>
    %25 = tpu.reciprocal %24 {approx = true} : vector<8x1xf32> -> vector<8x1xf32>
    %26 = vector.broadcast %25 : vector<8x1xf32> to vector<8x8xf32>
    %27 = arith.mulf %22, %26 : vector<8x8xf32>
    %28 = arith.truncf %27 : vector<8x8xf32> to vector<8x8xbf16>
    %cst_13 = arith.constant dense<0.000000e+00> : vector<8x8xf32>
    %29 = tpu.matmul %28, %10, %cst_13 {dimension_numbers = #tpu.dot_dimension_numbers<[1], [0], [0], [1], [0, 0, 1, 1], [], []>} : vector<8x8xbf16>, vector<8x8xbf16>, vector<8x8xf32> -> vector<8x8xf32>
    %30 = vector.extract_strided_slice %1 {offsets = [0, 8], sizes = [8, 8], strides = [1, 1]} : vector<8x32xbf16> to vector<8x8xbf16>
    %31 = vector.extract_strided_slice %3 {offsets = [0, 8], sizes = [8, 8], strides = [1, 1]} : vector<8x64xbf16> to vector<8x8xbf16>
    %32 = vector.extract_strided_slice %3 {offsets = [0, 40], sizes = [8, 8], strides = [1, 1]} : vector<8x64xbf16> to vector<8x8xbf16>
    %cst_14 = arith.constant dense<0.000000e+00> : vector<8x8xf32>
    %33 = tpu.matmul %30, %31, %cst_14 {dimension_numbers = #tpu.dot_dimension_numbers<[1], [1], [0], [0], [0, 0, 1, 0], [], []>} : vector<8x8xbf16>, vector<8x8xbf16>, vector<8x8xf32> -> vector<8x8xf32>
    %cst_15 = arith.constant 0.353553385 : f32
    %34 = vector.broadcast %cst_15 : f32 to vector<8x8xf32>
    %35 = arith.mulf %33, %34 : vector<8x8xf32>
    %cst_16 = arith.constant -1.000000e+09 : f32
    %36 = vector.shape_cast %7 : vector<1x8xi1> to vector<1x8xi1>
    %37 = vector.broadcast %36 : vector<1x8xi1> to vector<8x8xi1>
    %38 = vector.broadcast %cst_16 : f32 to vector<8x8xf32>
    %39 = arith.select %37, %38, %35 : vector<8x8xi1>, vector<8x8xf32>
    %cst_17 = arith.constant dense<0xFF800000> : vector<8xf32>
    %40 = vector.multi_reduction <maximumf>, %39, %cst_17 [1] : vector<8x8xf32> to vector<8xf32>
    %41 = vector.shape_cast %40 : vector<8xf32> to vector<8x1xf32>
    %42 = vector.broadcast %41 : vector<8x1xf32> to vector<8x8xf32>
    %43 = arith.subf %39, %42 : vector<8x8xf32>
    %44 = math.exp %43 : vector<8x8xf32>
    %cst_18 = arith.constant dense<0.000000e+00> : vector<8xf32>
    %45 = vector.multi_reduction <add>, %44, %cst_18 [1] : vector<8x8xf32> to vector<8xf32>
    %46 = vector.shape_cast %45 : vector<8xf32> to vector<8x1xf32>
    %47 = tpu.reciprocal %46 {approx = true} : vector<8x1xf32> -> vector<8x1xf32>
    %48 = vector.broadcast %47 : vector<8x1xf32> to vector<8x8xf32>
    %49 = arith.mulf %44, %48 : vector<8x8xf32>
    %50 = arith.truncf %49 : vector<8x8xf32> to vector<8x8xbf16>
    %cst_19 = arith.constant dense<0.000000e+00> : vector<8x8xf32>
    %51 = tpu.matmul %50, %32, %cst_19 {dimension_numbers = #tpu.dot_dimension_numbers<[1], [0], [0], [1], [0, 0, 1, 1], [], []>} : vector<8x8xbf16>, vector<8x8xbf16>, vector<8x8xf32> -> vector<8x8xf32>
    %52 = vector.extract_strided_slice %1 {offsets = [0, 16], sizes = [8, 8], strides = [1, 1]} : vector<8x32xbf16> to vector<8x8xbf16>
    %53 = vector.extract_strided_slice %3 {offsets = [0, 16], sizes = [8, 8], strides = [1, 1]} : vector<8x64xbf16> to vector<8x8xbf16>
    %54 = vector.extract_strided_slice %3 {offsets = [0, 48], sizes = [8, 8], strides = [1, 1]} : vector<8x64xbf16> to vector<8x8xbf16>
    %cst_20 = arith.constant dense<0.000000e+00> : vector<8x8xf32>
    %55 = tpu.matmul %52, %53, %cst_20 {dimension_numbers = #tpu.dot_dimension_numbers<[1], [1], [0], [0], [0, 0, 1, 0], [], []>} : vector<8x8xbf16>, vector<8x8xbf16>, vector<8x8xf32> -> vector<8x8xf32>
    %cst_21 = arith.constant 0.353553385 : f32
    %56 = vector.broadcast %cst_21 : f32 to vector<8x8xf32>
    %57 = arith.mulf %55, %56 : vector<8x8xf32>
    %cst_22 = arith.constant -1.000000e+09 : f32
    %58 = vector.shape_cast %7 : vector<1x8xi1> to vector<1x8xi1>
    %59 = vector.broadcast %58 : vector<1x8xi1> to vector<8x8xi1>
    %60 = vector.broadcast %cst_22 : f32 to vector<8x8xf32>
    %61 = arith.select %59, %60, %57 : vector<8x8xi1>, vector<8x8xf32>
    %cst_23 = arith.constant dense<0xFF800000> : vector<8xf32>
    %62 = vector.multi_reduction <maximumf>, %61, %cst_23 [1] : vector<8x8xf32> to vector<8xf32>
    %63 = vector.shape_cast %62 : vector<8xf32> to vector<8x1xf32>
    %64 = vector.broadcast %63 : vector<8x1xf32> to vector<8x8xf32>
    %65 = arith.subf %61, %64 : vector<8x8xf32>
    %66 = math.exp %65 : vector<8x8xf32>
    %cst_24 = arith.constant dense<0.000000e+00> : vector<8xf32>
    %67 = vector.multi_reduction <add>, %66, %cst_24 [1] : vector<8x8xf32> to vector<8xf32>
    %68 = vector.shape_cast %67 : vector<8xf32> to vector<8x1xf32>
    %69 = tpu.reciprocal %68 {approx = true} : vector<8x1xf32> -> vector<8x1xf32>
    %70 = vector.broadcast %69 : vector<8x1xf32> to vector<8x8xf32>
    %71 = arith.mulf %66, %70 : vector<8x8xf32>
    %72 = arith.truncf %71 : vector<8x8xf32> to vector<8x8xbf16>
    %cst_25 = arith.constant dense<0.000000e+00> : vector<8x8xf32>
    %73 = tpu.matmul %72, %54, %cst_25 {dimension_numbers = #tpu.dot_dimension_numbers<[1], [0], [0], [1], [0, 0, 1, 1], [], []>} : vector<8x8xbf16>, vector<8x8xbf16>, vector<8x8xf32> -> vector<8x8xf32>
    %74 = vector.extract_strided_slice %1 {offsets = [0, 24], sizes = [8, 8], strides = [1, 1]} : vector<8x32xbf16> to vector<8x8xbf16>
    %75 = vector.extract_strided_slice %3 {offsets = [0, 24], sizes = [8, 8], strides = [1, 1]} : vector<8x64xbf16> to vector<8x8xbf16>
    %76 = vector.extract_strided_slice %3 {offsets = [0, 56], sizes = [8, 8], strides = [1, 1]} : vector<8x64xbf16> to vector<8x8xbf16>
    %cst_26 = arith.constant dense<0.000000e+00> : vector<8x8xf32>
    %77 = tpu.matmul %74, %75, %cst_26 {dimension_numbers = #tpu.dot_dimension_numbers<[1], [1], [0], [0], [0, 0, 1, 0], [], []>} : vector<8x8xbf16>, vector<8x8xbf16>, vector<8x8xf32> -> vector<8x8xf32>
    %cst_27 = arith.constant 0.353553385 : f32
    %78 = vector.broadcast %cst_27 : f32 to vector<8x8xf32>
    %79 = arith.mulf %77, %78 : vector<8x8xf32>
    %cst_28 = arith.constant -1.000000e+09 : f32
    %80 = vector.shape_cast %7 : vector<1x8xi1> to vector<1x8xi1>
    %81 = vector.broadcast %80 : vector<1x8xi1> to vector<8x8xi1>
    %82 = vector.broadcast %cst_28 : f32 to vector<8x8xf32>
    %83 = arith.select %81, %82, %79 : vector<8x8xi1>, vector<8x8xf32>
    %cst_29 = arith.constant dense<0xFF800000> : vector<8xf32>
    %84 = vector.multi_reduction <maximumf>, %83, %cst_29 [1] : vector<8x8xf32> to vector<8xf32>
    %85 = vector.shape_cast %84 : vector<8xf32> to vector<8x1xf32>
    %86 = vector.broadcast %85 : vector<8x1xf32> to vector<8x8xf32>
    %87 = arith.subf %83, %86 : vector<8x8xf32>
    %88 = math.exp %87 : vector<8x8xf32>
    %cst_30 = arith.constant dense<0.000000e+00> : vector<8xf32>
    %89 = vector.multi_reduction <add>, %88, %cst_30 [1] : vector<8x8xf32> to vector<8xf32>
    %90 = vector.shape_cast %89 : vector<8xf32> to vector<8x1xf32>
    %91 = tpu.reciprocal %90 {approx = true} : vector<8x1xf32> -> vector<8x1xf32>
    %92 = vector.broadcast %91 : vector<8x1xf32> to vector<8x8xf32>
    %93 = arith.mulf %88, %92 : vector<8x8xf32>
    %94 = arith.truncf %93 : vector<8x8xf32> to vector<8x8xbf16>
    %cst_31 = arith.constant dense<0.000000e+00> : vector<8x8xf32>
    %95 = tpu.matmul %94, %76, %cst_31 {dimension_numbers = #tpu.dot_dimension_numbers<[1], [0], [0], [1], [0, 0, 1, 1], [], []>} : vector<8x8xbf16>, vector<8x8xbf16>, vector<8x8xf32> -> vector<8x8xf32>
    %96 = tpu.concatenate %29, %51, %73, %95 in 1 : vector<8x8xf32>, vector<8x8xf32>, vector<8x8xf32>, vector<8x8xf32> -> vector<8x32xf32>
    %97 = arith.truncf %96 : vector<8x32xf32> to vector<8x32xbf16>
    %c0_32 = arith.constant 0 : index
    %c0_33 = arith.constant 0 : index
    %c0_34 = arith.constant 0 : index
    %98 = vector.load %arg4[%c0_32, %c0_33, %c0_34] : memref<1x8x32xbf16, #tpu.memory_space<vmem>>, vector<1x8x32xbf16>
    %99 = vector.shape_cast %98 : vector<1x8x32xbf16> to vector<8x32xbf16>
    %100 = vector.shape_cast %97 : vector<8x32xbf16> to vector<1x8x32xbf16>
    tpu.vector_store %arg4[%c0_32, %c0_33, %c0_34], %100 {strides = array<i32>} : memref<1x8x32xbf16, #tpu.memory_space<vmem>>, vector<1x8x32xbf16>,
    return
  }
  func.func @transform_0(%arg0: i32) -> (i32, i32, i32) {
    %c0_i32 = arith.constant 0 : i32
    %c0_i32_0 = arith.constant 0 : i32
    %c0_i32_1 = arith.constant 0 : i32
    return %arg0, %c0_i32, %c0_i32_0 : i32, i32, i32
  }
  func.func @transform_1(%arg0: i32) -> (i32, i32, i32) {
    %c0_i32 = arith.constant 0 : i32
    %c0_i32_0 = arith.constant 0 : i32
    %c0_i32_1 = arith.constant 0 : i32
    return %arg0, %c0_i32, %c0_i32_0 : i32, i32, i32
  }
  func.func @transform_2(%arg0: i32) -> (i32, i32, i32) {
    %c0_i32 = arith.constant 0 : i32
    %c0_i32_0 = arith.constant 0 : i32
    %c0_i32_1 = arith.constant 0 : i32
    return %arg0, %c0_i32, %c0_i32_0 : i32, i32, i32
  }
  func.func @transform_3(%arg0: i32) -> (i32, i32, i32) {
    %c0_i32 = arith.constant 0 : i32
    %c0_i32_0 = arith.constant 0 : i32
    %c0_i32_1 = arith.constant 0 : i32
    return %arg0, %c0_i32, %c0_i32_0 : i32, i32, i32
  }
}

module attributes {stable_mosaic.version = 11 : i64} {
  func.func @_mm_add_ln_kernel(%arg0: i32, %arg1: memref<16x32xbf16, #tpu.memory_space<vmem>>, %arg2: memref<32x32xbf16, #tpu.memory_space<vmem>>, %arg3: memref<16x32xf32, #tpu.memory_space<vmem>>, %arg4: memref<1x32xf32, #tpu.memory_space<vmem>>, %arg5: memref<1x32xf32, #tpu.memory_space<vmem>>, %arg6: memref<16x32xf32, #tpu.memory_space<vmem>>) attributes {dimension_semantics = [#tpu.dimension_semantics<parallel>], iteration_bounds = array<i64: 1>, scalar_prefetch = 0 : i64, scratch_operands = 0 : i64, tpu.core_type = #tpu.core_type<tc>, window_params = [{transform_indices = @transform_0, window_bounds = array<i64: 16, 32>}, {pipeline_mode = #tpu.pipeline_mode<synchronous>, transform_indices = @transform_1, window_bounds = array<i64: 32, 32>}, {transform_indices = @transform_2, window_bounds = array<i64: 16, 32>}, {pipeline_mode = #tpu.pipeline_mode<synchronous>, transform_indices = @transform_3, window_bounds = array<i64: 1, 32>}, {pipeline_mode = #tpu.pipeline_mode<synchronous>, transform_indices = @transform_4, window_bounds = array<i64: 1, 32>}, {transform_indices = @transform_5, window_bounds = array<i64: 16, 32>}]} {
    %c0 = arith.constant 0 : index
    %c0_0 = arith.constant 0 : index
    %0 = vector.load %arg1[%c0, %c0_0] : memref<16x32xbf16, #tpu.memory_space<vmem>>, vector<16x32xbf16>
    %c0_1 = arith.constant 0 : index
    %c0_2 = arith.constant 0 : index
    %1 = vector.load %arg2[%c0_1, %c0_2] : memref<32x32xbf16, #tpu.memory_space<vmem>>, vector<32x32xbf16>
    %cst = arith.constant dense<0.000000e+00> : vector<16x32xf32>
    %2 = tpu.matmul %0, %1, %cst {dimension_numbers = #tpu.dot_dimension_numbers<[1], [0], [0], [1], [0, 0, 1, 1], [], []>} : vector<16x32xbf16>, vector<32x32xbf16>, vector<16x32xf32> -> vector<16x32xf32>
    %c0_3 = arith.constant 0 : index
    %c0_4 = arith.constant 0 : index
    %3 = vector.load %arg3[%c0_3, %c0_4] : memref<16x32xf32, #tpu.memory_space<vmem>>, vector<16x32xf32>
    %4 = arith.addf %2, %3 : vector<16x32xf32>
    %cst_5 = arith.constant dense<0.000000e+00> : vector<16xf32>
    %5 = vector.multi_reduction <add>, %4, %cst_5 [1] : vector<16x32xf32> to vector<16xf32>
    %6 = vector.shape_cast %5 : vector<16xf32> to vector<16x1xf32>
    %cst_6 = arith.constant 3.200000e+01 : f32
    %7 = vector.broadcast %cst_6 : f32 to vector<16x1xf32>
    %8 = arith.divf %6, %7 : vector<16x1xf32>
    %9 = vector.broadcast %8 : vector<16x1xf32> to vector<16x32xf32>
    %10 = arith.subf %4, %9 : vector<16x32xf32>
    %11 = arith.mulf %10, %10 : vector<16x32xf32>
    %cst_7 = arith.constant dense<0.000000e+00> : vector<16xf32>
    %12 = vector.multi_reduction <add>, %11, %cst_7 [1] : vector<16x32xf32> to vector<16xf32>
    %13 = vector.shape_cast %12 : vector<16xf32> to vector<16x1xf32>
    %cst_8 = arith.constant 3.200000e+01 : f32
    %14 = vector.broadcast %cst_8 : f32 to vector<16x1xf32>
    %15 = arith.divf %13, %14 : vector<16x1xf32>
    %16 = vector.broadcast %8 : vector<16x1xf32> to vector<16x32xf32>
    %17 = arith.subf %4, %16 : vector<16x32xf32>
    %cst_9 = arith.constant 9.99999997E-7 : f32
    %18 = vector.broadcast %cst_9 : f32 to vector<16x1xf32>
    %19 = arith.addf %15, %18 : vector<16x1xf32>
    %20 = math.rsqrt %19 : vector<16x1xf32>
    %21 = vector.broadcast %20 : vector<16x1xf32> to vector<16x32xf32>
    %22 = arith.mulf %17, %21 : vector<16x32xf32>
    %c0_10 = arith.constant 0 : index
    %c0_11 = arith.constant 0 : index
    %23 = vector.load %arg4[%c0_10, %c0_11] : memref<1x32xf32, #tpu.memory_space<vmem>>, vector<1x32xf32>
    %24 = vector.broadcast %23 : vector<1x32xf32> to vector<16x32xf32>
    %25 = arith.mulf %22, %24 : vector<16x32xf32>
    %c0_12 = arith.constant 0 : index
    %c0_13 = arith.constant 0 : index
    %26 = vector.load %arg5[%c0_12, %c0_13] : memref<1x32xf32, #tpu.memory_space<vmem>>, vector<1x32xf32>
    %27 = vector.broadcast %26 : vector<1x32xf32> to vector<16x32xf32>
    %28 = arith.addf %25, %27 : vector<16x32xf32>
    %c0_14 = arith.constant 0 : index
    %c0_15 = arith.constant 0 : index
    %29 = vector.load %arg6[%c0_14, %c0_15] : memref<16x32xf32, #tpu.memory_space<vmem>>, vector<16x32xf32>
    tpu.vector_store %arg6[%c0_14, %c0_15], %28 {strides = array<i32>} : memref<16x32xf32, #tpu.memory_space<vmem>>, vector<16x32xf32>,
    return
  }
  func.func @transform_0(%arg0: i32) -> (i32, i32) {
    %c0_i32 = arith.constant 0 : i32
    %c0_i32_0 = arith.constant 0 : i32
    return %arg0, %c0_i32 : i32, i32
  }
  func.func @transform_1(%arg0: i32) -> (i32, i32) {
    %c0_i32 = arith.constant 0 : i32
    %c0_i32_0 = arith.constant 0 : i32
    %c0_i32_1 = arith.constant 0 : i32
    return %c0_i32, %c0_i32_0 : i32, i32
  }
  func.func @transform_2(%arg0: i32) -> (i32, i32) {
    %c0_i32 = arith.constant 0 : i32
    %c0_i32_0 = arith.constant 0 : i32
    return %arg0, %c0_i32 : i32, i32
  }
  func.func @transform_3(%arg0: i32) -> (i32, i32) {
    %c0_i32 = arith.constant 0 : i32
    %c0_i32_0 = arith.constant 0 : i32
    %c0_i32_1 = arith.constant 0 : i32
    return %c0_i32, %c0_i32_0 : i32, i32
  }
  func.func @transform_4(%arg0: i32) -> (i32, i32) {
    %c0_i32 = arith.constant 0 : i32
    %c0_i32_0 = arith.constant 0 : i32
    %c0_i32_1 = arith.constant 0 : i32
    return %c0_i32, %c0_i32_0 : i32, i32
  }
  func.func @transform_5(%arg0: i32) -> (i32, i32) {
    %c0_i32 = arith.constant 0 : i32
    %c0_i32_0 = arith.constant 0 : i32
    return %arg0, %c0_i32 : i32, i32
  }
}

module attributes {stable_mosaic.version = 11 : i64} {
  func.func @_linear_kernel(%arg0: i32, %arg1: i32, %arg2: memref<16x32xf32, #tpu.memory_space<vmem>>, %arg3: memref<32x64xbf16, #tpu.memory_space<vmem>>, %arg4: memref<1x64xf32, #tpu.memory_space<vmem>>, %arg5: memref<16x64xbf16, #tpu.memory_space<vmem>>) attributes {dimension_semantics = [#tpu.dimension_semantics<parallel>, #tpu.dimension_semantics<parallel>], iteration_bounds = array<i64: 1, 1>, scalar_prefetch = 0 : i64, scratch_operands = 0 : i64, tpu.core_type = #tpu.core_type<tc>, window_params = [{transform_indices = @transform_0, window_bounds = array<i64: 16, 32>}, {transform_indices = @transform_1, window_bounds = array<i64: 32, 64>}, {transform_indices = @transform_2, window_bounds = array<i64: 1, 64>}, {transform_indices = @transform_3, window_bounds = array<i64: 16, 64>}]} {
    %c0 = arith.constant 0 : index
    %c0_0 = arith.constant 0 : index
    %0 = vector.load %arg2[%c0, %c0_0] : memref<16x32xf32, #tpu.memory_space<vmem>>, vector<16x32xf32>
    %1 = arith.truncf %0 : vector<16x32xf32> to vector<16x32xbf16>
    %c0_1 = arith.constant 0 : index
    %c0_2 = arith.constant 0 : index
    %2 = vector.load %arg3[%c0_1, %c0_2] : memref<32x64xbf16, #tpu.memory_space<vmem>>, vector<32x64xbf16>
    %cst = arith.constant dense<0.000000e+00> : vector<16x64xf32>
    %3 = tpu.matmul %1, %2, %cst {dimension_numbers = #tpu.dot_dimension_numbers<[1], [0], [0], [1], [0, 0, 1, 1], [], []>} : vector<16x32xbf16>, vector<32x64xbf16>, vector<16x64xf32> -> vector<16x64xf32>
    %c0_3 = arith.constant 0 : index
    %c0_4 = arith.constant 0 : index
    %4 = vector.load %arg4[%c0_3, %c0_4] : memref<1x64xf32, #tpu.memory_space<vmem>>, vector<1x64xf32>
    %5 = vector.broadcast %4 : vector<1x64xf32> to vector<16x64xf32>
    %6 = arith.addf %3, %5 : vector<16x64xf32>
    %cst_5 = arith.constant 0.000000e+00 : f32
    %7 = vector.broadcast %cst_5 : f32 to vector<16x64xf32>
    %8 = arith.maximumf %6, %7 : vector<16x64xf32>
    %9 = arith.truncf %8 : vector<16x64xf32> to vector<16x64xbf16>
    %c0_6 = arith.constant 0 : index
    %c0_7 = arith.constant 0 : index
    %10 = vector.load %arg5[%c0_6, %c0_7] : memref<16x64xbf16, #tpu.memory_space<vmem>>, vector<16x64xbf16>
    tpu.vector_store %arg5[%c0_6, %c0_7], %9 {strides = array<i32>} : memref<16x64xbf16, #tpu.memory_space<vmem>>, vector<16x64xbf16>,
    return
  }
  func.func @transform_0(%arg0: i32, %arg1: i32) -> (i32, i32) {
    %c0_i32 = arith.constant 0 : i32
    %c0_i32_0 = arith.constant 0 : i32
    return %arg0, %c0_i32 : i32, i32
  }
  func.func @transform_1(%arg0: i32, %arg1: i32) -> (i32, i32) {
    %c0_i32 = arith.constant 0 : i32
    %c0_i32_0 = arith.constant 0 : i32
    return %c0_i32, %arg1 : i32, i32
  }
  func.func @transform_2(%arg0: i32, %arg1: i32) -> (i32, i32) {
    %c0_i32 = arith.constant 0 : i32
    %c0_i32_0 = arith.constant 0 : i32
    return %c0_i32, %arg1 : i32, i32
  }
  func.func @transform_3(%arg0: i32, %arg1: i32) -> (i32, i32) {
    %c0_i32 = arith.constant 0 : i32
    return %arg0, %arg1 : i32, i32
  }
}

module attributes {stable_mosaic.version = 11 : i64} {
  func.func @_mm_add_ln_kernel(%arg0: i32, %arg1: memref<16x64xbf16, #tpu.memory_space<vmem>>, %arg2: memref<64x32xbf16, #tpu.memory_space<vmem>>, %arg3: memref<1x32xf32, #tpu.memory_space<vmem>>, %arg4: memref<16x32xf32, #tpu.memory_space<vmem>>, %arg5: memref<1x32xf32, #tpu.memory_space<vmem>>, %arg6: memref<1x32xf32, #tpu.memory_space<vmem>>, %arg7: memref<16x32xf32, #tpu.memory_space<vmem>>) attributes {dimension_semantics = [#tpu.dimension_semantics<parallel>], iteration_bounds = array<i64: 1>, scalar_prefetch = 0 : i64, scratch_operands = 0 : i64, tpu.core_type = #tpu.core_type<tc>, window_params = [{transform_indices = @transform_0, window_bounds = array<i64: 16, 64>}, {pipeline_mode = #tpu.pipeline_mode<synchronous>, transform_indices = @transform_1, window_bounds = array<i64: 64, 32>}, {pipeline_mode = #tpu.pipeline_mode<synchronous>, transform_indices = @transform_2, window_bounds = array<i64: 1, 32>}, {transform_indices = @transform_3, window_bounds = array<i64: 16, 32>}, {pipeline_mode = #tpu.pipeline_mode<synchronous>, transform_indices = @transform_4, window_bounds = array<i64: 1, 32>}, {pipeline_mode = #tpu.pipeline_mode<synchronous>, transform_indices = @transform_5, window_bounds = array<i64: 1, 32>}, {transform_indices = @transform_6, window_bounds = array<i64: 16, 32>}]} {
    %c0 = arith.constant 0 : index
    %c0_0 = arith.constant 0 : index
    %0 = vector.load %arg1[%c0, %c0_0] : memref<16x64xbf16, #tpu.memory_space<vmem>>, vector<16x64xbf16>
    %c0_1 = arith.constant 0 : index
    %c0_2 = arith.constant 0 : index
    %1 = vector.load %arg2[%c0_1, %c0_2] : memref<64x32xbf16, #tpu.memory_space<vmem>>, vector<64x32xbf16>
    %cst = arith.constant dense<0.000000e+00> : vector<16x32xf32>
    %2 = tpu.matmul %0, %1, %cst {dimension_numbers = #tpu.dot_dimension_numbers<[1], [0], [0], [1], [0, 0, 1, 1], [], []>} : vector<16x64xbf16>, vector<64x32xbf16>, vector<16x32xf32> -> vector<16x32xf32>
    %c0_3 = arith.constant 0 : index
    %c0_4 = arith.constant 0 : index
    %3 = vector.load %arg3[%c0_3, %c0_4] : memref<1x32xf32, #tpu.memory_space<vmem>>, vector<1x32xf32>
    %4 = vector.broadcast %3 : vector<1x32xf32> to vector<16x32xf32>
    %5 = arith.addf %2, %4 : vector<16x32xf32>
    %c0_5 = arith.constant 0 : index
    %c0_6 = arith.constant 0 : index
    %6 = vector.load %arg4[%c0_5, %c0_6] : memref<16x32xf32, #tpu.memory_space<vmem>>, vector<16x32xf32>
    %7 = arith.addf %5, %6 : vector<16x32xf32>
    %cst_7 = arith.constant dense<0.000000e+00> : vector<16xf32>
    %8 = vector.multi_reduction <add>, %7, %cst_7 [1] : vector<16x32xf32> to vector<16xf32>
    %9 = vector.shape_cast %8 : vector<16xf32> to vector<16x1xf32>
    %cst_8 = arith.constant 3.200000e+01 : f32
    %10 = vector.broadcast %cst_8 : f32 to vector<16x1xf32>
    %11 = arith.divf %9, %10 : vector<16x1xf32>
    %12 = vector.broadcast %11 : vector<16x1xf32> to vector<16x32xf32>
    %13 = arith.subf %7, %12 : vector<16x32xf32>
    %14 = arith.mulf %13, %13 : vector<16x32xf32>
    %cst_9 = arith.constant dense<0.000000e+00> : vector<16xf32>
    %15 = vector.multi_reduction <add>, %14, %cst_9 [1] : vector<16x32xf32> to vector<16xf32>
    %16 = vector.shape_cast %15 : vector<16xf32> to vector<16x1xf32>
    %cst_10 = arith.constant 3.200000e+01 : f32
    %17 = vector.broadcast %cst_10 : f32 to vector<16x1xf32>
    %18 = arith.divf %16, %17 : vector<16x1xf32>
    %19 = vector.broadcast %11 : vector<16x1xf32> to vector<16x32xf32>
    %20 = arith.subf %7, %19 : vector<16x32xf32>
    %cst_11 = arith.constant 9.99999997E-7 : f32
    %21 = vector.broadcast %cst_11 : f32 to vector<16x1xf32>
    %22 = arith.addf %18, %21 : vector<16x1xf32>
    %23 = math.rsqrt %22 : vector<16x1xf32>
    %24 = vector.broadcast %23 : vector<16x1xf32> to vector<16x32xf32>
    %25 = arith.mulf %20, %24 : vector<16x32xf32>
    %c0_12 = arith.constant 0 : index
    %c0_13 = arith.constant 0 : index
    %26 = vector.load %arg5[%c0_12, %c0_13] : memref<1x32xf32, #tpu.memory_space<vmem>>, vector<1x32xf32>
    %27 = vector.broadcast %26 : vector<1x32xf32> to vector<16x32xf32>
    %28 = arith.mulf %25, %27 : vector<16x32xf32>
    %c0_14 = arith.constant 0 : index
    %c0_15 = arith.constant 0 : index
    %29 = vector.load %arg6[%c0_14, %c0_15] : memref<1x32xf32, #tpu.memory_space<vmem>>, vector<1x32xf32>
    %30 = vector.broadcast %29 : vector<1x32xf32> to vector<16x32xf32>
    %31 = arith.addf %28, %30 : vector<16x32xf32>
    %c0_16 = arith.constant 0 : index
    %c0_17 = arith.constant 0 : index
    %32 = vector.load %arg7[%c0_16, %c0_17] : memref<16x32xf32, #tpu.memory_space<vmem>>, vector<16x32xf32>
    tpu.vector_store %arg7[%c0_16, %c0_17], %31 {strides = array<i32>} : memref<16x32xf32, #tpu.memory_space<vmem>>, vector<16x32xf32>,
    return
  }
  func.func @transform_0(%arg0: i32) -> (i32, i32) {
    %c0_i32 = arith.constant 0 : i32
    %c0_i32_0 = arith.constant 0 : i32
    return %arg0, %c0_i32 : i32, i32
  }
  func.func @transform_1(%arg0: i32) -> (i32, i32) {
    %c0_i32 = arith.constant 0 : i32
    %c0_i32_0 = arith.constant 0 : i32
    %c0_i32_1 = arith.constant 0 : i32
    return %c0_i32, %c0_i32_0 : i32, i32
  }
  func.func @transform_2(%arg0: i32) -> (i32, i32) {
    %c0_i32 = arith.constant 0 : i32
    %c0_i32_0 = arith.constant 0 : i32
    %c0_i32_1 = arith.constant 0 : i32
    return %c0_i32, %c0_i32_0 : i32, i32
  }
  func.func @transform_3(%arg0: i32) -> (i32, i32) {
    %c0_i32 = arith.constant 0 : i32
    %c0_i32_0 = arith.constant 0 : i32
    return %arg0, %c0_i32 : i32, i32
  }
  func.func @transform_4(%arg0: i32) -> (i32, i32) {
    %c0_i32 = arith.constant 0 : i32
    %c0_i32_0 = arith.constant 0 : i32
    %c0_i32_1 = arith.constant 0 : i32
    return %c0_i32, %c0_i32_0 : i32, i32
  }
  func.func @transform_5(%arg0: i32) -> (i32, i32) {
    %c0_i32 = arith.constant 0 : i32
    %c0_i32_0 = arith.constant 0 : i32
    %c0_i32_1 = arith.constant 0 : i32
    return %c0_i32, %c0_i32_0 : i32, i32
  }
  func.func @transform_6(%arg0: i32) -> (i32, i32) {
    %c0_i32 = arith.constant 0 : i32
    %c0_i32_0 = arith.constant 0 : i32
    return %arg0, %c0_i32 : i32, i32
  }
}

module attributes {stable_mosaic.version = 11 : i64} {
  func.func @_linear_kernel(%arg0: i32, %arg1: i32, %arg2: memref<16x32xf32, #tpu.memory_space<vmem>>, %arg3: memref<32x32xbf16, #tpu.memory_space<vmem>>, %arg4: memref<16x32xbf16, #tpu.memory_space<vmem>>) attributes {dimension_semantics = [#tpu.dimension_semantics<parallel>, #tpu.dimension_semantics<parallel>], iteration_bounds = array<i64: 1, 1>, scalar_prefetch = 0 : i64, scratch_operands = 0 : i64, tpu.core_type = #tpu.core_type<tc>, window_params = [{transform_indices = @transform_0, window_bounds = array<i64: 16, 32>}, {transform_indices = @transform_1, window_bounds = array<i64: 32, 32>}, {transform_indices = @transform_2, window_bounds = array<i64: 16, 32>}]} {
    %c0 = arith.constant 0 : index
    %c0_0 = arith.constant 0 : index
    %0 = vector.load %arg2[%c0, %c0_0] : memref<16x32xf32, #tpu.memory_space<vmem>>, vector<16x32xf32>
    %1 = arith.truncf %0 : vector<16x32xf32> to vector<16x32xbf16>
    %c0_1 = arith.constant 0 : index
    %c0_2 = arith.constant 0 : index
    %2 = vector.load %arg3[%c0_1, %c0_2] : memref<32x32xbf16, #tpu.memory_space<vmem>>, vector<32x32xbf16>
    %cst = arith.constant dense<0.000000e+00> : vector<16x32xf32>
    %3 = tpu.matmul %1, %2, %cst {dimension_numbers = #tpu.dot_dimension_numbers<[1], [0], [0], [1], [0, 0, 1, 1], [], []>} : vector<16x32xbf16>, vector<32x32xbf16>, vector<16x32xf32> -> vector<16x32xf32>
    %4 = arith.truncf %3 : vector<16x32xf32> to vector<16x32xbf16>
    %c0_3 = arith.constant 0 : index
    %c0_4 = arith.constant 0 : index
    %5 = vector.load %arg4[%c0_3, %c0_4] : memref<16x32xbf16, #tpu.memory_space<vmem>>, vector<16x32xbf16>
    tpu.vector_store %arg4[%c0_3, %c0_4], %4 {strides = array<i32>} : memref<16x32xbf16, #tpu.memory_space<vmem>>, vector<16x32xbf16>,
    return
  }
  func.func @transform_0(%arg0: i32, %arg1: i32) -> (i32, i32) {
    %c0_i32 = arith.constant 0 : i32
    %c0_i32_0 = arith.constant 0 : i32
    return %arg0, %c0_i32 : i32, i32
  }
  func.func @transform_1(%arg0: i32, %arg1: i32) -> (i32, i32) {
    %c0_i32 = arith.constant 0 : i32
    %c0_i32_0 = arith.constant 0 : i32
    return %c0_i32, %arg1 : i32, i32
  }
  func.func @transform_2(%arg0: i32, %arg1: i32) -> (i32, i32) {
    %c0_i32 = arith.constant 0 : i32
    return %arg0, %arg1 : i32, i32
  }
}

module attributes {stable_mosaic.version = 11 : i64} {
  func.func @_self_attn_kernel(%arg0: i32, %arg1: memref<1x8x96xbf16, #tpu.memory_space<vmem>>, %arg2: memref<1x8x8xf32, #tpu.memory_space<vmem>>, %arg3: memref<1x8x32xbf16, #tpu.memory_space<vmem>>) attributes {dimension_semantics = [#tpu.dimension_semantics<parallel>], iteration_bounds = array<i64: 2>, scalar_prefetch = 0 : i64, scratch_operands = 0 : i64, tpu.core_type = #tpu.core_type<tc>, window_params = [{transform_indices = @transform_0, window_bounds = array<i64: 1, 8, 96>}, {transform_indices = @transform_1, window_bounds = array<i64: 1, 8, 8>}, {transform_indices = @transform_2, window_bounds = array<i64: 1, 8, 32>}]} {
    %c0 = arith.constant 0 : index
    %c0_0 = arith.constant 0 : index
    %c0_1 = arith.constant 0 : index
    %0 = vector.load %arg1[%c0, %c0_0, %c0_1] : memref<1x8x96xbf16, #tpu.memory_space<vmem>>, vector<1x8x96xbf16>
    %1 = vector.shape_cast %0 : vector<1x8x96xbf16> to vector<8x96xbf16>
    %c0_2 = arith.constant 0 : index
    %c0_3 = arith.constant 0 : index
    %c0_4 = arith.constant 0 : index
    %2 = vector.load %arg2[%c0_2, %c0_3, %c0_4] : memref<1x8x8xf32, #tpu.memory_space<vmem>>, vector<1x8x8xf32>
    %3 = vector.shape_cast %2 : vector<1x8x8xf32> to vector<8x8xf32>
    %cst = arith.constant 0.000000e+00 : f32
    %4 = vector.broadcast %cst : f32 to vector<8x8xf32>
    %5 = arith.cmpf oeq, %3, %4 : vector<8x8xf32>
    %6 = vector.extract_strided_slice %1 {offsets = [0, 0], sizes = [8, 8], strides = [1, 1]} : vector<8x96xbf16> to vector<8x8xbf16>
    %7 = vector.extract_strided_slice %1 {offsets = [0, 32], sizes = [8, 8], strides = [1, 1]} : vector<8x96xbf16> to vector<8x8xbf16>
    %8 = vector.extract_strided_slice %1 {offsets = [0, 64], sizes = [8, 8], strides = [1, 1]} : vector<8x96xbf16> to vector<8x8xbf16>
    %cst_5 = arith.constant dense<0.000000e+00> : vector<8x8xf32>
    %9 = tpu.matmul %6, %7, %cst_5 {dimension_numbers = #tpu.dot_dimension_numbers<[1], [1], [0], [0], [0, 0, 1, 0], [], []>} : vector<8x8xbf16>, vector<8x8xbf16>, vector<8x8xf32> -> vector<8x8xf32>
    %cst_6 = arith.constant 0.353553385 : f32
    %10 = vector.broadcast %cst_6 : f32 to vector<8x8xf32>
    %11 = arith.mulf %9, %10 : vector<8x8xf32>
    %cst_7 = arith.constant -1.000000e+09 : f32
    %12 = vector.broadcast %cst_7 : f32 to vector<8x8xf32>
    %13 = arith.select %5, %12, %11 : vector<8x8xi1>, vector<8x8xf32>
    %cst_8 = arith.constant dense<0xFF800000> : vector<8xf32>
    %14 = vector.multi_reduction <maximumf>, %13, %cst_8 [1] : vector<8x8xf32> to vector<8xf32>
    %15 = vector.shape_cast %14 : vector<8xf32> to vector<8x1xf32>
    %16 = vector.broadcast %15 : vector<8x1xf32> to vector<8x8xf32>
    %17 = arith.subf %13, %16 : vector<8x8xf32>
    %18 = math.exp %17 : vector<8x8xf32>
    %cst_9 = arith.constant dense<0.000000e+00> : vector<8xf32>
    %19 = vector.multi_reduction <add>, %18, %cst_9 [1] : vector<8x8xf32> to vector<8xf32>
    %20 = vector.shape_cast %19 : vector<8xf32> to vector<8x1xf32>
    %21 = tpu.reciprocal %20 {approx = true} : vector<8x1xf32> -> vector<8x1xf32>
    %22 = vector.broadcast %21 : vector<8x1xf32> to vector<8x8xf32>
    %23 = arith.mulf %18, %22 : vector<8x8xf32>
    %24 = arith.truncf %23 : vector<8x8xf32> to vector<8x8xbf16>
    %cst_10 = arith.constant dense<0.000000e+00> : vector<8x8xf32>
    %25 = tpu.matmul %24, %8, %cst_10 {dimension_numbers = #tpu.dot_dimension_numbers<[1], [0], [0], [1], [0, 0, 1, 1], [], []>} : vector<8x8xbf16>, vector<8x8xbf16>, vector<8x8xf32> -> vector<8x8xf32>
    %26 = vector.extract_strided_slice %1 {offsets = [0, 8], sizes = [8, 8], strides = [1, 1]} : vector<8x96xbf16> to vector<8x8xbf16>
    %27 = vector.extract_strided_slice %1 {offsets = [0, 40], sizes = [8, 8], strides = [1, 1]} : vector<8x96xbf16> to vector<8x8xbf16>
    %28 = vector.extract_strided_slice %1 {offsets = [0, 72], sizes = [8, 8], strides = [1, 1]} : vector<8x96xbf16> to vector<8x8xbf16>
    %cst_11 = arith.constant dense<0.000000e+00> : vector<8x8xf32>
    %29 = tpu.matmul %26, %27, %cst_11 {dimension_numbers = #tpu.dot_dimension_numbers<[1], [1], [0], [0], [0, 0, 1, 0], [], []>} : vector<8x8xbf16>, vector<8x8xbf16>, vector<8x8xf32> -> vector<8x8xf32>
    %cst_12 = arith.constant 0.353553385 : f32
    %30 = vector.broadcast %cst_12 : f32 to vector<8x8xf32>
    %31 = arith.mulf %29, %30 : vector<8x8xf32>
    %cst_13 = arith.constant -1.000000e+09 : f32
    %32 = vector.broadcast %cst_13 : f32 to vector<8x8xf32>
    %33 = arith.select %5, %32, %31 : vector<8x8xi1>, vector<8x8xf32>
    %cst_14 = arith.constant dense<0xFF800000> : vector<8xf32>
    %34 = vector.multi_reduction <maximumf>, %33, %cst_14 [1] : vector<8x8xf32> to vector<8xf32>
    %35 = vector.shape_cast %34 : vector<8xf32> to vector<8x1xf32>
    %36 = vector.broadcast %35 : vector<8x1xf32> to vector<8x8xf32>
    %37 = arith.subf %33, %36 : vector<8x8xf32>
    %38 = math.exp %37 : vector<8x8xf32>
    %cst_15 = arith.constant dense<0.000000e+00> : vector<8xf32>
    %39 = vector.multi_reduction <add>, %38, %cst_15 [1] : vector<8x8xf32> to vector<8xf32>
    %40 = vector.shape_cast %39 : vector<8xf32> to vector<8x1xf32>
    %41 = tpu.reciprocal %40 {approx = true} : vector<8x1xf32> -> vector<8x1xf32>
    %42 = vector.broadcast %41 : vector<8x1xf32> to vector<8x8xf32>
    %43 = arith.mulf %38, %42 : vector<8x8xf32>
    %44 = arith.truncf %43 : vector<8x8xf32> to vector<8x8xbf16>
    %cst_16 = arith.constant dense<0.000000e+00> : vector<8x8xf32>
    %45 = tpu.matmul %44, %28, %cst_16 {dimension_numbers = #tpu.dot_dimension_numbers<[1], [0], [0], [1], [0, 0, 1, 1], [], []>} : vector<8x8xbf16>, vector<8x8xbf16>, vector<8x8xf32> -> vector<8x8xf32>
    %46 = vector.extract_strided_slice %1 {offsets = [0, 16], sizes = [8, 8], strides = [1, 1]} : vector<8x96xbf16> to vector<8x8xbf16>
    %47 = vector.extract_strided_slice %1 {offsets = [0, 48], sizes = [8, 8], strides = [1, 1]} : vector<8x96xbf16> to vector<8x8xbf16>
    %48 = vector.extract_strided_slice %1 {offsets = [0, 80], sizes = [8, 8], strides = [1, 1]} : vector<8x96xbf16> to vector<8x8xbf16>
    %cst_17 = arith.constant dense<0.000000e+00> : vector<8x8xf32>
    %49 = tpu.matmul %46, %47, %cst_17 {dimension_numbers = #tpu.dot_dimension_numbers<[1], [1], [0], [0], [0, 0, 1, 0], [], []>} : vector<8x8xbf16>, vector<8x8xbf16>, vector<8x8xf32> -> vector<8x8xf32>
    %cst_18 = arith.constant 0.353553385 : f32
    %50 = vector.broadcast %cst_18 : f32 to vector<8x8xf32>
    %51 = arith.mulf %49, %50 : vector<8x8xf32>
    %cst_19 = arith.constant -1.000000e+09 : f32
    %52 = vector.broadcast %cst_19 : f32 to vector<8x8xf32>
    %53 = arith.select %5, %52, %51 : vector<8x8xi1>, vector<8x8xf32>
    %cst_20 = arith.constant dense<0xFF800000> : vector<8xf32>
    %54 = vector.multi_reduction <maximumf>, %53, %cst_20 [1] : vector<8x8xf32> to vector<8xf32>
    %55 = vector.shape_cast %54 : vector<8xf32> to vector<8x1xf32>
    %56 = vector.broadcast %55 : vector<8x1xf32> to vector<8x8xf32>
    %57 = arith.subf %53, %56 : vector<8x8xf32>
    %58 = math.exp %57 : vector<8x8xf32>
    %cst_21 = arith.constant dense<0.000000e+00> : vector<8xf32>
    %59 = vector.multi_reduction <add>, %58, %cst_21 [1] : vector<8x8xf32> to vector<8xf32>
    %60 = vector.shape_cast %59 : vector<8xf32> to vector<8x1xf32>
    %61 = tpu.reciprocal %60 {approx = true} : vector<8x1xf32> -> vector<8x1xf32>
    %62 = vector.broadcast %61 : vector<8x1xf32> to vector<8x8xf32>
    %63 = arith.mulf %58, %62 : vector<8x8xf32>
    %64 = arith.truncf %63 : vector<8x8xf32> to vector<8x8xbf16>
    %cst_22 = arith.constant dense<0.000000e+00> : vector<8x8xf32>
    %65 = tpu.matmul %64, %48, %cst_22 {dimension_numbers = #tpu.dot_dimension_numbers<[1], [0], [0], [1], [0, 0, 1, 1], [], []>} : vector<8x8xbf16>, vector<8x8xbf16>, vector<8x8xf32> -> vector<8x8xf32>
    %66 = vector.extract_strided_slice %1 {offsets = [0, 24], sizes = [8, 8], strides = [1, 1]} : vector<8x96xbf16> to vector<8x8xbf16>
    %67 = vector.extract_strided_slice %1 {offsets = [0, 56], sizes = [8, 8], strides = [1, 1]} : vector<8x96xbf16> to vector<8x8xbf16>
    %68 = vector.extract_strided_slice %1 {offsets = [0, 88], sizes = [8, 8], strides = [1, 1]} : vector<8x96xbf16> to vector<8x8xbf16>
    %cst_23 = arith.constant dense<0.000000e+00> : vector<8x8xf32>
    %69 = tpu.matmul %66, %67, %cst_23 {dimension_numbers = #tpu.dot_dimension_numbers<[1], [1], [0], [0], [0, 0, 1, 0], [], []>} : vector<8x8xbf16>, vector<8x8xbf16>, vector<8x8xf32> -> vector<8x8xf32>
    %cst_24 = arith.constant 0.353553385 : f32
    %70 = vector.broadcast %cst_24 : f32 to vector<8x8xf32>
    %71 = arith.mulf %69, %70 : vector<8x8xf32>
    %cst_25 = arith.constant -1.000000e+09 : f32
    %72 = vector.broadcast %cst_25 : f32 to vector<8x8xf32>
    %73 = arith.select %5, %72, %71 : vector<8x8xi1>, vector<8x8xf32>
    %cst_26 = arith.constant dense<0xFF800000> : vector<8xf32>
    %74 = vector.multi_reduction <maximumf>, %73, %cst_26 [1] : vector<8x8xf32> to vector<8xf32>
    %75 = vector.shape_cast %74 : vector<8xf32> to vector<8x1xf32>
    %76 = vector.broadcast %75 : vector<8x1xf32> to vector<8x8xf32>
    %77 = arith.subf %73, %76 : vector<8x8xf32>
    %78 = math.exp %77 : vector<8x8xf32>
    %cst_27 = arith.constant dense<0.000000e+00> : vector<8xf32>
    %79 = vector.multi_reduction <add>, %78, %cst_27 [1] : vector<8x8xf32> to vector<8xf32>
    %80 = vector.shape_cast %79 : vector<8xf32> to vector<8x1xf32>
    %81 = tpu.reciprocal %80 {approx = true} : vector<8x1xf32> -> vector<8x1xf32>
    %82 = vector.broadcast %81 : vector<8x1xf32> to vector<8x8xf32>
    %83 = arith.mulf %78, %82 : vector<8x8xf32>
    %84 = arith.truncf %83 : vector<8x8xf32> to vector<8x8xbf16>
    %cst_28 = arith.constant dense<0.000000e+00> : vector<8x8xf32>
    %85 = tpu.matmul %84, %68, %cst_28 {dimension_numbers = #tpu.dot_dimension_numbers<[1], [0], [0], [1], [0, 0, 1, 1], [], []>} : vector<8x8xbf16>, vector<8x8xbf16>, vector<8x8xf32> -> vector<8x8xf32>
    %86 = tpu.concatenate %25, %45, %65, %85 in 1 : vector<8x8xf32>, vector<8x8xf32>, vector<8x8xf32>, vector<8x8xf32> -> vector<8x32xf32>
    %87 = arith.truncf %86 : vector<8x32xf32> to vector<8x32xbf16>
    %c0_29 = arith.constant 0 : index
    %c0_30 = arith.constant 0 : index
    %c0_31 = arith.constant 0 : index
    %88 = vector.load %arg3[%c0_29, %c0_30, %c0_31] : memref<1x8x32xbf16, #tpu.memory_space<vmem>>, vector<1x8x32xbf16>
    %89 = vector.shape_cast %88 : vector<1x8x32xbf16> to vector<8x32xbf16>
    %90 = vector.shape_cast %87 : vector<8x32xbf16> to vector<1x8x32xbf16>
    tpu.vector_store %arg3[%c0_29, %c0_30, %c0_31], %90 {strides = array<i32>} : memref<1x8x32xbf16, #tpu.memory_space<vmem>>, vector<1x8x32xbf16>,
    return
  }
  func.func @transform_0(%arg0: i32) -> (i32, i32, i32) {
    %c0_i32 = arith.constant 0 : i32
    %c0_i32_0 = arith.constant 0 : i32
    %c0_i32_1 = arith.constant 0 : i32
    return %arg0, %c0_i32, %c0_i32_0 : i32, i32, i32
  }
  func.func @transform_1(%arg0: i32) -> (i32, i32, i32) {
    %c0_i32 = arith.constant 0 : i32
    %c0_i32_0 = arith.constant 0 : i32
    %c0_i32_1 = arith.constant 0 : i32
    return %arg0, %c0_i32, %c0_i32_0 : i32, i32, i32
  }
  func.func @transform_2(%arg0: i32) -> (i32, i32, i32) {
    %c0_i32 = arith.constant 0 : i32
    %c0_i32_0 = arith.constant 0 : i32
    %c0_i32_1 = arith.constant 0 : i32
    return %arg0, %c0_i32, %c0_i32_0 : i32, i32, i32
  }
}

module attributes {stable_mosaic.version = 11 : i64} {
  func.func @_linear_kernel(%arg0: i32, %arg1: i32, %arg2: memref<16x32xf32, #tpu.memory_space<vmem>>, %arg3: memref<32x64xbf16, #tpu.memory_space<vmem>>, %arg4: memref<16x64xbf16, #tpu.memory_space<vmem>>) attributes {dimension_semantics = [#tpu.dimension_semantics<parallel>, #tpu.dimension_semantics<parallel>], iteration_bounds = array<i64: 1, 1>, scalar_prefetch = 0 : i64, scratch_operands = 0 : i64, tpu.core_type = #tpu.core_type<tc>, window_params = [{transform_indices = @transform_0, window_bounds = array<i64: 16, 32>}, {transform_indices = @transform_1, window_bounds = array<i64: 32, 64>}, {transform_indices = @transform_2, window_bounds = array<i64: 16, 64>}]} {
    %c0 = arith.constant 0 : index
    %c0_0 = arith.constant 0 : index
    %0 = vector.load %arg2[%c0, %c0_0] : memref<16x32xf32, #tpu.memory_space<vmem>>, vector<16x32xf32>
    %1 = arith.truncf %0 : vector<16x32xf32> to vector<16x32xbf16>
    %c0_1 = arith.constant 0 : index
    %c0_2 = arith.constant 0 : index
    %2 = vector.load %arg3[%c0_1, %c0_2] : memref<32x64xbf16, #tpu.memory_space<vmem>>, vector<32x64xbf16>
    %cst = arith.constant dense<0.000000e+00> : vector<16x64xf32>
    %3 = tpu.matmul %1, %2, %cst {dimension_numbers = #tpu.dot_dimension_numbers<[1], [0], [0], [1], [0, 0, 1, 1], [], []>} : vector<16x32xbf16>, vector<32x64xbf16>, vector<16x64xf32> -> vector<16x64xf32>
    %4 = arith.truncf %3 : vector<16x64xf32> to vector<16x64xbf16>
    %c0_3 = arith.constant 0 : index
    %c0_4 = arith.constant 0 : index
    %5 = vector.load %arg4[%c0_3, %c0_4] : memref<16x64xbf16, #tpu.memory_space<vmem>>, vector<16x64xbf16>
    tpu.vector_store %arg4[%c0_3, %c0_4], %4 {strides = array<i32>} : memref<16x64xbf16, #tpu.memory_space<vmem>>, vector<16x64xbf16>,
    return
  }
  func.func @transform_0(%arg0: i32, %arg1: i32) -> (i32, i32) {
    %c0_i32 = arith.constant 0 : i32
    %c0_i32_0 = arith.constant 0 : i32
    return %arg0, %c0_i32 : i32, i32
  }
  func.func @transform_1(%arg0: i32, %arg1: i32) -> (i32, i32) {
    %c0_i32 = arith.constant 0 : i32
    %c0_i32_0 = arith.constant 0 : i32
    return %c0_i32, %arg1 : i32, i32
  }
  func.func @transform_2(%arg0: i32, %arg1: i32) -> (i32, i32) {
    %c0_i32 = arith.constant 0 : i32
    return %arg0, %arg1 : i32, i32
  }
}

module attributes {stable_mosaic.version = 11 : i64} {
  func.func @_mm_add_ln_kernel(%arg0: i32, %arg1: memref<16x64xbf16, #tpu.memory_space<vmem>>, %arg2: memref<64x32xbf16, #tpu.memory_space<vmem>>, %arg3: memref<1x32xf32, #tpu.memory_space<vmem>>, %arg4: memref<16x32xf32, #tpu.memory_space<vmem>>, %arg5: memref<1x32xf32, #tpu.memory_space<vmem>>, %arg6: memref<1x32xf32, #tpu.memory_space<vmem>>, %arg7: memref<16x32xf32, #tpu.memory_space<vmem>>) attributes {dimension_semantics = [#tpu.dimension_semantics<parallel>], iteration_bounds = array<i64: 1>, scalar_prefetch = 0 : i64, scratch_operands = 0 : i64, tpu.core_type = #tpu.core_type<tc>, window_params = [{transform_indices = @transform_0, window_bounds = array<i64: 16, 64>}, {pipeline_mode = #tpu.pipeline_mode<synchronous>, transform_indices = @transform_1, window_bounds = array<i64: 64, 32>}, {pipeline_mode = #tpu.pipeline_mode<synchronous>, transform_indices = @transform_2, window_bounds = array<i64: 1, 32>}, {transform_indices = @transform_3, window_bounds = array<i64: 16, 32>}, {pipeline_mode = #tpu.pipeline_mode<synchronous>, transform_indices = @transform_4, window_bounds = array<i64: 1, 32>}, {pipeline_mode = #tpu.pipeline_mode<synchronous>, transform_indices = @transform_5, window_bounds = array<i64: 1, 32>}, {transform_indices = @transform_6, window_bounds = array<i64: 16, 32>}]} {
    %c0 = arith.constant 0 : index
    %c0_0 = arith.constant 0 : index
    %0 = vector.load %arg1[%c0, %c0_0] : memref<16x64xbf16, #tpu.memory_space<vmem>>, vector<16x64xbf16>
    %c0_1 = arith.constant 0 : index
    %c0_2 = arith.constant 0 : index
    %1 = vector.load %arg2[%c0_1, %c0_2] : memref<64x32xbf16, #tpu.memory_space<vmem>>, vector<64x32xbf16>
    %cst = arith.constant dense<0.000000e+00> : vector<16x32xf32>
    %2 = tpu.matmul %0, %1, %cst {dimension_numbers = #tpu.dot_dimension_numbers<[1], [0], [0], [1], [0, 0, 1, 1], [], []>} : vector<16x64xbf16>, vector<64x32xbf16>, vector<16x32xf32> -> vector<16x32xf32>
    %c0_3 = arith.constant 0 : index
    %c0_4 = arith.constant 0 : index
    %3 = vector.load %arg3[%c0_3, %c0_4] : memref<1x32xf32, #tpu.memory_space<vmem>>, vector<1x32xf32>
    %4 = vector.broadcast %3 : vector<1x32xf32> to vector<16x32xf32>
    %5 = arith.addf %2, %4 : vector<16x32xf32>
    %c0_5 = arith.constant 0 : index
    %c0_6 = arith.constant 0 : index
    %6 = vector.load %arg4[%c0_5, %c0_6] : memref<16x32xf32, #tpu.memory_space<vmem>>, vector<16x32xf32>
    %7 = arith.addf %5, %6 : vector<16x32xf32>
    %cst_7 = arith.constant dense<0.000000e+00> : vector<16xf32>
    %8 = vector.multi_reduction <add>, %7, %cst_7 [1] : vector<16x32xf32> to vector<16xf32>
    %9 = vector.shape_cast %8 : vector<16xf32> to vector<16x1xf32>
    %cst_8 = arith.constant 3.200000e+01 : f32
    %10 = vector.broadcast %cst_8 : f32 to vector<16x1xf32>
    %11 = arith.divf %9, %10 : vector<16x1xf32>
    %12 = vector.broadcast %11 : vector<16x1xf32> to vector<16x32xf32>
    %13 = arith.subf %7, %12 : vector<16x32xf32>
    %14 = arith.mulf %13, %13 : vector<16x32xf32>
    %cst_9 = arith.constant dense<0.000000e+00> : vector<16xf32>
    %15 = vector.multi_reduction <add>, %14, %cst_9 [1] : vector<16x32xf32> to vector<16xf32>
    %16 = vector.shape_cast %15 : vector<16xf32> to vector<16x1xf32>
    %cst_10 = arith.constant 3.200000e+01 : f32
    %17 = vector.broadcast %cst_10 : f32 to vector<16x1xf32>
    %18 = arith.divf %16, %17 : vector<16x1xf32>
    %19 = vector.broadcast %11 : vector<16x1xf32> to vector<16x32xf32>
    %20 = arith.subf %7, %19 : vector<16x32xf32>
    %cst_11 = arith.constant 9.99999997E-7 : f32
    %21 = vector.broadcast %cst_11 : f32 to vector<16x1xf32>
    %22 = arith.addf %18, %21 : vector<16x1xf32>
    %23 = math.rsqrt %22 : vector<16x1xf32>
    %24 = vector.broadcast %23 : vector<16x1xf32> to vector<16x32xf32>
    %25 = arith.mulf %20, %24 : vector<16x32xf32>
    %c0_12 = arith.constant 0 : index
    %c0_13 = arith.constant 0 : index
    %26 = vector.load %arg5[%c0_12, %c0_13] : memref<1x32xf32, #tpu.memory_space<vmem>>, vector<1x32xf32>
    %27 = vector.broadcast %26 : vector<1x32xf32> to vector<16x32xf32>
    %28 = arith.mulf %25, %27 : vector<16x32xf32>
    %c0_14 = arith.constant 0 : index
    %c0_15 = arith.constant 0 : index
    %29 = vector.load %arg6[%c0_14, %c0_15] : memref<1x32xf32, #tpu.memory_space<vmem>>, vector<1x32xf32>
    %30 = vector.broadcast %29 : vector<1x32xf32> to vector<16x32xf32>
    %31 = arith.addf %28, %30 : vector<16x32xf32>
    %c0_16 = arith.constant 0 : index
    %c0_17 = arith.constant 0 : index
    %32 = vector.load %arg7[%c0_16, %c0_17] : memref<16x32xf32, #tpu.memory_space<vmem>>, vector<16x32xf32>
    tpu.vector_store %arg7[%c0_16, %c0_17], %31 {strides = array<i32>} : memref<16x32xf32, #tpu.memory_space<vmem>>, vector<16x32xf32>,
    return
  }
  func.func @transform_0(%arg0: i32) -> (i32, i32) {
    %c0_i32 = arith.constant 0 : i32
    %c0_i32_0 = arith.constant 0 : i32
    return %arg0, %c0_i32 : i32, i32
  }
  func.func @transform_1(%arg0: i32) -> (i32, i32) {
    %c0_i32 = arith.constant 0 : i32
    %c0_i32_0 = arith.constant 0 : i32
    %c0_i32_1 = arith.constant 0 : i32
    return %c0_i32, %c0_i32_0 : i32, i32
  }
  func.func @transform_2(%arg0: i32) -> (i32, i32) {
    %c0_i32 = arith.constant 0 : i32
    %c0_i32_0 = arith.constant 0 : i32
    %c0_i32_1 = arith.constant 0 : i32
    return %c0_i32, %c0_i32_0 : i32, i32
  }
  func.func @transform_3(%arg0: i32) -> (i32, i32) {
    %c0_i32 = arith.constant 0 : i32
    %c0_i32_0 = arith.constant 0 : i32
    return %arg0, %c0_i32 : i32, i32
  }
  func.func @transform_4(%arg0: i32) -> (i32, i32) {
    %c0_i32 = arith.constant 0 : i32
    %c0_i32_0 = arith.constant 0 : i32
    %c0_i32_1 = arith.constant 0 : i32
    return %c0_i32, %c0_i32_0 : i32, i32
  }
  func.func @transform_5(%arg0: i32) -> (i32, i32) {
    %c0_i32 = arith.constant 0 : i32
    %c0_i32_0 = arith.constant 0 : i32
    %c0_i32_1 = arith.constant 0 : i32
    return %c0_i32, %c0_i32_0 : i32, i32
  }
  func.func @transform_6(%arg0: i32) -> (i32, i32) {
    %c0_i32 = arith.constant 0 : i32
    %c0_i32_0 = arith.constant 0 : i32
    return %arg0, %c0_i32 : i32, i32
  }
}

module attributes {stable_mosaic.version = 11 : i64} {
  func.func @_mm_add_ln_kernel(%arg0: i32, %arg1: memref<16x32xbf16, #tpu.memory_space<vmem>>, %arg2: memref<32x32xbf16, #tpu.memory_space<vmem>>, %arg3: memref<16x32xf32, #tpu.memory_space<vmem>>, %arg4: memref<1x32xf32, #tpu.memory_space<vmem>>, %arg5: memref<1x32xf32, #tpu.memory_space<vmem>>, %arg6: memref<16x32xf32, #tpu.memory_space<vmem>>) attributes {dimension_semantics = [#tpu.dimension_semantics<parallel>], iteration_bounds = array<i64: 1>, scalar_prefetch = 0 : i64, scratch_operands = 0 : i64, tpu.core_type = #tpu.core_type<tc>, window_params = [{transform_indices = @transform_0, window_bounds = array<i64: 16, 32>}, {pipeline_mode = #tpu.pipeline_mode<synchronous>, transform_indices = @transform_1, window_bounds = array<i64: 32, 32>}, {transform_indices = @transform_2, window_bounds = array<i64: 16, 32>}, {pipeline_mode = #tpu.pipeline_mode<synchronous>, transform_indices = @transform_3, window_bounds = array<i64: 1, 32>}, {pipeline_mode = #tpu.pipeline_mode<synchronous>, transform_indices = @transform_4, window_bounds = array<i64: 1, 32>}, {transform_indices = @transform_5, window_bounds = array<i64: 16, 32>}]} {
    %c0 = arith.constant 0 : index
    %c0_0 = arith.constant 0 : index
    %0 = vector.load %arg1[%c0, %c0_0] : memref<16x32xbf16, #tpu.memory_space<vmem>>, vector<16x32xbf16>
    %c0_1 = arith.constant 0 : index
    %c0_2 = arith.constant 0 : index
    %1 = vector.load %arg2[%c0_1, %c0_2] : memref<32x32xbf16, #tpu.memory_space<vmem>>, vector<32x32xbf16>
    %cst = arith.constant dense<0.000000e+00> : vector<16x32xf32>
    %2 = tpu.matmul %0, %1, %cst {dimension_numbers = #tpu.dot_dimension_numbers<[1], [0], [0], [1], [0, 0, 1, 1], [], []>} : vector<16x32xbf16>, vector<32x32xbf16>, vector<16x32xf32> -> vector<16x32xf32>
    %c0_3 = arith.constant 0 : index
    %c0_4 = arith.constant 0 : index
    %3 = vector.load %arg3[%c0_3, %c0_4] : memref<16x32xf32, #tpu.memory_space<vmem>>, vector<16x32xf32>
    %4 = arith.addf %2, %3 : vector<16x32xf32>
    %cst_5 = arith.constant dense<0.000000e+00> : vector<16xf32>
    %5 = vector.multi_reduction <add>, %4, %cst_5 [1] : vector<16x32xf32> to vector<16xf32>
    %6 = vector.shape_cast %5 : vector<16xf32> to vector<16x1xf32>
    %cst_6 = arith.constant 3.200000e+01 : f32
    %7 = vector.broadcast %cst_6 : f32 to vector<16x1xf32>
    %8 = arith.divf %6, %7 : vector<16x1xf32>
    %9 = vector.broadcast %8 : vector<16x1xf32> to vector<16x32xf32>
    %10 = arith.subf %4, %9 : vector<16x32xf32>
    %11 = arith.mulf %10, %10 : vector<16x32xf32>
    %cst_7 = arith.constant dense<0.000000e+00> : vector<16xf32>
    %12 = vector.multi_reduction <add>, %11, %cst_7 [1] : vector<16x32xf32> to vector<16xf32>
    %13 = vector.shape_cast %12 : vector<16xf32> to vector<16x1xf32>
    %cst_8 = arith.constant 3.200000e+01 : f32
    %14 = vector.broadcast %cst_8 : f32 to vector<16x1xf32>
    %15 = arith.divf %13, %14 : vector<16x1xf32>
    %16 = vector.broadcast %8 : vector<16x1xf32> to vector<16x32xf32>
    %17 = arith.subf %4, %16 : vector<16x32xf32>
    %cst_9 = arith.constant 9.99999997E-7 : f32
    %18 = vector.broadcast %cst_9 : f32 to vector<16x1xf32>
    %19 = arith.addf %15, %18 : vector<16x1xf32>
    %20 = math.rsqrt %19 : vector<16x1xf32>
    %21 = vector.broadcast %20 : vector<16x1xf32> to vector<16x32xf32>
    %22 = arith.mulf %17, %21 : vector<16x32xf32>
    %c0_10 = arith.constant 0 : index
    %c0_11 = arith.constant 0 : index
    %23 = vector.load %arg4[%c0_10, %c0_11] : memref<1x32xf32, #tpu.memory_space<vmem>>, vector<1x32xf32>
    %24 = vector.broadcast %23 : vector<1x32xf32> to vector<16x32xf32>
    %25 = arith.mulf %22, %24 : vector<16x32xf32>
    %c0_12 = arith.constant 0 : index
    %c0_13 = arith.constant 0 : index
    %26 = vector.load %arg5[%c0_12, %c0_13] : memref<1x32xf32, #tpu.memory_space<vmem>>, vector<1x32xf32>
    %27 = vector.broadcast %26 : vector<1x32xf32> to vector<16x32xf32>
    %28 = arith.addf %25, %27 : vector<16x32xf32>
    %c0_14 = arith.constant 0 : index
    %c0_15 = arith.constant 0 : index
    %29 = vector.load %arg6[%c0_14, %c0_15] : memref<16x32xf32, #tpu.memory_space<vmem>>, vector<16x32xf32>
    tpu.vector_store %arg6[%c0_14, %c0_15], %28 {strides = array<i32>} : memref<16x32xf32, #tpu.memory_space<vmem>>, vector<16x32xf32>,
    return
  }
  func.func @transform_0(%arg0: i32) -> (i32, i32) {
    %c0_i32 = arith.constant 0 : i32
    %c0_i32_0 = arith.constant 0 : i32
    return %arg0, %c0_i32 : i32, i32
  }
  func.func @transform_1(%arg0: i32) -> (i32, i32) {
    %c0_i32 = arith.constant 0 : i32
    %c0_i32_0 = arith.constant 0 : i32
    %c0_i32_1 = arith.constant 0 : i32
    return %c0_i32, %c0_i32_0 : i32, i32
  }
  func.func @transform_2(%arg0: i32) -> (i32, i32) {
    %c0_i32 = arith.constant 0 : i32
    %c0_i32_0 = arith.constant 0 : i32
    return %arg0, %c0_i32 : i32, i32
  }
  func.func @transform_3(%arg0: i32) -> (i32, i32) {
    %c0_i32 = arith.constant 0 : i32
    %c0_i32_0 = arith.constant 0 : i32
    %c0_i32_1 = arith.constant 0 : i32
    return %c0_i32, %c0_i32_0 : i32, i32
  }
  func.func @transform_4(%arg0: i32) -> (i32, i32) {
    %c0_i32 = arith.constant 0 : i32
    %c0_i32_0 = arith.constant 0 : i32
    %c0_i32_1 = arith.constant 0 : i32
    return %c0_i32, %c0_i32_0 : i32, i32
  }
  func.func @transform_5(%arg0: i32) -> (i32, i32) {
    %c0_i32 = arith.constant 0 : i32
    %c0_i32_0 = arith.constant 0 : i32
    return %arg0, %c0_i32 : i32, i32
  }
}

</mosaic_0001>

<bundles_post_ra>
// kernel: decoder_forward.19
= control target key start
LH: loop header
LB: loop body
LE: loop exit
PB: predicated region body
PF: predicated region fallthrough
CT: control target
= control target key end

     0   :  { %s348_s15 = smov 0   ;;  %s384_s0 = inlined_call_operand.vmem [shape: f32[16,32], index: 0, kind: input, shape index: {}]   ;;  %s385_s1 = inlined_call_operand.vmem [shape: f32[8,32], index: 1, kind: input, shape index: {}]   ;;  %s386_s2 = inlined_call_operand.vmem [shape: f32[1,32], index: 2, kind: input, shape index: {}]   ;;  %s387_s3 = inlined_call_operand.vmem [shape: f32[1,32], index: 3, kind: input, shape index: {}]   ;;  %s388_s4 = inlined_call_operand.vmem [shape: f32[16,32], index: 4, kind: output, shape index: {}]  }
   0x1 LB: > { %s290_s16 = sadd.s32 4294967295, %s320_s15   ;;  %p294_p0 = scmp.ge.s32.totalorder %s320_s15, 1  ;;  %s320_s15 = sphi %s348_s15, %s14_s15  }
   0x2   : > { %p161_p1 = scmp.lt.s32.totalorder %s320_s15, 3 }
   0x4   : > { %p162_p2 = pnand %p294_p0, %p161_p1 }
   0x5   : > { %p185_p3 = scmp.lt.s32.totalorder (!%p162_p2), %s290_s16, 1 }
   0x6   : > { %165 = sbr.rel (%p162_p2) target bundleno = 286 (0x11e), region = 36 }
   0xb   : > { %s390_s16 = smov (!%p185_p3, %s290_s16), 1  ;;  %v194_v0 = vld [vmem:[%s385_s1] sm:$0xff]  ;;  %vm196_vm0 = vcmask 261120   ;;  %v322_v4 = vmov 32.0  }
   0xc   : > { %s295_s17 = sshll.u32 %s390_s16, 3  ;;  %310 = vrcp.f32 %v322_v4  ;;  %v308_v25 = vld [vmem:[%s386_s2] ss:$0 sm:$0xff] }
   0xd   : > { %s188_s22 = scalar_lea.vmem %s384_s0, %s295_s17  ;;  %v309_v27 = vld [vmem:[%s387_s3] ss:$0 sm:$0xff]  ;;  %s192_s29 = scalar_lea.vmem %s388_s4, %s295_s17 }
   0xe   : > { %v193_v1 = vld [vmem:[%s188_s22] sm:$0xff] }
   0xf   : > { %v195_v2 = vadd.f32 %v194_v0, %v193_v1 }
  0x11   : > { %v197_v3 = vsel %vm196_vm0, %v195_v2, 0.0 }
  0x12   : > { %198 = vadd.xlane.f32.xlu0 %v197_v3  ;;  %v311_v5 = vpop.eup %310 }
  0x13   : > { %v201_v6 = vmul.f32 32.0, %v311_v5  ;;  %vm205_vm1 = vweird.f32 %v311_v5 }
  0x15   : > { %v202_v7 = vsub.f32 1.0, %v201_v6 }
  0x17   : > { %v203_v8 = vmul.f32 %v311_v5, %v202_v7 }
  0x19   : > { %v204_v9 = vadd.f32 %v311_v5, %v203_v8 }
  0x1b   : > { %v206_v10 = vsel %vm205_vm1, %v311_v5, %v204_v9 }
  0x85   : > { %v199_v11 = vpop.xlane.xlu0 %198 }
  0x86   : > { %v207_v12 = vmul.f32 %v206_v10, %v199_v11 }
  0x88   : > { %v208_v13 = vsub.f32 %v195_v2, %v207_v12 }
  0x8a   : > { %v209_v14 = vmul.f32 %v208_v13, %v208_v13 }
  0x8c   : > { %v210_v15 = vsel %vm196_vm0, %v209_v14, 0.0 }
  0x8d   : > { %211 = vadd.xlane.f32.xlu0 %v210_v15 }
 0x100   : > { %v212_v16 = vpop.xlane.xlu0 %211 }
 0x101   : > { %v213_v17 = vmul.f32 %v212_v16, %v206_v10 }
 0x103   : > { %v214_v18 = vadd.f32 1e-06, %v213_v17 }
 0x105   : > { %312 = vrsqrt.f32 %v214_v18  ;;  %vm221_vm3 = vweird.f32 %v214_v18 }
 0x10b   : > { %v313_v19 = vpop.eup %312 }
 0x10c   : > { %v216_v20 = vmul.f32 %v313_v19, %v214_v18  ;;  %vm222_vm2 = vweird.f32 %v313_v19 }
 0x10d   : > { %vm223_vm4 = vmor %vm221_vm3, %vm222_vm2 }
 0x10e   : > { %v217_v21 = vmul.f32 %v313_v19, %v216_v20 }
 0x110   : > { %v218_v22 = vmul.f32 0.5, %v217_v21 }
 0x112   : > { %v219_v23 = vsub.f32 1.5, %v218_v22 }
 0x114   : > { %v220_v24 = vmul.f32 %v313_v19, %v219_v23 }
 0x116   : > { %v224_v26 = vsel %vm223_vm4, %v313_v19, %v220_v24 }
 0x117   : > { %v225_v28 = vmul.f32 %v224_v26, %v208_v13 }
 0x119   : > { %v230_v29 = vmul.f32 %v308_v25, %v225_v28 }
 0x11b   : > { %v235_v30 = vadd.f32 %v309_v27, %v230_v29 }
 0x11d   : > { %236 = vst.msk [vmem:[%s192_s29] sm:$0xff] %vm196_vm0, %v235_v30 }
 0x11e PF: > { %s14_s15 = sadd.s32 1, %s320_s15  }
 0x11f   : > { %p11_p4 = scmp.ge.s32.totalorder %s14_s15, 4  }
 0x121   :  { %13 = sbr.rel (!%p11_p4) target bundleno = 1 (0x1), region = 66 }

// kernel: decoder_forward.20
= control target key start
LH: loop header
LB: loop body
LE: loop exit
PB: predicated region body
PF: predicated region fallthrough
CT: control target
= control target key end

     0   :  { %vm31_vm0 = vcmask 261120   ;;  %vm51_vm1 = vcmask 781312   ;;  %s102_s1 = inlined_call_operand.vmem [shape: bf16[32,96], index: 1, kind: input, shape index: {}]   ;;  %s103_s0 = inlined_call_operand.vmem [shape: f32[16,32], index: 0, kind: input, shape index: {}]   ;;  %s104_s2 = inlined_call_operand.vmem [shape: bf16[16,96], index: 2, kind: output, shape index: {}]  }
   0x1   :  { %v68_v0 = vld [vmem:[%s102_s1 + $0x8] sm:$0xff]  ;;  %v67_v1 = vld [vmem:[%s102_s1] sm:$0xff] }
   0x2   :  { %41 = vmatpush.bf16.msra.mxu0 %v68_v0  ;;  %v12_v2 = vld [vmem:[%s103_s0] sm:$0xff]  ;;  %v13_v3 = vld [vmem:[%s103_s0 + $0x8] sm:$0xff] }
   0x3   :  { %v14_v4 = vpack.c.bf16 %v13_v3, %v12_v2 }
   0x6   :  { %42 = vmatpush.bf16.msra.mxu0 %v67_v1 }
   0x9   :  { %66 = vmatmul.msk.bf16.vlgmr.msra.gmra.mxu0 %vm31_vm0, %v14_v4 }
  0x86   :  { %v44_v5 = vpop.f32.mrf.mxu0 }
  0x87   :  { %v49_v6 = vpack.c.bf16 %v44_v5, %v44_v5 }
  0x89   :  { %52 = vst.msk [vmem:[%s104_s2] sm:$0xf] %vm51_vm1, %v49_v6 }
  0x8e   :  { %v46_v7 = vpop.f32.mrf.mxu0 }
  0x8f   :  { %v50_v8 = vpack.c.bf16 %v46_v7, %v46_v7 }
  0x91   :  { %53 = vst.msk [vmem:[%s104_s2 + $0x4] sm:$0xf] %vm51_vm1, %v50_v8 }

// kernel: decoder_forward.21
= control target key start
LH: loop header
LB: loop body
LE: loop exit
PB: predicated region body
PF: predicated region fallthrough
CT: control target
= control target key end

     0   :  { %7 = vsyncpa [#allocation3], 0  ;;  %s851_s0 = inlined_call_operand.vmem [shape: bf16[2,8,96], index: 0, kind: input, shape index: {}]   ;;  %s852_s1 = inlined_call_operand.hbm [shape: f32[2,8,8], index: 1, kind: input, shape index: {}]   ;;  %s853_s2 = inlined_call_operand.vmem [shape: bf16[2,8,32], index: 2, kind: output, shape index: {}]  }
   0x1   :  { %9 = vsyncpa [#allocation3 + $0x1], 0  ;;  %s697_s9 = smov 0   ;;  %s699_s10 = smov 0  }
   0x2   :  { %s701_s11 = smov 0   ;;  %s703_s12 = smov 0  }
   0x3 LB: > { %s716_s13 = sadd.s32 4294967295, %s666_s12   ;;  %s719_s14 = sadd.s32 1, %s666_s12   ;;  %s666_s12 = sphi %s703_s12, %s860_s12   ;;  %s662_s11 = sphi %s701_s11, %s859_s11   ;;  %s658_s10 = sphi %s699_s10, %s858_s10   ;;  %s654_s9 = sphi %s697_s9, %s857_s9  }
   0x4   : > { %s45_s15 = ssub.s32 %s666_s12, %s719_s14  ;;  %s48_s16 = sadd.s32 1, %s662_s11 }
   0x5   : > { %p46_p0 = scmp.eq.s32.totalorder %s45_s15, 0  ;;  %p55_p1 = scmp.ne.s32.totalorder %s662_s11, %s658_s10 }
   0x6   : > { %p56_p2 = scmp.eq.s32.totalorder %s666_s12, 0  ;;  %p61_p3 = scmp.ne.s32.totalorder %s658_s10, %s654_s9 }
   0x7   : > { %s729_s17 = scalar_select %p46_p0, %s662_s11, %s48_s16  }
   0x8   : > { %p731_p4 = por %p56_p2, %p55_p1  ;;  %p62_p5 = scmp.eq.s32.totalorder %s716_s13, 0 }
   0x9   : > { %p539_p6 = scmp.lt.s32.totalorder %s666_s12, 2  ;;  %s118_s20 = sand.u32 1, %s662_s11  }
   0xa   : > { %p737_p7 = por %p62_p5, %p61_p3  ;;  %s517_s21 = sshll.u32 %s118_s20, 3 }
   0xb   : > { %s518_s22 = sshll.u32 %s666_s12, 3  ;;  %s122_s26 = scalar_lea.vmem [#allocation2], %s517_s21 }
   0xc   : > { %s126_s25 = scalar_lea.hbm %s852_s1, %s518_s22  ;;  %s130_s27 = sshll.u32 %s122_s26, 4  ;;  %s131_s27 = int_to_ptr.vmem [resolvable:$true] %s130_s27 }
   0xd   : > { %s128_s28 = sshll.u32 %s126_s25, 4  ;;  %p748_p8 = pnand %p539_p6, %p731_p4  ;;  %s129_s28 = int_to_ptr.hbm [resolvable:$true] %s128_s28 }
   0xe   : > { %p519_p9 = scmp.ge.s32.totalorder %s666_s12, 1  ;;  %p135_p10 = scmp.lt.s32.totalorder %s666_s12, 3 }
   0xf   : > { %s119_s30 = scalar_lea.sflag [#allocation3], %s118_s20  ;;  %s602_s3 = sshra.s32 %s129_s28, 4  ;;  %s603_s3 = int_to_ptr.hbm [resolvable:$true] %s602_s3 }
  0x10   : > { %s604_s4 = scalar_lea.hbm %s603_s3, 8  ;;  %p606_p12 = pneg %p748_p8 }
  0x11   : > { %p605_p11 = scmp.ne.s32.totalorder %s603_s3, %s604_s4  ;;  %s609_s7 = scalar_lea.hbm %s852_s1, 16 }
  0x12   : > { %p610_p1 = scmp.lt.s32.totalorder %s603_s3, %s852_s1  ;;  %p611_p2 = scmp.lt.s32.totalorder %s609_s7, %s604_s4 }
  0x13   : > { %p607_p13 = pnand %p606_p12, %p605_p11 }
  0x14   : > { %p612_p3 = por %p611_p2, %p610_p1 }
  0x15   : > { %p608_p0 = pneg %p607_p13 }
  0x17   : > { %p613_p4 = pnand %p612_p3, %p608_p0 }
  0x19   : > { %616 = shalt.err (!%p613_p4)
}
  0x1a   : > { %538 = dma.hbm_to_vmem [thread:$0]  (!%p748_p8), %s129_s28, 128, %s131_s27, %s119_s30  }
  0x1b   : > { %p136_p5 = pnand %p519_p9, %p135_p10 }
  0x1c   : > { %s141_s15 = sand.u32 (!%p136_p5), 1, %s658_s10  }
  0x1d   : > { %139 = sbr.rel (%p136_p5) target bundleno = 1225 (0x4c9), region = 28  ;;  %s769_s16 = sshll.u32 (!%p136_p5), %s141_s15, 3 }
  0x1e   : > { %s142_s18 = scalar_lea.sflag (!%p136_p5), [#allocation3], %s141_s15  ;;  %s145_s20 = scalar_lea.vmem (!%p136_p5), [#allocation2], %s769_s16 }
  0x22   : > { %649 = dma.done.wait (%p737_p7), %s142_s18, 128  }
  0x23   : > { %651 = vsyncadd (%p737_p7), %s142_s18, 4294967168  ;;  %p170_p6 = scmp.lt.s32.totalorder %s716_s13, 1  ;;  %s668_s24 = smov 96   ;;  %vm187_vm0 = vcmask 64512   ;;  %v180_v8 = vld [vmem:[%s145_s20] sm:$0xff]  ;;  %vm226_vm2 = vcmask 1043456  }
  0x24   : > { %s669_s19 = smov 88   ;;  %s670_s25 = smov 120   ;;  %vm181_vm1 = vcmp.eq.f32.partialorder %v180_v8, 0.0  ;;  %vm430_vm3 = vcmask 130048   ;;  %vm432_vm4 = vcmask 195584   ;;  %vm435_vm5 = vcmask 257024  }
  0x25   : > { %s862_s13 = smov (!%p170_p6, %s716_s13), 1  ;;  %s671_s26 = smov 64  }
  0x26   : > { %s521_s12 = sshll.u32 %s862_s13, 2  ;;  %s672_s27 = smov 80  }
  0x27   : > { %s173_s23 = scalar_lea.vmem %s851_s0, %s521_s12  ;;  %s673_s28 = smov 72  }
  0x28   : > { %v179_v0 = vld [vmem:[%s173_s23] sm:$0xf]  ;;  %s674_s29 = smov 112   ;;  %s675_s30 = smov 104  }
  0x29   : > { %v183_v1 = vunpack.c.l.b16 %v179_v0  ;;  %s676_s3 = smov 56   ;;  %s677_s4 = smov 40  }
  0x2a   : > { %s678_s5 = smov 48   ;;  %s679_s6 = smov 8  }
  0x2b   : > { %v786_v2 = vpack.c.b16 %v183_v1, %v183_v1  ;;  %s680_s7 = smov 16   ;;  %s681_s8 = smov 24  }
  0x2c   : > { %s177_s16 = scalar_lea.vmem %s853_s2, %s521_s12 }
  0x2d   : > { %185 = vrot.lane.b32.xlu0 %v786_v2, %s668_s24  ;;  %245 = vrot.lane.b32.xlu1 %v786_v2, %s669_s19 }
  0x2e   : > { %243 = vrot.lane.b32.xlu2 %v786_v2, %s670_s25 }
  0x36   : > { %221 = vrot.lane.b32.xlu2 %v786_v2, %s671_s26 }
  0x3e   : > { %303 = vrot.lane.b32.xlu2 %v786_v2, %s672_s27 }
  0x46   : > { %361 = vrot.lane.b32.xlu2 %v786_v2, %s673_s28 }
  0x4e   : > { %301 = vrot.lane.b32.xlu2 %v786_v2, %s674_s29 }
  0x56   : > { %359 = vrot.lane.b32.xlu2 %v786_v2, %s675_s30 }
  0x88   : > { %v244_v7 = vpop.permute.xlu2 %243 }
  0x90   : > { %v222_v14 = vpop.permute.xlu2 %221 }
  0x91   : > { %v228_v19 = vsel %vm226_vm2, %v222_v14, 0 }
  0x92   : > { %237 = vmatpush.bf16.msra.mxu1 %v228_v19 }
  0x98   : > { %v304_v15 = vpop.permute.xlu2 %303 }
  0x99   : > { %v309_v17 = vsel %vm187_vm0, %v304_v15, 0 }
  0x9a   : > { %318 = vmatpush.bf16.xpose.msrb.mxu1 %v309_v17 }
  0x9f   : > { %v186_v3 = vpop.permute.xlu0 %185  ;;  %v246_v5 = vpop.permute.xlu1 %245 }
  0xa0   : > { %v192_v4 = vsel %vm187_vm0, %v186_v3, 0  ;;  %v251_v6 = vsel %vm187_vm0, %v246_v5, 0  ;;  %v362_v16 = vpop.permute.xlu2 %361 }
  0xa1   : > { %201 = vmatpush.bf16.xpose.msra.mxu0 %v192_v4  ;;  %260 = vmatpush.bf16.xpose.msra.mxu2 %v251_v6  ;;  %v367_v18 = vsel %vm187_vm0, %v362_v16, 0 }
  0xa8   : > { %523 = vmatmul.msk.bf16.vlgmr.msra.gmra.mxu0 %vm187_vm0, %v179_v0  ;;  %525 = vmatmul.msk.bf16.vlgmr.msra.gmra.mxu2 %vm187_vm0, %v244_v7  ;;  %v302_v20 = vpop.permute.xlu2 %301 }
  0xa9   : > { %376 = vmatpush.bf16.xpose.msrb.mxu0 %v367_v18 }
  0xb0   : > { %v360_v22 = vpop.permute.xlu2 %359 }
  0xb8   : > { %529 = vmatmul.msk.bf16.vlgmr.msrb.gmra.mxu0 %vm187_vm0, %v360_v22 }
 0x125   : > { %v203_v9 = vpop.f32.mrf.mxu0 }
 0x126   : > { %v207_v10 = vmul.f32 0.35355338, %v203_v9 }
 0x128   : > { %v208_v11 = vsel %vm181_vm1, -1e+09, %v207_v10 }
 0x129   : > { %v209_v12 = vsel %vm187_vm0, %v208_v11, -inf }
 0x12a   : > { %210 = vmax.xlane.f32.xlu0 %v209_v12 }
 0x12b   : > { %v262_v21 = vpop.f32.mrf.mxu2 }
 0x12c   : > { %v266_v23 = vmul.f32 0.35355338, %v262_v21 }
 0x12d   : > { %v205_v13 = vpop.f32.mrf.mxu0 }
 0x12e   : > { %v267_v24 = vsel %vm181_vm1, -1e+09, %v266_v23 }
 0x12f   : > { %v268_v26 = vsel %vm187_vm0, %v267_v24, -inf }
 0x130   : > { %269 = vmax.xlane.f32.xlu2 %v268_v26 }
 0x133   : > { %v264_v29 = vpop.f32.mrf.mxu2 }
 0x135   : > { %v378_v32 = vpop.f32.mrf.mxu0 }
 0x136   : > { %v382_v33 = vmul.f32 0.35355338, %v378_v32 }
 0x138   : > { %v383_v34 = vsel %vm181_vm1, -1e+09, %v382_v33 }
 0x139   : > { %v384_v36 = vsel %vm187_vm0, %v383_v34, -inf }
 0x13d   : > { %v380_v37 = vpop.f32.mrf.mxu0 }
 0x19d   : > { %v211_v25 = vpop.xlane.xlu0 %210 }
 0x19e   : > { %v212_v27 = vsub.f32 %v208_v11, %v211_v25 }
 0x1a0   : > { %v213_v28 = vmul.f32 1.442695, %v212_v27 }
 0x1a2   : > { %586 = vpow2.f32 %v213_v28 }
 0x1a3   : > { %v270_v42 = vpop.xlane.xlu2 %269 }
 0x1a4   : > { %v271_v44 = vsub.f32 %v267_v24, %v270_v42 }
 0x1a6   : > { %v272_v45 = vmul.f32 1.442695, %v271_v44 }
 0x1a8   : > { %v587_v30 = vpop.eup %586 }
 0x1a9   : > { %v215_v31 = vsel %vm187_vm0, %v587_v30, 0.0 }
 0x1aa   : > { %216 = vadd.xlane.f32.xlu1 %v215_v31 }
 0x1b2   : > { %385 = vmax.xlane.f32.xlu1 %v384_v36 }
 0x1cb   : > { %280 = vrot.lane.b32.xlu1 %v786_v2, %s676_s3 }
 0x1d3   : > { %396 = vrot.lane.b32.xlu1 %v786_v2, %s677_s4 }
 0x21d   : > { %v217_v35 = vpop.xlane.xlu1 %216 }
 0x21e   : > { %588 = vrcp.f32 %v217_v35 }
 0x21f   : > { %590 = vpow2.f32 %v272_v45 }
 0x224   : > { %v589_v38 = vpop.eup %588 }
 0x225   : > { %v219_v39 = vmul.f32 %v589_v38, %v587_v30  ;;  %v386_v46 = vpop.xlane.xlu1 %385  ;;  %v591_v54 = vpop.eup %590 }
 0x226   : > { %v387_v49 = vsub.f32 %v383_v34, %v386_v46  ;;  %v274_v55 = vsel %vm187_vm0, %v591_v54, 0.0 }
 0x227   : > { %v220_v40 = vpack.c.bf16 %v219_v39, %v219_v39 }
 0x228   : > { %v388_v52 = vmul.f32 1.442695, %v387_v49 }
 0x229   : > { %524 = vmatmul.msk.bf16.vlgmr.msra.gmra.mxu1 %vm187_vm0, %v220_v40 }
 0x22a   : > { %592 = vpow2.f32 %v388_v52 }
 0x230   : > { %v593_v56 = vpop.eup %592 }
 0x231   : > { %v390_v57 = vsel %vm187_vm0, %v593_v56, 0.0 }
 0x239   : > { %527 = vmatmul.msk.bf16.vlgmr.msrb.gmra.mxu1 %vm187_vm0, %v302_v20 }
 0x23d   : > { %v281_v58 = vpop.permute.xlu1 %280 }
 0x23e   : > { %v286_v59 = vsel %vm226_vm2, %v281_v58, 0 }
 0x23f   : > { %295 = vmatpush.bf16.msra.mxu3 %v286_v59 }
 0x245   : > { %v397_v60 = vpop.permute.xlu1 %396 }
 0x246   : > { %v402_v61 = vsel %vm226_vm2, %v397_v60, 0 }
 0x247   : > { %411 = vmatpush.bf16.msrb.mxu2 %v402_v61 }
 0x2a6   : > { %v817_v41 = vpop.f32.mrf.mxu1 }
 0x2ae   : > { %v241_v43 = vpop.f32.mrf.mxu1 }
 0x2b6   : > { %v320_v47 = vpop.f32.mrf.mxu1 }
 0x2b7   : > { %v324_v48 = vmul.f32 0.35355338, %v320_v47 }
 0x2b9   : > { %v325_v50 = vsel %vm181_vm1, -1e+09, %v324_v48 }
 0x2ba   : > { %v326_v51 = vsel %vm187_vm0, %v325_v50, -inf }
 0x2bb   : > { %327 = vmax.xlane.f32.xlu0 %v326_v51 }
 0x2be   : > { %v322_v53 = vpop.f32.mrf.mxu1 }
 0x2c3   : > { %275 = vadd.xlane.f32.xlu0 %v274_v55 }
 0x2cb   : > { %391 = vadd.xlane.f32.xlu0 %v390_v57 }
 0x32e   : > { %v328_v62 = vpop.xlane.xlu0 %327 }
 0x32f   : > { %v329_v63 = vsub.f32 %v325_v50, %v328_v62 }
 0x331   : > { %v330_v0 = vmul.f32 1.442695, %v329_v63 }
 0x333   : > { %594 = vpow2.f32 %v330_v0 }
 0x336   : > { %v276_v1 = vpop.xlane.xlu0 %275 }
 0x337   : > { %596 = vrcp.f32 %v276_v1 }
 0x339   : > { %v595_v3 = vpop.eup %594 }
 0x33a   : > { %v332_v4 = vsel %vm187_vm0, %v595_v3, 0.0 }
 0x33b   : > { %333 = vadd.xlane.f32.xlu0 %v332_v4 }
 0x33d   : > { %v597_v5 = vpop.eup %596 }
 0x33e   : > { %v392_v6 = vpop.xlane.xlu0 %391  ;;  %v278_v7 = vmul.f32 %v597_v5, %v591_v54 }
 0x33f   : > { %598 = vrcp.f32 %v392_v6 }
 0x340   : > { %v279_v8 = vpack.c.bf16 %v278_v7, %v278_v7 }
 0x342   : > { %526 = vmatmul.msk.bf16.vlgmr.msra.gmra.mxu3 %vm187_vm0, %v279_v8 }
 0x345   : > { %v599_v9 = vpop.eup %598 }
 0x346   : > { %v394_v10 = vmul.f32 %v599_v9, %v593_v56 }
 0x348   : > { %v395_v11 = vpack.c.bf16 %v394_v10, %v394_v10 }
 0x34a   : > { %530 = vmatmul.msk.bf16.vlgmr.msrb.gmra.mxu2 %vm187_vm0, %v395_v11 }
 0x34f   : > { %338 = vrot.lane.b32.xlu0 %v786_v2, %s678_s5 }
 0x3ae   : > { %v334_v12 = vpop.xlane.xlu0 %333 }
 0x3af   : > { %600 = vrcp.f32 %v334_v12 }
 0x3b5   : > { %v601_v13 = vpop.eup %600 }
 0x3b6   : > { %v336_v14 = vmul.f32 %v601_v13, %v595_v3 }
 0x3b8   : > { %v337_v17 = vpack.c.bf16 %v336_v14, %v336_v14 }
 0x3c1   : > { %v339_v15 = vpop.permute.xlu0 %338 }
 0x3c2   : > { %v344_v16 = vsel %vm226_vm2, %v339_v15, 0 }
 0x3c3   : > { %353 = vmatpush.bf16.msrb.mxu3 %v344_v16 }
 0x3c5   : > { %v297_v18 = vpop.f32.mrf.mxu3 }
 0x3c6   : > { %528 = vmatmul.msk.bf16.vlgmr.msrb.gmra.mxu3 %vm187_vm0, %v337_v17  ;;  %418 = vrot.lane.b32.xlu2 %v297_v18, %s679_s6 }
 0x3cd   : > { %v299_v19 = vpop.f32.mrf.mxu3  ;;  %v413_v20 = vpop.f32.mrf.mxu2 }
 0x3d5   : > { %v415_v21 = vpop.f32.mrf.mxu2 }
 0x420   : > { %v419_v24 = vpop.permute.xlu2 %418 }
 0x421   : > { %v429_v25 = vsel %vm187_vm0, %v817_v41, %v419_v24 }
 0x449   : > { %v355_v22 = vpop.f32.mrf.mxu3 }
 0x44a   : > { %422 = vrot.lane.b32.xlu1 %v355_v22, %s680_s7 }
 0x451   : > { %v357_v2 = vpop.f32.mrf.mxu3 }
 0x452   : > { %426 = vrot.lane.b32.xlu1 %v413_v20, %s681_s8 }
 0x4bc   : > { %v423_v23 = vpop.permute.xlu1 %422 }
 0x4bd   : > { %v431_v26 = vsel %vm430_vm3, %v429_v25, %v423_v23 }
 0x4c4   : > { %v427_v27 = vpop.permute.xlu1 %426 }
 0x4c5   : > { %v433_v28 = vsel %vm432_vm4, %v431_v26, %v427_v27 }
 0x4c6   : > { %v434_v29 = vpack.c.bf16 %v433_v28, %v433_v28 }
 0x4c8   : > { %436 = vst.msk [vmem:[%s177_s16] sm:$0xf] %vm435_vm5, %v434_v29 }
 0x4c9 PF: > { %p12_p7 = scmp.ge.s32.totalorder %s719_s14, 4   ;;  %s857_s9 = smov %s658_s10 }
 0x4ca   : > { %s858_s10 = smov %s662_s11  ;;  %s859_s11 = smov %s729_s17 }
 0x4cb   : > { %s860_s12 = smov %s719_s14  ;;  %14 = sbr.rel (!%p12_p7) target bundleno = 3 (0x3), region = 71 }
 0x4d0   :  { %456 = vsyncpa [#allocation3], 1 }
 0x4d1   :  { %458 = vsyncpa [#allocation3 + $0x1], 1 }

// kernel: decoder_forward.22
= control target key start
LH: loop header
LB: loop body
LE: loop exit
PB: predicated region body
PF: predicated region fallthrough
CT: control target
= control target key end

     0   :  { %vm46_vm0 = vcmask 261120   ;;  %v158_v11 = vmov 32.0   ;;  %s223_s1 = inlined_call_operand.vmem [shape: bf16[32,32], index: 1, kind: input, shape index: {}]   ;;  %s224_s0 = inlined_call_operand.vmem [shape: bf16[16,32], index: 0, kind: input, shape index: {}]   ;;  %s225_s2 = inlined_call_operand.vmem [shape: f32[16,32], index: 2, kind: input, shape index: {}]   ;;  %s226_s3 = inlined_call_operand.vmem [shape: f32[1,32], index: 3, kind: input, shape index: {}]   ;;  %s227_s4 = inlined_call_operand.vmem [shape: f32[1,32], index: 4, kind: input, shape index: {}]   ;;  %s228_s5 = inlined_call_operand.vmem [shape: f32[16,32], index: 5, kind: output, shape index: {}]  }
   0x1   :  { %v148_v0 = vld [vmem:[%s223_s1 + $0x8] sm:$0xff]  ;;  %v147_v1 = vld [vmem:[%s223_s1] sm:$0xff]  ;;  %152 = vrcp.f32 %v158_v11 }
   0x2   :  { %56 = vmatpush.bf16.msra.mxu0 %v148_v0  ;;  %v146_v2 = vld [vmem:[%s224_s0] sm:$0xff]  ;;  %v28_v7 = vld [vmem:[%s225_s2 + $0x8] sm:$0xff] }
   0x3   :  { %v27_v3 = vld [vmem:[%s225_s2] sm:$0xff] }
   0x4   :  { %v150_v42 = vld [vmem:[%s226_s3] ss:$0 sm:$0xff] }
   0x5   :  { %v151_v45 = vld [vmem:[%s227_s4] ss:$0 sm:$0xff] }
   0x6   :  { %57 = vmatpush.bf16.msra.mxu0 %v147_v1 }
   0x7   :  { %v153_v12 = vpop.eup %152 }
   0x8   :  { %v71_v13 = vmul.f32 32.0, %v153_v12  ;;  %vm75_vm1 = vweird.f32 %v153_v12 }
   0x9   :  { %145 = vmatmul.msk.bf16.vlgmr.msra.gmra.mxu0 %vm46_vm0, %v146_v2 }
   0xa   :  { %v72_v14 = vsub.f32 1.0, %v71_v13 }
   0xc   :  { %v73_v15 = vmul.f32 %v153_v12, %v72_v14 }
   0xe   :  { %v74_v16 = vadd.f32 %v153_v12, %v73_v15 }
  0x10   :  { %v76_v17 = vsel %vm75_vm1, %v153_v12, %v74_v16 }
  0x86   :  { %v59_v4 = vpop.f32.mrf.mxu0 }
  0x87   :  { %v60_v5 = vadd.f32 %v59_v4, %v27_v3 }
  0x89   :  { %v64_v6 = vsel %vm46_vm0, %v60_v5, 0.0 }
  0x8a   :  { %65 = vadd.xlane.f32.xlu0 %v64_v6 }
  0x8e   :  { %v61_v8 = vpop.f32.mrf.mxu0 }
  0x8f   :  { %v62_v9 = vadd.f32 %v61_v8, %v28_v7 }
  0x91   :  { %v67_v10 = vsel %vm46_vm0, %v62_v9, 0.0 }
  0x92   :  { %68 = vadd.xlane.f32.xlu0 %v67_v10 }
  0xfd   :  { %v66_v18 = vpop.xlane.xlu0 %65 }
  0xfe   :  { %v77_v19 = vmul.f32 %v76_v17, %v66_v18 }
 0x100   :  { %v79_v20 = vsub.f32 %v60_v5, %v77_v19 }
 0x102   :  { %v81_v21 = vmul.f32 %v79_v20, %v79_v20 }
 0x104   :  { %v83_v22 = vsel %vm46_vm0, %v81_v21, 0.0 }
 0x105   :  { %84 = vadd.xlane.f32.xlu1 %v83_v22  ;;  %v69_v23 = vpop.xlane.xlu0 %68 }
 0x106   :  { %v78_v24 = vmul.f32 %v76_v17, %v69_v23 }
 0x108   :  { %v80_v25 = vsub.f32 %v62_v9, %v78_v24 }
 0x10a   :  { %v82_v26 = vmul.f32 %v80_v25, %v80_v25 }
 0x10c   :  { %v86_v27 = vsel %vm46_vm0, %v82_v26, 0.0 }
 0x10d   :  { %87 = vadd.xlane.f32.xlu1 %v86_v27 }
 0x178   :  { %v85_v28 = vpop.xlane.xlu1 %84 }
 0x179   :  { %v89_v29 = vmul.f32 %v85_v28, %v76_v17 }
 0x17b   :  { %v91_v30 = vadd.f32 1e-06, %v89_v29 }
 0x17d   :  { %154 = vrsqrt.f32 %v91_v30  ;;  %vm99_vm3 = vweird.f32 %v91_v30 }
 0x180   :  { %v88_v31 = vpop.xlane.xlu1 %87 }
 0x181   :  { %v90_v32 = vmul.f32 %v88_v31, %v76_v17 }
 0x183   :  { %v155_v33 = vpop.eup %154  ;;  %v92_v34 = vadd.f32 1e-06, %v90_v32 }
 0x184   :  { %v94_v35 = vmul.f32 %v155_v33, %v91_v30  ;;  %vm100_vm2 = vweird.f32 %v155_v33 }
 0x185   :  { %156 = vrsqrt.f32 %v92_v34  ;;  %vm101_vm4 = vmor %vm99_vm3, %vm100_vm2  ;;  %vm109_vm6 = vweird.f32 %v92_v34 }
 0x186   :  { %v95_v36 = vmul.f32 %v155_v33, %v94_v35 }
 0x188   :  { %v96_v37 = vmul.f32 0.5, %v95_v36 }
 0x18a   :  { %v97_v38 = vsub.f32 1.5, %v96_v37 }
 0x18b   :  { %v157_v39 = vpop.eup %156 }
 0x18c   :  { %v98_v40 = vmul.f32 %v155_v33, %v97_v38  ;;  %v104_v41 = vmul.f32 %v157_v39, %v92_v34  ;;  %vm110_vm5 = vweird.f32 %v157_v39 }
 0x18d   :  { %vm111_vm7 = vmor %vm109_vm6, %vm110_vm5 }
 0x18e   :  { %v102_v43 = vsel %vm101_vm4, %v155_v33, %v98_v40  ;;  %v105_v44 = vmul.f32 %v157_v39, %v104_v41 }
 0x18f   :  { %v113_v46 = vmul.f32 %v102_v43, %v79_v20 }
 0x190   :  { %v106_v47 = vmul.f32 0.5, %v105_v44 }
 0x191   :  { %v119_v48 = vmul.f32 %v150_v42, %v113_v46 }
 0x192   :  { %v107_v49 = vsub.f32 1.5, %v106_v47 }
 0x193   :  { %v125_v50 = vadd.f32 %v151_v45, %v119_v48 }
 0x194   :  { %v108_v51 = vmul.f32 %v157_v39, %v107_v49 }
 0x195   :  { %127 = vst.msk [vmem:[%s228_s5] sm:$0xff] %vm46_vm0, %v125_v50 }
 0x196   :  { %v112_v52 = vsel %vm111_vm7, %v157_v39, %v108_v51 }
 0x197   :  { %v114_v53 = vmul.f32 %v112_v52, %v80_v25 }
 0x199   :  { %v120_v54 = vmul.f32 %v150_v42, %v114_v53 }
 0x19b   :  { %v126_v55 = vadd.f32 %v151_v45, %v120_v54 }
 0x19d   :  { %128 = vst.msk [vmem:[%s228_s5 + $0x8] sm:$0xff] %vm46_vm0, %v126_v55 }

// kernel: decoder_forward.24
= control target key start
LH: loop header
LB: loop body
LE: loop exit
PB: predicated region body
PF: predicated region fallthrough
CT: control target
= control target key end

     0   :  { %7 = vsyncpa [#allocation3], 0  ;;  %s115_s12 = smov [#allocation2]   ;;  %s116_s14 = smov 128   ;;  %s148_s0 = inlined_call_operand.hbm [shape: f32[16,32], index: 0, kind: input, shape index: {}]   ;;  %s149_s1 = inlined_call_operand.vmem [shape: bf16[32,64], index: 1, kind: input, shape index: {}]   ;;  %s150_s2 = inlined_call_operand.vmem [shape: bf16[16,64], index: 2, kind: output, shape index: {}]  }
   0x1   :  { %s12_s11 = sshll.u32 %s148_s0, 4  ;;  %s14_s13 = sshll.u32 %s115_s12, 4  ;;  %s13_s11 = int_to_ptr.hbm [resolvable:$true] %s12_s11  ;;  %s15_s13 = int_to_ptr.vmem [resolvable:$true] %s14_s13 }
   0x2   :  { %s117_s15 = smov 8  }
   0x3   :  { %20 = dma.hbm_to_vmem [thread:$0]  %s13_s11, 256, %s15_s13, [#allocation3], %s116_s14, %s116_s14, %s117_s15  }
   0x4   :  { %113 = dma.done.wait [#allocation3], 256  }
   0x5   :  { %114 = vsyncadd [#allocation3], 4294967040  ;;  %v85_v0 = vld [vmem:[%s149_s1 + $0x8] sm:$0xff]  ;;  %v84_v1 = vld [vmem:[%s149_s1] sm:$0xff]  ;;  %vm47_vm0 = vcmask 261120   ;;  %vm67_vm1 = vcmask 519168  }
   0x6   :  { %57 = vmatpush.bf16.msra.mxu0 %v85_v0  ;;  %v28_v2 = vld [vmem:[#allocation2] sm:$0xff]  ;;  %v29_v3 = vld [vmem:[#allocation2 + $0x8] sm:$0xff] }
   0x7   :  { %v30_v4 = vpack.c.bf16 %v29_v3, %v28_v2 }
   0xa   :  { %58 = vmatpush.bf16.msra.mxu0 %v84_v1 }
   0xd   :  { %83 = vmatmul.msk.bf16.vlgmr.msra.gmra.mxu0 %vm47_vm0, %v30_v4 }
  0x8a   :  { %v60_v5 = vpop.f32.mrf.mxu0 }
  0x8b   :  { %v65_v6 = vpack.c.bf16 %v60_v5, %v60_v5 }
  0x8d   :  { %68 = vst.msk [vmem:[%s150_s2] sm:$0xf] %vm67_vm1, %v65_v6 }
  0x92   :  { %v62_v7 = vpop.f32.mrf.mxu0 }
  0x93   :  { %v66_v8 = vpack.c.bf16 %v62_v7, %v62_v7 }
  0x95   :  { %69 = vst.msk [vmem:[%s150_s2 + $0x4] sm:$0xf] %vm67_vm1, %v66_v8 }
  0x96   :  { %74 = vsyncpa [#allocation3], 1 }

// kernel: decoder_forward.23
= control target key start
LH: loop header
LB: loop body
LE: loop exit
PB: predicated region body
PF: predicated region fallthrough
CT: control target
= control target key end

     0   :  { %vm31_vm0 = vcmask 261120   ;;  %vm51_vm1 = vcmask 257024   ;;  %s102_s1 = inlined_call_operand.vmem [shape: bf16[32,32], index: 1, kind: input, shape index: {}]   ;;  %s103_s0 = inlined_call_operand.vmem [shape: f32[16,32], index: 0, kind: input, shape index: {}]   ;;  %s104_s2 = inlined_call_operand.vmem [shape: bf16[16,32], index: 2, kind: output, shape index: {}]  }
   0x1   :  { %v68_v0 = vld [vmem:[%s102_s1 + $0x8] sm:$0xff]  ;;  %v67_v1 = vld [vmem:[%s102_s1] sm:$0xff] }
   0x2   :  { %41 = vmatpush.bf16.msra.mxu0 %v68_v0  ;;  %v12_v2 = vld [vmem:[%s103_s0] sm:$0xff]  ;;  %v13_v3 = vld [vmem:[%s103_s0 + $0x8] sm:$0xff] }
   0x3   :  { %v14_v4 = vpack.c.bf16 %v13_v3, %v12_v2 }
   0x6   :  { %42 = vmatpush.bf16.msra.mxu0 %v67_v1 }
   0x9   :  { %66 = vmatmul.msk.bf16.vlgmr.msra.gmra.mxu0 %vm31_vm0, %v14_v4 }
  0x86   :  { %v44_v5 = vpop.f32.mrf.mxu0 }
  0x87   :  { %v49_v6 = vpack.c.bf16 %v44_v5, %v44_v5 }
  0x89   :  { %52 = vst.msk [vmem:[%s104_s2] sm:$0xf] %vm51_vm1, %v49_v6 }
  0x8e   :  { %v46_v7 = vpop.f32.mrf.mxu0 }
  0x8f   :  { %v50_v8 = vpack.c.bf16 %v46_v7, %v46_v7 }
  0x91   :  { %53 = vst.msk [vmem:[%s104_s2 + $0x4] sm:$0xf] %vm51_vm1, %v50_v8 }

// kernel: decoder_forward.25
= control target key start
LH: loop header
LB: loop body
LE: loop exit
PB: predicated region body
PF: predicated region fallthrough
CT: control target
= control target key end

     0   :  { %s627_s12 = smov 0   ;;  %s704_s0 = inlined_call_operand.vmem [shape: bf16[2,8,32], index: 0, kind: input, shape index: {}]   ;;  %s705_s1 = inlined_call_operand.vmem [shape: bf16[2,8,64], index: 1, kind: input, shape index: {}]   ;;  %s706_s2 = inlined_call_operand.vmem [shape: f32[2,1,8], index: 2, kind: input, shape index: {}]   ;;  %s707_s3 = inlined_call_operand.vmem [shape: bf16[2,8,32], index: 3, kind: output, shape index: {}]  }
   0x1 LB: > { %s535_s13 = sadd.s32 4294967295, %s594_s12   ;;  %p539_p0 = scmp.ge.s32.totalorder %s594_s12, 1  ;;  %s594_s12 = sphi %s627_s12, %s13_s12  }
   0x2   : > { %p153_p1 = scmp.lt.s32.totalorder %s594_s12, 3 }
   0x4   : > { %p154_p2 = pnand %p539_p0, %p153_p1 }
   0x5   : > { %p182_p3 = scmp.lt.s32.totalorder (!%p154_p2), %s535_s13, 1  ;;  %s596_s21 = smov (!%p154_p2), 96  }
   0x6   : > { %157 = sbr.rel (%p154_p2) target bundleno = 1080 (0x438), region = 32  ;;  %s597_s22 = smov (!%p154_p2), 112  }
   0x7   : > { %s598_s23 = smov (!%p154_p2), 104   ;;  %s600_s27 = smov (!%p154_p2), 120  }
   0x8   : > { %s601_s28 = smov (!%p154_p2), 88   ;;  %s602_s29 = smov (!%p154_p2), 80  }
   0x9   : > { %s603_s30 = smov (!%p154_p2), 72   ;;  %s604_s4 = smov (!%p154_p2), 8  }
   0xa   : > { %s605_s5 = smov (!%p154_p2), 24   ;;  %s606_s6 = smov (!%p154_p2), 16  }
   0xb   : > { %s711_s13 = smov (!%p182_p3, %s535_s13), 1  ;;  %vm202_vm0 = vcmask 64512   ;;  %v599_v8 = vmov 0   ;;  %vm247_vm3 = vcmask 1043456   ;;  %vm454_vm4 = vcmask 130048  }
   0xc   : > { %s635_s14 = sshll.u32 %s711_s13, 2  ;;  %s192_s26 = scalar_lea.vmem %s706_s2, %s711_s13  ;;  %vm456_vm5 = vcmask 195584   ;;  %vm459_vm6 = vcmask 257024  }
   0xd   : > { %s189_s17 = scalar_lea.vmem %s705_s1, %s635_s14  ;;  %s185_s20 = scalar_lea.vmem %s704_s0, %s635_s14  ;;  %v200_v7 = vld [vmem:[%s192_s26] sm:$0x1] }
   0xe   : > { %v199_v0 = vld [vmem:[%s189_s17] sm:$0xf]  ;;  %vm201_vm1 = vcmp.eq.f32.partialorder %v200_v7, 0.0  ;;  %s196_s9 = scalar_lea.vmem %s707_s3, %s635_s14 }
   0xf   : > { %v207_v1 = vsel %vm202_vm0, %v199_v0, 0  ;;  %v198_v2 = vld [vmem:[%s185_s20] sm:$0xf]  ;;  %v240_v3 = vunpack.c.l.b16 %v199_v0  ;;  %v223_v9 = vsel %vm201_vm1, 1, %v599_v8 }
  0x10   : > { %216 = vmatpush.bf16.xpose.msra.mxu0 %v207_v1  ;;  %v265_v5 = vunpack.c.l.b16 %v198_v2  ;;  %v224_v10 = vperm.slane %v223_v9, 0 }
  0x11   : > { %v647_v4 = vpack.c.b16 %v240_v3, %v240_v3 }
  0x12   : > { %v266_v6 = vpack.c.b16 %v265_v5, %v265_v5  ;;  %vm655_vm2 = vcmp.eq.s32.totalorder %v224_v10, 1 }
  0x13   : > { %242 = vrot.lane.b32.xlu2 %v647_v4, %s596_s21 }
  0x17   : > { %543 = vmatmul.msk.bf16.vlgmr.msra.gmra.mxu0 %vm202_vm0, %v198_v2 }
  0x1b   : > { %327 = vrot.lane.b32.xlu2 %v647_v4, %s597_s22 }
  0x23   : > { %385 = vrot.lane.b32.xlu2 %v647_v4, %s598_s23 }
  0x2b   : > { %325 = vrot.lane.b32.xlu2 %v266_v6, %s597_s22 }
  0x6d   : > { %v243_v17 = vpop.permute.xlu2 %242 }
  0x6e   : > { %v249_v28 = vsel %vm247_vm3, %v243_v17, 0 }
  0x6f   : > { %258 = vmatpush.bf16.msra.mxu1 %v249_v28 }
  0x75   : > { %v328_v18 = vpop.permute.xlu2 %327 }
  0x76   : > { %v333_v29 = vsel %vm202_vm0, %v328_v18, 0 }
  0x77   : > { %342 = vmatpush.bf16.xpose.msrb.mxu1 %v333_v29 }
  0x7d   : > { %v386_v22 = vpop.permute.xlu2 %385 }
  0x7e   : > { %v391_v23 = vsel %vm202_vm0, %v386_v22, 0 }
  0x7f   : > { %400 = vmatpush.bf16.xpose.msrb.mxu0 %v391_v23 }
  0x85   : > { %v326_v36 = vpop.permute.xlu2 %325 }
  0x94   : > { %v218_v11 = vpop.f32.mrf.mxu0 }
  0x95   : > { %v222_v13 = vmul.f32 0.35355338, %v218_v11 }
  0x97   : > { %v226_v14 = vsel %vm655_vm2, -1e+09, %v222_v13 }
  0x98   : > { %v227_v15 = vsel %vm202_vm0, %v226_v14, -inf }
  0x99   : > { %228 = vmax.xlane.f32.xlu0 %v227_v15 }
  0x9c   : > { %v220_v16 = vpop.f32.mrf.mxu0 }
  0xad   : > { %269 = vrot.lane.b32.xlu0 %v647_v4, %s600_s27 }
  0xb5   : > { %383 = vrot.lane.b32.xlu0 %v266_v6, %s598_s23 }
 0x10c   : > { %v229_v19 = vpop.xlane.xlu0 %228 }
 0x10d   : > { %v230_v20 = vsub.f32 %v226_v14, %v229_v19 }
 0x10f   : > { %v231_v21 = vmul.f32 1.442695, %v230_v20 }
 0x111   : > { %572 = vpow2.f32 %v231_v21 }
 0x117   : > { %v573_v24 = vpop.eup %572 }
 0x118   : > { %v233_v25 = vsel %vm202_vm0, %v573_v24, 0.0 }
 0x119   : > { %234 = vadd.xlane.f32.xlu1 %v233_v25 }
 0x11f   : > { %v270_v26 = vpop.permute.xlu0 %269 }
 0x120   : > { %v275_v30 = vsel %vm202_vm0, %v270_v26, 0 }
 0x121   : > { %284 = vmatpush.bf16.xpose.msra.mxu2 %v275_v30 }
 0x127   : > { %v384_v27 = vpop.permute.xlu0 %383 }
 0x128   : > { %549 = vmatmul.msk.bf16.vlgmr.msrb.gmra.mxu0 %vm202_vm0, %v384_v27 }
 0x132   : > { %267 = vrot.lane.b32.xlu1 %v266_v6, %s600_s27 }
 0x18c   : > { %v235_v31 = vpop.xlane.xlu1 %234 }
 0x18d   : > { %574 = vrcp.f32 %v235_v31 }
 0x193   : > { %v575_v32 = vpop.eup %574 }
 0x194   : > { %v237_v33 = vmul.f32 %v575_v32, %v573_v24 }
 0x196   : > { %v238_v34 = vpack.c.bf16 %v237_v33, %v237_v33 }
 0x198   : > { %544 = vmatmul.msk.bf16.vlgmr.msra.gmra.mxu1 %vm202_vm0, %v238_v34 }
 0x1a4   : > { %v268_v35 = vpop.permute.xlu1 %267 }
 0x1a5   : > { %545 = vmatmul.msk.bf16.vlgmr.msra.gmra.mxu2 %vm202_vm0, %v268_v35  ;;  %v402_v37 = vpop.f32.mrf.mxu0 }
 0x1a6   : > { %v406_v38 = vmul.f32 0.35355338, %v402_v37 }
 0x1a8   : > { %547 = vmatmul.msk.bf16.vlgmr.msrb.gmra.mxu1 %vm202_vm0, %v326_v36  ;;  %v407_v39 = vsel %vm655_vm2, -1e+09, %v406_v38 }
 0x1a9   : > { %v408_v40 = vsel %vm202_vm0, %v407_v39, -inf }
 0x1aa   : > { %409 = vmax.xlane.f32.xlu0 %v408_v40 }
 0x1ad   : > { %v404_v41 = vpop.f32.mrf.mxu0 }
 0x215   : > { %v675_v42 = vpop.f32.mrf.mxu1 }
 0x21d   : > { %v262_v43 = vpop.f32.mrf.mxu1  ;;  %v410_v56 = vpop.xlane.xlu0 %409 }
 0x21e   : > { %v411_v60 = vsub.f32 %v407_v39, %v410_v56 }
 0x220   : > { %v412_v62 = vmul.f32 1.442695, %v411_v60 }
 0x225   : > { %v344_v44 = vpop.f32.mrf.mxu1 }
 0x226   : > { %v348_v45 = vmul.f32 0.35355338, %v344_v44 }
 0x228   : > { %v286_v46 = vpop.f32.mrf.mxu2  ;;  %v349_v47 = vsel %vm655_vm2, -1e+09, %v348_v45 }
 0x229   : > { %v290_v48 = vmul.f32 0.35355338, %v286_v46  ;;  %v350_v49 = vsel %vm202_vm0, %v349_v47, -inf }
 0x22a   : > { %351 = vmax.xlane.f32.xlu1 %v350_v49 }
 0x22b   : > { %v291_v50 = vsel %vm655_vm2, -1e+09, %v290_v48 }
 0x22c   : > { %v292_v51 = vsel %vm202_vm0, %v291_v50, -inf }
 0x22d   : > { %v346_v52 = vpop.f32.mrf.mxu1  ;;  %293 = vmax.xlane.f32.xlu2 %v292_v51 }
 0x230   : > { %v288_v53 = vpop.f32.mrf.mxu2 }
 0x243   : > { %304 = vrot.lane.b32.xlu1 %v647_v4, %s601_s28 }
 0x29d   : > { %v352_v54 = vpop.xlane.xlu1 %351 }
 0x29e   : > { %v353_v55 = vsub.f32 %v349_v47, %v352_v54 }
 0x2a0   : > { %v354_v57 = vmul.f32 1.442695, %v353_v55  ;;  %v294_v58 = vpop.xlane.xlu2 %293 }
 0x2a1   : > { %v295_v59 = vsub.f32 %v291_v50, %v294_v58 }
 0x2a2   : > { %576 = vpow2.f32 %v354_v57 }
 0x2a3   : > { %v296_v61 = vmul.f32 1.442695, %v295_v59 }
 0x2a5   : > { %578 = vpow2.f32 %v296_v61 }
 0x2a6   : > { %580 = vpow2.f32 %v412_v62 }
 0x2a8   : > { %v577_v63 = vpop.eup %576 }
 0x2a9   : > { %v356_v0 = vsel %vm202_vm0, %v577_v63, 0.0 }
 0x2aa   : > { %357 = vadd.xlane.f32.xlu0 %v356_v0 }
 0x2ab   : > { %v579_v1 = vpop.eup %578 }
 0x2ac   : > { %v298_v2 = vsel %vm202_vm0, %v579_v1, 0.0  ;;  %v581_v3 = vpop.eup %580 }
 0x2ad   : > { %299 = vadd.xlane.f32.xlu2 %v298_v2  ;;  %v414_v5 = vsel %vm202_vm0, %v581_v3, 0.0 }
 0x2b5   : > { %415 = vadd.xlane.f32.xlu2 %v414_v5  ;;  %v305_v6 = vpop.permute.xlu1 %304 }
 0x2b6   : > { %v310_v7 = vsel %vm247_vm3, %v305_v6, 0 }
 0x2b7   : > { %319 = vmatpush.bf16.msra.mxu3 %v310_v7 }
 0x2be   : > { %362 = vrot.lane.b32.xlu0 %v647_v4, %s602_s29 }
 0x2cd   : > { %420 = vrot.lane.b32.xlu2 %v647_v4, %s603_s30 }
 0x31d   : > { %v358_v10 = vpop.xlane.xlu0 %357 }
 0x320   : > { %v300_v8 = vpop.xlane.xlu2 %299 }
 0x321   : > { %582 = vrcp.f32 %v300_v8 }
 0x327   : > { %v583_v9 = vpop.eup %582 }
 0x328   : > { %v416_v11 = vpop.xlane.xlu2 %415  ;;  %v302_v12 = vmul.f32 %v583_v9, %v579_v1 }
 0x329   : > { %584 = vrcp.f32 %v416_v11 }
 0x32a   : > { %v303_v13 = vpack.c.bf16 %v302_v12, %v302_v12  ;;  %586 = vrcp.f32 %v358_v10 }
 0x32c   : > { %546 = vmatmul.msk.bf16.vlgmr.msra.gmra.mxu3 %vm202_vm0, %v303_v13 }
 0x32f   : > { %v585_v14 = vpop.eup %584 }
 0x330   : > { %v418_v15 = vmul.f32 %v585_v14, %v581_v3  ;;  %v421_v16 = vpop.permute.xlu2 %420  ;;  %v363_v17 = vpop.permute.xlu0 %362 }
 0x331   : > { %v368_v4 = vsel %vm247_vm3, %v363_v17, 0  ;;  %v426_v18 = vsel %vm247_vm3, %v421_v16, 0  ;;  %v587_v20 = vpop.eup %586 }
 0x332   : > { %377 = vmatpush.bf16.msrb.mxu3 %v368_v4  ;;  %435 = vmatpush.bf16.msrb.mxu2 %v426_v18  ;;  %v419_v19 = vpack.c.bf16 %v418_v15, %v418_v15  ;;  %v360_v21 = vmul.f32 %v587_v20, %v577_v63 }
 0x334   : > { %v361_v22 = vpack.c.bf16 %v360_v21, %v360_v21 }
 0x335   : > { %550 = vmatmul.msk.bf16.vlgmr.msrb.gmra.mxu2 %vm202_vm0, %v419_v19 }
 0x33c   : > { %548 = vmatmul.msk.bf16.vlgmr.msrb.gmra.mxu3 %vm202_vm0, %v361_v22 }
 0x3af   : > { %v321_v23 = vpop.f32.mrf.mxu3 }
 0x3b0   : > { %442 = vrot.lane.b32.xlu1 %v321_v23, %s604_s4 }
 0x3b7   : > { %v323_v24 = vpop.f32.mrf.mxu3 }
 0x3b8   : > { %v437_v25 = vpop.f32.mrf.mxu2 }
 0x3b9   : > { %450 = vrot.lane.b32.xlu1 %v437_v25, %s605_s5 }
 0x3bf   : > { %v379_v26 = vpop.f32.mrf.mxu3 }
 0x3c0   : > { %v439_v27 = vpop.f32.mrf.mxu2  ;;  %446 = vrot.lane.b32.xlu0 %v379_v26, %s606_s6 }
 0x3c7   : > { %v381_v28 = vpop.f32.mrf.mxu3 }
 0x422   : > { %v443_v29 = vpop.permute.xlu1 %442 }
 0x423   : > { %v453_v30 = vsel %vm202_vm0, %v675_v42, %v443_v29 }
 0x42b   : > { %v451_v32 = vpop.permute.xlu1 %450 }
 0x432   : > { %v447_v31 = vpop.permute.xlu0 %446 }
 0x433   : > { %v455_v33 = vsel %vm454_vm4, %v453_v30, %v447_v31 }
 0x434   : > { %v457_v34 = vsel %vm456_vm5, %v455_v33, %v451_v32 }
 0x435   : > { %v458_v35 = vpack.c.bf16 %v457_v34, %v457_v34 }
 0x437   : > { %460 = vst.msk [vmem:[%s196_s9] sm:$0xf] %vm459_vm6, %v458_v35 }
 0x438 PF: > { %s13_s12 = sadd.s32 1, %s594_s12  }
 0x439   : > { %p10_p4 = scmp.ge.s32.totalorder %s13_s12, 4  }
 0x43b   :  { %12 = sbr.rel (!%p10_p4) target bundleno = 1 (0x1), region = 68 }

// kernel: decoder_forward.26
= control target key start
LH: loop header
LB: loop body
LE: loop exit
PB: predicated region body
PF: predicated region fallthrough
CT: control target
= control target key end

     0   :  { %10 = vsyncpa [#allocation3], 0  ;;  %s309_s0 = inlined_call_operand.vmem [shape: bf16[16,32], index: 0, kind: input, shape index: {}]   ;;  %s310_s1 = inlined_call_operand.vmem [shape: bf16[32,32], index: 1, kind: input, shape index: {}]   ;;  %s311_s2 = inlined_call_operand.vmem [shape: f32[16,32], index: 2, kind: input, shape index: {}]   ;;  %s312_s3 = inlined_call_operand.hbm [shape: f32[1,32], index: 3, kind: input, shape index: {}]   ;;  %s313_s4 = inlined_call_operand.hbm [shape: f32[1,32], index: 4, kind: input, shape index: {}]   ;;  %s314_s5 = inlined_call_operand.vmem [shape: f32[16,32], index: 5, kind: output, shape index: {}]  }
   0x1   :  { %s23_s20 = sshll.u32 %s312_s3, 4  ;;  %s24_s20 = int_to_ptr.hbm [resolvable:$true] %s23_s20 }
   0x2   :  { %11 = vsyncpa [#allocation5], 0  ;;  %s242_s21 = smov [#allocation2]   ;;  %s34_s25 = sshll.u32 %s313_s4, 4  ;;  %s35_s25 = int_to_ptr.hbm [resolvable:$true] %s34_s25 }
   0x3   :  { %s25_s22 = sshll.u32 %s242_s21, 4  ;;  %s243_s26 = smov [#allocation4]   ;;  %s26_s22 = int_to_ptr.vmem [resolvable:$true] %s25_s22 }
   0x4   :  { %28 = dma.hbm_to_vmem [thread:$0]  %s24_s20, 16, %s26_s22, [#allocation3]  }
   0x5   :  { %s36_s27 = sshll.u32 %s243_s26, 4  ;;  %s37_s27 = int_to_ptr.vmem [resolvable:$true] %s36_s27 }
   0x6   :  { %39 = dma.hbm_to_vmem [thread:$0]  %s35_s25, 16, %s37_s27, [#allocation5]  }
   0x7   :  { %238 = dma.done.wait [#allocation3], 16  }
   0x8   :  { %239 = vsyncadd [#allocation3], 4294967280 }
   0x9   :  { %240 = dma.done.wait [#allocation5], 16  }
   0xa   :  { %241 = vsyncadd [#allocation5], 4294967280  ;;  %v178_v0 = vld [vmem:[%s310_s1 + $0x8] sm:$0xff]  ;;  %v177_v1 = vld [vmem:[%s310_s1] sm:$0xff]  ;;  %vm74_vm0 = vcmask 261120   ;;  %v244_v11 = vmov 32.0  }
   0xb   :  { %84 = vmatpush.bf16.msra.mxu0 %v178_v0  ;;  %v176_v2 = vld [vmem:[%s309_s0] sm:$0xff]  ;;  %v56_v7 = vld [vmem:[%s311_s2 + $0x8] sm:$0xff]  ;;  %184 = vrcp.f32 %v244_v11 }
   0xc   :  { %v55_v3 = vld [vmem:[%s311_s2] sm:$0xff] }
   0xd   :  { %v182_v42 = vld [vmem:[#allocation2] ss:$0 sm:$0xff]  ;;  %v183_v45 = vld [vmem:[#allocation4] ss:$0 sm:$0xff] }
   0xf   :  { %85 = vmatpush.bf16.msra.mxu0 %v177_v1 }
  0x11   :  { %v185_v12 = vpop.eup %184 }
  0x12   :  { %175 = vmatmul.msk.bf16.vlgmr.msra.gmra.mxu0 %vm74_vm0, %v176_v2  ;;  %v99_v13 = vmul.f32 32.0, %v185_v12  ;;  %vm103_vm1 = vweird.f32 %v185_v12 }
  0x14   :  { %v100_v14 = vsub.f32 1.0, %v99_v13 }
  0x16   :  { %v101_v15 = vmul.f32 %v185_v12, %v100_v14 }
  0x18   :  { %v102_v16 = vadd.f32 %v185_v12, %v101_v15 }
  0x1a   :  { %v104_v17 = vsel %vm103_vm1, %v185_v12, %v102_v16 }
  0x8f   :  { %v87_v4 = vpop.f32.mrf.mxu0 }
  0x90   :  { %v88_v5 = vadd.f32 %v87_v4, %v55_v3 }
  0x92   :  { %v92_v6 = vsel %vm74_vm0, %v88_v5, 0.0 }
  0x93   :  { %93 = vadd.xlane.f32.xlu0 %v92_v6 }
  0x97   :  { %v89_v8 = vpop.f32.mrf.mxu0 }
  0x98   :  { %v90_v9 = vadd.f32 %v89_v8, %v56_v7 }
  0x9a   :  { %v95_v10 = vsel %vm74_vm0, %v90_v9, 0.0 }
  0x9b   :  { %96 = vadd.xlane.f32.xlu0 %v95_v10 }
 0x106   :  { %v94_v18 = vpop.xlane.xlu0 %93 }
 0x107   :  { %v105_v19 = vmul.f32 %v104_v17, %v94_v18 }
 0x109   :  { %v107_v20 = vsub.f32 %v88_v5, %v105_v19 }
 0x10b   :  { %v109_v21 = vmul.f32 %v107_v20, %v107_v20 }
 0x10d   :  { %v111_v22 = vsel %vm74_vm0, %v109_v21, 0.0 }
 0x10e   :  { %112 = vadd.xlane.f32.xlu1 %v111_v22  ;;  %v97_v23 = vpop.xlane.xlu0 %96 }
 0x10f   :  { %v106_v24 = vmul.f32 %v104_v17, %v97_v23 }
 0x111   :  { %v108_v25 = vsub.f32 %v90_v9, %v106_v24 }
 0x113   :  { %v110_v26 = vmul.f32 %v108_v25, %v108_v25 }
 0x115   :  { %v114_v27 = vsel %vm74_vm0, %v110_v26, 0.0 }
 0x116   :  { %115 = vadd.xlane.f32.xlu1 %v114_v27 }
 0x181   :  { %v113_v28 = vpop.xlane.xlu1 %112 }
 0x182   :  { %v117_v29 = vmul.f32 %v113_v28, %v104_v17 }
 0x184   :  { %v119_v30 = vadd.f32 1e-06, %v117_v29 }
 0x186   :  { %186 = vrsqrt.f32 %v119_v30  ;;  %vm127_vm3 = vweird.f32 %v119_v30 }
 0x189   :  { %v116_v31 = vpop.xlane.xlu1 %115 }
 0x18a   :  { %v118_v32 = vmul.f32 %v116_v31, %v104_v17 }
 0x18c   :  { %v187_v33 = vpop.eup %186  ;;  %v120_v34 = vadd.f32 1e-06, %v118_v32 }
 0x18d   :  { %v122_v35 = vmul.f32 %v187_v33, %v119_v30  ;;  %vm128_vm2 = vweird.f32 %v187_v33 }
 0x18e   :  { %188 = vrsqrt.f32 %v120_v34  ;;  %vm129_vm4 = vmor %vm127_vm3, %vm128_vm2  ;;  %vm137_vm6 = vweird.f32 %v120_v34 }
 0x18f   :  { %v123_v36 = vmul.f32 %v187_v33, %v122_v35 }
 0x191   :  { %v124_v37 = vmul.f32 0.5, %v123_v36 }
 0x193   :  { %v125_v38 = vsub.f32 1.5, %v124_v37 }
 0x194   :  { %v189_v39 = vpop.eup %188 }
 0x195   :  { %v126_v40 = vmul.f32 %v187_v33, %v125_v38  ;;  %v132_v41 = vmul.f32 %v189_v39, %v120_v34  ;;  %vm138_vm5 = vweird.f32 %v189_v39 }
 0x196   :  { %vm139_vm7 = vmor %vm137_vm6, %vm138_vm5 }
 0x197   :  { %v130_v43 = vsel %vm129_vm4, %v187_v33, %v126_v40  ;;  %v133_v44 = vmul.f32 %v189_v39, %v132_v41 }
 0x198   :  { %v141_v46 = vmul.f32 %v130_v43, %v107_v20 }
 0x199   :  { %v134_v47 = vmul.f32 0.5, %v133_v44 }
 0x19a   :  { %v147_v48 = vmul.f32 %v182_v42, %v141_v46 }
 0x19b   :  { %v135_v49 = vsub.f32 1.5, %v134_v47 }
 0x19c   :  { %v153_v50 = vadd.f32 %v183_v45, %v147_v48 }
 0x19d   :  { %v136_v51 = vmul.f32 %v189_v39, %v135_v49 }
 0x19e   :  { %155 = vst.msk [vmem:[%s314_s5] sm:$0xff] %vm74_vm0, %v153_v50 }
 0x19f   :  { %v140_v52 = vsel %vm139_vm7, %v189_v39, %v136_v51 }
 0x1a0   :  { %v142_v53 = vmul.f32 %v140_v52, %v108_v25 }
 0x1a2   :  { %v148_v54 = vmul.f32 %v182_v42, %v142_v53 }
 0x1a4   :  { %v154_v55 = vadd.f32 %v183_v45, %v148_v54 }
 0x1a6   :  { %156 = vst.msk [vmem:[%s314_s5 + $0x8] sm:$0xff] %vm74_vm0, %v154_v55 }
 0x1a7   :  { %161 = vsyncpa [#allocation3], 1 }
 0x1a8   :  { %162 = vsyncpa [#allocation5], 1 }

// kernel: decoder_forward.27
= control target key start
LH: loop header
LB: loop body
LE: loop exit
PB: predicated region body
PF: predicated region fallthrough
CT: control target
= control target key end

     0   :  { %8 = vsyncpa [#allocation3], 0  ;;  %s209_s0 = inlined_call_operand.vmem [shape: f32[16,32], index: 0, kind: input, shape index: {}]   ;;  %s210_s1 = inlined_call_operand.hbm [shape: bf16[32,64], index: 1, kind: input, shape index: {}]   ;;  %s211_s2 = inlined_call_operand.hbm [shape: f32[1,64], index: 2, kind: input, shape index: {}]   ;;  %s212_s3 = inlined_call_operand.vmem [shape: bf16[16,64], index: 3, kind: output, shape index: {}]  }
   0x1   :  { %s16_s14 = sshll.u32 %s210_s1, 4  ;;  %s17_s14 = int_to_ptr.hbm [resolvable:$true] %s16_s14 }
   0x2   :  { %9 = vsyncpa [#allocation5], 0  ;;  %s167_s15 = smov [#allocation2]   ;;  %s30_s19 = sshll.u32 %s211_s2, 4  ;;  %s31_s19 = int_to_ptr.hbm [resolvable:$true] %s30_s19 }
   0x3   :  { %s18_s16 = sshll.u32 %s167_s15, 4  ;;  %s168_s20 = smov 64   ;;  %s19_s16 = int_to_ptr.vmem [resolvable:$true] %s18_s16 }
   0x4   :  { %s169_s21 = smov 4   ;;  %s170_s22 = smov [#allocation4]  }
   0x5   :  { %24 = dma.hbm_to_vmem [thread:$0]  %s17_s14, 256, %s19_s16, [#allocation3], %s168_s20, %s168_s20, %s169_s21  }
   0x6   :  { %s32_s23 = sshll.u32 %s170_s22, 4  ;;  %s33_s23 = int_to_ptr.vmem [resolvable:$true] %s32_s23 }
   0x7   :  { %35 = dma.hbm_to_vmem [thread:$0]  %s31_s19, 16, %s33_s23, [#allocation5]  }
   0x8   :  { %163 = dma.done.wait [#allocation3], 256  }
   0x9   :  { %164 = vsyncadd [#allocation3], 4294967040 }
   0xa   :  { %165 = dma.done.wait [#allocation5], 16  }
   0xb   :  { %166 = vsyncadd [#allocation5], 4294967280  ;;  %v109_v0 = vld [vmem:[#allocation2 + $0x8] sm:$0xff]  ;;  %v108_v1 = vld [vmem:[#allocation2] sm:$0xff]  ;;  %vm68_vm0 = vcmask 261120   ;;  %vm90_vm1 = vcmask 519168  }
   0xc   :  { %78 = vmatpush.bf16.msra.mxu0 %v109_v0  ;;  %v45_v2 = vld [vmem:[%s209_s0] sm:$0xff]  ;;  %v46_v3 = vld [vmem:[%s209_s0 + $0x8] sm:$0xff]  ;;  %v114_v5 = vld [vmem:[#allocation4] ss:$0 sm:$0xff] }
   0xd   :  { %v47_v4 = vpack.c.bf16 %v46_v3, %v45_v2 }
  0x10   :  { %79 = vmatpush.bf16.msra.mxu0 %v108_v1 }
  0x13   :  { %107 = vmatmul.msk.bf16.vlgmr.msra.gmra.mxu0 %vm68_vm0, %v47_v4 }
  0x90   :  { %v81_v6 = vpop.f32.mrf.mxu0 }
  0x91   :  { %v82_v7 = vadd.f32 %v114_v5, %v81_v6 }
  0x93   :  { %v86_v8 = vmax.f32 %v82_v7, 0.0 }
  0x95   :  { %v88_v9 = vpack.c.bf16 %v86_v8, %v86_v8 }
  0x97   :  { %91 = vst.msk [vmem:[%s212_s3] sm:$0xf] %vm90_vm1, %v88_v9 }
  0x98   :  { %v83_v10 = vpop.f32.mrf.mxu0 }
  0x99   :  { %v84_v11 = vadd.f32 %v114_v5, %v83_v10 }
  0x9b   :  { %v87_v12 = vmax.f32 %v84_v11, 0.0 }
  0x9d   :  { %v89_v13 = vpack.c.bf16 %v87_v12, %v87_v12 }
  0x9f   :  { %92 = vst.msk [vmem:[%s212_s3 + $0x4] sm:$0xf] %vm90_vm1, %v89_v13 }
  0xa0   :  { %97 = vsyncpa [#allocation3], 1 }
  0xa1   :  { %98 = vsyncpa [#allocation5], 1 }

// kernel: decoder_forward.28
= control target key start
LH: loop header
LB: loop body
LE: loop exit
PB: predicated region body
PF: predicated region fallthrough
CT: control target
= control target key end

     0   :  { %vm67_vm0 = vcmask 523264   ;;  %vm89_vm1 = vcmask 261120   ;;  %v195_v16 = vmov 32.0   ;;  %s273_s1 = inlined_call_operand.vmem [shape: bf16[64,32], index: 1, kind: input, shape index: {}]   ;;  %s274_s2 = inlined_call_operand.vmem [shape: f32[1,32], index: 2, kind: input, shape index: {}]   ;;  %s275_s0 = inlined_call_operand.vmem [shape: bf16[16,64], index: 0, kind: input, shape index: {}]   ;;  %s276_s3 = inlined_call_operand.vmem [shape: f32[16,32], index: 3, kind: input, shape index: {}]   ;;  %s277_s4 = inlined_call_operand.vmem [shape: f32[1,32], index: 4, kind: input, shape index: {}]   ;;  %s278_s5 = inlined_call_operand.vmem [shape: f32[1,32], index: 5, kind: input, shape index: {}]   ;;  %s279_s6 = inlined_call_operand.vmem [shape: f32[16,32], index: 6, kind: output, shape index: {}]  }
   0x1   :  { %v184_v0 = vld [vmem:[%s273_s1 + $0x18] sm:$0xff]  ;;  %v183_v1 = vld [vmem:[%s273_s1 + $0x10] sm:$0xff]  ;;  %v182_v2 = vld [vmem:[%s273_s1 + $0x8] sm:$0xff]  ;;  %189 = vrcp.f32 %v195_v16 }
   0x2   :  { %75 = vmatpush.bf16.msra.mxu0 %v184_v0  ;;  %v181_v3 = vld [vmem:[%s273_s1] sm:$0xff]  ;;  %v86_v12 = vld [vmem:[%s276_s3 + $0x8] sm:$0xff] }
   0x3   :  { %v180_v4 = vld [vmem:[%s275_s0] sm:$0xff] }
   0x4   :  { %v186_v5 = vld [vmem:[%s274_s2] ss:$0 sm:$0xff] }
   0x5   :  { %v85_v7 = vld [vmem:[%s276_s3] sm:$0xff] }
   0x6   :  { %76 = vmatpush.bf16.msra.mxu0 %v183_v1  ;;  %v187_v47 = vld [vmem:[%s277_s4] ss:$0 sm:$0xff] }
   0x7   :  { %v190_v17 = vpop.eup %189  ;;  %v188_v50 = vld [vmem:[%s278_s5] ss:$0 sm:$0xff] }
   0x8   :  { %v97_v18 = vmul.f32 32.0, %v190_v17  ;;  %vm101_vm2 = vweird.f32 %v190_v17 }
   0xa   :  { %77 = vmatpush.bf16.msra.mxu0 %v182_v2  ;;  %v98_v19 = vsub.f32 1.0, %v97_v18 }
   0xc   :  { %v99_v20 = vmul.f32 %v190_v17, %v98_v19 }
   0xe   :  { %78 = vmatpush.bf16.msra.mxu0 %v181_v3  ;;  %v100_v21 = vadd.f32 %v190_v17, %v99_v20 }
  0x10   :  { %v102_v22 = vsel %vm101_vm2, %v190_v17, %v100_v21 }
  0x11   :  { %179 = vmatmul.msk.bf16.vlgmr.msra.gmra.mxu0 %vm67_vm0, %v180_v4 }
  0x8e   :  { %v80_v6 = vpop.f32.mrf.mxu0 }
  0x8f   :  { %v81_v8 = vadd.f32 %v186_v5, %v80_v6 }
  0x91   :  { %v87_v9 = vadd.f32 %v85_v7, %v81_v8 }
  0x93   :  { %v90_v10 = vsel %vm89_vm1, %v87_v9, 0.0 }
  0x94   :  { %91 = vadd.xlane.f32.xlu0 %v90_v10 }
  0x96   :  { %v82_v11 = vpop.f32.mrf.mxu0 }
  0x97   :  { %v83_v13 = vadd.f32 %v186_v5, %v82_v11 }
  0x99   :  { %v88_v14 = vadd.f32 %v86_v12, %v83_v13 }
  0x9b   :  { %v93_v15 = vsel %vm89_vm1, %v88_v14, 0.0 }
  0x9c   :  { %94 = vadd.xlane.f32.xlu0 %v93_v15 }
 0x107   :  { %v92_v23 = vpop.xlane.xlu0 %91 }
 0x108   :  { %v103_v24 = vmul.f32 %v102_v22, %v92_v23 }
 0x10a   :  { %v105_v25 = vsub.f32 %v87_v9, %v103_v24 }
 0x10c   :  { %v107_v26 = vmul.f32 %v105_v25, %v105_v25 }
 0x10e   :  { %v109_v27 = vsel %vm89_vm1, %v107_v26, 0.0 }
 0x10f   :  { %110 = vadd.xlane.f32.xlu1 %v109_v27  ;;  %v95_v28 = vpop.xlane.xlu0 %94 }
 0x110   :  { %v104_v29 = vmul.f32 %v102_v22, %v95_v28 }
 0x112   :  { %v106_v30 = vsub.f32 %v88_v14, %v104_v29 }
 0x114   :  { %v108_v31 = vmul.f32 %v106_v30, %v106_v30 }
 0x116   :  { %v112_v32 = vsel %vm89_vm1, %v108_v31, 0.0 }
 0x117   :  { %113 = vadd.xlane.f32.xlu1 %v112_v32 }
 0x182   :  { %v111_v33 = vpop.xlane.xlu1 %110 }
 0x183   :  { %v115_v34 = vmul.f32 %v111_v33, %v102_v22 }
 0x185   :  { %v117_v35 = vadd.f32 1e-06, %v115_v34 }
 0x187   :  { %191 = vrsqrt.f32 %v117_v35  ;;  %vm125_vm4 = vweird.f32 %v117_v35 }
 0x18a   :  { %v114_v36 = vpop.xlane.xlu1 %113 }
 0x18b   :  { %v116_v37 = vmul.f32 %v114_v36, %v102_v22 }
 0x18d   :  { %v192_v38 = vpop.eup %191  ;;  %v118_v39 = vadd.f32 1e-06, %v116_v37 }
 0x18e   :  { %v120_v40 = vmul.f32 %v192_v38, %v117_v35  ;;  %vm126_vm3 = vweird.f32 %v192_v38 }
 0x18f   :  { %193 = vrsqrt.f32 %v118_v39  ;;  %vm127_vm5 = vmor %vm125_vm4, %vm126_vm3  ;;  %vm135_vm7 = vweird.f32 %v118_v39 }
 0x190   :  { %v121_v41 = vmul.f32 %v192_v38, %v120_v40 }
 0x192   :  { %v122_v42 = vmul.f32 0.5, %v121_v41 }
 0x194   :  { %v123_v43 = vsub.f32 1.5, %v122_v42 }
 0x195   :  { %v194_v44 = vpop.eup %193 }
 0x196   :  { %v124_v45 = vmul.f32 %v192_v38, %v123_v43  ;;  %v130_v46 = vmul.f32 %v194_v44, %v118_v39  ;;  %vm136_vm6 = vweird.f32 %v194_v44 }
 0x197   :  { %vm137_vm8 = vmor %vm135_vm7, %vm136_vm6 }
 0x198   :  { %v128_v48 = vsel %vm127_vm5, %v192_v38, %v124_v45  ;;  %v131_v49 = vmul.f32 %v194_v44, %v130_v46 }
 0x199   :  { %v139_v51 = vmul.f32 %v128_v48, %v105_v25 }
 0x19a   :  { %v132_v52 = vmul.f32 0.5, %v131_v49 }
 0x19b   :  { %v145_v53 = vmul.f32 %v187_v47, %v139_v51 }
 0x19c   :  { %v133_v54 = vsub.f32 1.5, %v132_v52 }
 0x19d   :  { %v151_v55 = vadd.f32 %v188_v50, %v145_v53 }
 0x19e   :  { %v134_v56 = vmul.f32 %v194_v44, %v133_v54 }
 0x19f   :  { %153 = vst.msk [vmem:[%s279_s6] sm:$0xff] %vm89_vm1, %v151_v55 }
 0x1a0   :  { %v138_v57 = vsel %vm137_vm8, %v194_v44, %v134_v56 }
 0x1a1   :  { %v140_v58 = vmul.f32 %v138_v57, %v106_v30 }
 0x1a3   :  { %v146_v59 = vmul.f32 %v187_v47, %v140_v58 }
 0x1a5   :  { %v152_v60 = vadd.f32 %v188_v50, %v146_v59 }
 0x1a7   :  { %154 = vst.msk [vmem:[%s279_s6 + $0x8] sm:$0xff] %vm89_vm1, %v152_v60 }

// kernel: decoder_forward.32
= control target key start
LH: loop header
LB: loop body
LE: loop exit
PB: predicated region body
PF: predicated region fallthrough
CT: control target
= control target key end

     0   :  { %7 = vsyncpa [#allocation3], 0  ;;  %s115_s12 = smov [#allocation2]   ;;  %s116_s14 = smov 64   ;;  %s148_s0 = inlined_call_operand.vmem [shape: f32[16,32], index: 0, kind: input, shape index: {}]   ;;  %s149_s1 = inlined_call_operand.hbm [shape: bf16[32,32], index: 1, kind: input, shape index: {}]   ;;  %s150_s2 = inlined_call_operand.vmem [shape: bf16[16,32], index: 2, kind: output, shape index: {}]  }
   0x1   :  { %s14_s11 = sshll.u32 %s149_s1, 4  ;;  %s16_s13 = sshll.u32 %s115_s12, 4  ;;  %s15_s11 = int_to_ptr.hbm [resolvable:$true] %s14_s11  ;;  %s17_s13 = int_to_ptr.vmem [resolvable:$true] %s16_s13 }
   0x2   :  { %s117_s15 = smov 4  }
   0x3   :  { %22 = dma.hbm_to_vmem [thread:$0]  %s15_s11, 256, %s17_s13, [#allocation3], %s116_s14, %s116_s14, %s117_s15  }
   0x4   :  { %113 = dma.done.wait [#allocation3], 256  }
   0x5   :  { %114 = vsyncadd [#allocation3], 4294967040  ;;  %v85_v0 = vld [vmem:[#allocation2 + $0x8] sm:$0xff]  ;;  %v84_v1 = vld [vmem:[#allocation2] sm:$0xff]  ;;  %vm47_vm0 = vcmask 261120   ;;  %vm67_vm1 = vcmask 257024  }
   0x6   :  { %57 = vmatpush.bf16.msra.mxu0 %v85_v0  ;;  %v28_v2 = vld [vmem:[%s148_s0] sm:$0xff]  ;;  %v29_v3 = vld [vmem:[%s148_s0 + $0x8] sm:$0xff] }
   0x7   :  { %v30_v4 = vpack.c.bf16 %v29_v3, %v28_v2 }
   0xa   :  { %58 = vmatpush.bf16.msra.mxu0 %v84_v1 }
   0xd   :  { %83 = vmatmul.msk.bf16.vlgmr.msra.gmra.mxu0 %vm47_vm0, %v30_v4 }
  0x8a   :  { %v60_v5 = vpop.f32.mrf.mxu0 }
  0x8b   :  { %v65_v6 = vpack.c.bf16 %v60_v5, %v60_v5 }
  0x8d   :  { %68 = vst.msk [vmem:[%s150_s2] sm:$0xf] %vm67_vm1, %v65_v6 }
  0x92   :  { %v62_v7 = vpop.f32.mrf.mxu0 }
  0x93   :  { %v66_v8 = vpack.c.bf16 %v62_v7, %v62_v7 }
  0x95   :  { %69 = vst.msk [vmem:[%s150_s2 + $0x4] sm:$0xf] %vm67_vm1, %v66_v8 }
  0x96   :  { %74 = vsyncpa [#allocation3], 1 }

// kernel: decoder_forward.33
= control target key start
LH: loop header
LB: loop body
LE: loop exit
PB: predicated region body
PF: predicated region fallthrough
CT: control target
= control target key end

     0   :  { %7 = vsyncpa [#allocation3], 0  ;;  %s194_s0 = inlined_call_operand.hbm [shape: f32[16,32], index: 0, kind: input, shape index: {}]   ;;  %s195_s1 = inlined_call_operand.hbm [shape: bf16[32,64], index: 1, kind: input, shape index: {}]   ;;  %s196_s2 = inlined_call_operand.vmem [shape: bf16[16,64], index: 2, kind: output, shape index: {}]  }
   0x1   :  { %s13_s11 = sshll.u32 %s194_s0, 4  ;;  %s14_s11 = int_to_ptr.hbm [resolvable:$true] %s13_s11 }
   0x2   :  { %8 = vsyncpa [#allocation5], 0  ;;  %s161_s12 = smov [#allocation2]   ;;  %s26_s16 = sshll.u32 %s195_s1, 4  ;;  %s27_s16 = int_to_ptr.hbm [resolvable:$true] %s26_s16 }
   0x3   :  { %s15_s13 = sshll.u32 %s161_s12, 4  ;;  %s162_s17 = smov 128   ;;  %s16_s13 = int_to_ptr.vmem [resolvable:$true] %s15_s13 }
   0x4   :  { %s163_s18 = smov 8   ;;  %s164_s19 = smov [#allocation4]  }
   0x5   :  { %21 = dma.hbm_to_vmem [thread:$0]  %s14_s11, 256, %s16_s13, [#allocation3], %s162_s17, %s162_s17, %s163_s18  }
   0x6   :  { %s28_s20 = sshll.u32 %s164_s19, 4  ;;  %s165_s21 = smov 64   ;;  %s29_s20 = int_to_ptr.vmem [resolvable:$true] %s28_s20 }
   0x7   :  { %s166_s22 = smov 4  }
   0x8   :  { %34 = dma.hbm_to_vmem [thread:$0]  %s27_s16, 256, %s29_s20, [#allocation5], %s165_s21, %s165_s21, %s166_s22  }
   0x9   :  { %157 = dma.done.wait [#allocation3], 256  }
   0xa   :  { %158 = vsyncadd [#allocation3], 4294967040 }
   0xb   :  { %159 = dma.done.wait [#allocation5], 256  }
   0xc   :  { %160 = vsyncadd [#allocation5], 4294967040  ;;  %v102_v0 = vld [vmem:[#allocation4 + $0x8] sm:$0xff]  ;;  %v101_v1 = vld [vmem:[#allocation4] sm:$0xff]  ;;  %vm63_vm0 = vcmask 261120   ;;  %vm83_vm1 = vcmask 519168  }
   0xd   :  { %73 = vmatpush.bf16.msra.mxu0 %v102_v0  ;;  %v44_v2 = vld [vmem:[#allocation2] sm:$0xff]  ;;  %v45_v3 = vld [vmem:[#allocation2 + $0x8] sm:$0xff] }
   0xe   :  { %v46_v4 = vpack.c.bf16 %v45_v3, %v44_v2 }
  0x11   :  { %74 = vmatpush.bf16.msra.mxu0 %v101_v1 }
  0x14   :  { %100 = vmatmul.msk.bf16.vlgmr.msra.gmra.mxu0 %vm63_vm0, %v46_v4 }
  0x91   :  { %v76_v5 = vpop.f32.mrf.mxu0 }
  0x92   :  { %v81_v6 = vpack.c.bf16 %v76_v5, %v76_v5 }
  0x94   :  { %84 = vst.msk [vmem:[%s196_s2] sm:$0xf] %vm83_vm1, %v81_v6 }
  0x99   :  { %v78_v7 = vpop.f32.mrf.mxu0 }
  0x9a   :  { %v82_v8 = vpack.c.bf16 %v78_v7, %v78_v7 }
  0x9c   :  { %85 = vst.msk [vmem:[%s196_s2 + $0x4] sm:$0xf] %vm83_vm1, %v82_v8 }
  0x9d   :  { %90 = vsyncpa [#allocation3], 1 }
  0x9e   :  { %91 = vsyncpa [#allocation5], 1 }

// kernel: decoder_forward.30
= control target key start
LH: loop header
LB: loop body
LE: loop exit
PB: predicated region body
PF: predicated region fallthrough
CT: control target
= control target key end

     0   :  { %s573_s9 = smov 0   ;;  %s646_s0 = inlined_call_operand.vmem [shape: bf16[2,8,96], index: 0, kind: input, shape index: {}]   ;;  %s647_s1 = inlined_call_operand.vmem [shape: f32[2,8,8], index: 1, kind: input, shape index: {}]   ;;  %s648_s2 = inlined_call_operand.vmem [shape: bf16[2,8,32], index: 2, kind: output, shape index: {}]  }
   0x1 LB: > { %s480_s10 = sadd.s32 4294967295, %s542_s9   ;;  %p484_p0 = scmp.ge.s32.totalorder %s542_s9, 1  ;;  %s542_s9 = sphi %s573_s9, %s12_s9  }
   0x2   : > { %p120_p1 = scmp.lt.s32.totalorder %s542_s9, 3 }
   0x4   : > { %p121_p2 = pnand %p484_p0, %p120_p1 }
   0x5   : > { %p144_p3 = scmp.lt.s32.totalorder (!%p121_p2), %s480_s10, 1  ;;  %s544_s15 = smov (!%p121_p2), 96  }
   0x6   : > { %124 = sbr.rel (%p121_p2) target bundleno = 1199 (0x4af), region = 28  ;;  %s545_s16 = smov (!%p121_p2), 88  }
   0x7   : > { %s546_s17 = smov (!%p121_p2), 120   ;;  %s547_s18 = smov (!%p121_p2), 64  }
   0x8   : > { %s548_s19 = smov (!%p121_p2), 80   ;;  %s549_s20 = smov (!%p121_p2), 72  }
   0x9   : > { %s550_s21 = smov (!%p121_p2), 112   ;;  %s551_s22 = smov (!%p121_p2), 104  }
   0xa   : > { %s552_s27 = smov (!%p121_p2), 56   ;;  %s553_s28 = smov (!%p121_p2), 40  }
   0xb   : > { %s650_s10 = smov (!%p144_p3, %s480_s10), 1  ;;  %vm165_vm0 = vcmask 64512   ;;  %vm204_vm2 = vcmask 1043456   ;;  %s554_s29 = smov 48   ;;  %vm408_vm3 = vcmask 130048   ;;  %vm410_vm4 = vcmask 195584  }
   0xc   : > { %s485_s11 = sshll.u32 %s650_s10, 2  ;;  %s486_s23 = sshll.u32 %s650_s10, 3  ;;  %vm413_vm5 = vcmask 257024  }
   0xd   : > { %s147_s14 = scalar_lea.vmem %s646_s0, %s485_s11  ;;  %s151_s26 = scalar_lea.vmem %s647_s1, %s486_s23 }
   0xe   : > { %v157_v0 = vld [vmem:[%s147_s14] sm:$0xf]  ;;  %s555_s30 = smov 8   ;;  %s556_s3 = smov 16  }
   0xf   : > { %v161_v1 = vunpack.c.l.b16 %v157_v0  ;;  %v158_v8 = vld [vmem:[%s151_s26] sm:$0xff]  ;;  %s557_s4 = smov 24   ;;  %s155_s7 = scalar_lea.vmem %s648_s2, %s485_s11 }
  0x10   : > { %vm159_vm1 = vcmp.eq.f32.partialorder %v158_v8, 0.0 }
  0x11   : > { %v589_v2 = vpack.c.b16 %v161_v1, %v161_v1 }
  0x13   : > { %163 = vrot.lane.b32.xlu0 %v589_v2, %s544_s15  ;;  %223 = vrot.lane.b32.xlu1 %v589_v2, %s545_s16 }
  0x14   : > { %221 = vrot.lane.b32.xlu2 %v589_v2, %s546_s17 }
  0x1c   : > { %199 = vrot.lane.b32.xlu2 %v589_v2, %s547_s18 }
  0x24   : > { %281 = vrot.lane.b32.xlu2 %v589_v2, %s548_s19 }
  0x2c   : > { %339 = vrot.lane.b32.xlu2 %v589_v2, %s549_s20 }
  0x34   : > { %279 = vrot.lane.b32.xlu2 %v589_v2, %s550_s21 }
  0x3c   : > { %337 = vrot.lane.b32.xlu2 %v589_v2, %s551_s22 }
  0x6e   : > { %v222_v7 = vpop.permute.xlu2 %221 }
  0x76   : > { %v200_v14 = vpop.permute.xlu2 %199 }
  0x77   : > { %v206_v19 = vsel %vm204_vm2, %v200_v14, 0 }
  0x78   : > { %215 = vmatpush.bf16.msra.mxu1 %v206_v19 }
  0x7e   : > { %v282_v15 = vpop.permute.xlu2 %281 }
  0x7f   : > { %v287_v17 = vsel %vm165_vm0, %v282_v15, 0 }
  0x80   : > { %296 = vmatpush.bf16.xpose.msrb.mxu1 %v287_v17 }
  0x85   : > { %v164_v3 = vpop.permute.xlu0 %163  ;;  %v224_v5 = vpop.permute.xlu1 %223 }
  0x86   : > { %v170_v4 = vsel %vm165_vm0, %v164_v3, 0  ;;  %v229_v6 = vsel %vm165_vm0, %v224_v5, 0  ;;  %v340_v16 = vpop.permute.xlu2 %339 }
  0x87   : > { %179 = vmatpush.bf16.xpose.msra.mxu0 %v170_v4  ;;  %238 = vmatpush.bf16.xpose.msra.mxu2 %v229_v6  ;;  %v345_v18 = vsel %vm165_vm0, %v340_v16, 0 }
  0x8e   : > { %488 = vmatmul.msk.bf16.vlgmr.msra.gmra.mxu0 %vm165_vm0, %v157_v0  ;;  %490 = vmatmul.msk.bf16.vlgmr.msra.gmra.mxu2 %vm165_vm0, %v222_v7  ;;  %v280_v20 = vpop.permute.xlu2 %279 }
  0x8f   : > { %354 = vmatpush.bf16.xpose.msrb.mxu0 %v345_v18 }
  0x96   : > { %v338_v22 = vpop.permute.xlu2 %337 }
  0x9e   : > { %494 = vmatmul.msk.bf16.vlgmr.msrb.gmra.mxu0 %vm165_vm0, %v338_v22 }
 0x10b   : > { %v181_v9 = vpop.f32.mrf.mxu0 }
 0x10c   : > { %v185_v10 = vmul.f32 0.35355338, %v181_v9 }
 0x10e   : > { %v186_v11 = vsel %vm159_vm1, -1e+09, %v185_v10 }
 0x10f   : > { %v187_v12 = vsel %vm165_vm0, %v186_v11, -inf }
 0x110   : > { %188 = vmax.xlane.f32.xlu0 %v187_v12 }
 0x111   : > { %v240_v21 = vpop.f32.mrf.mxu2 }
 0x112   : > { %v244_v23 = vmul.f32 0.35355338, %v240_v21 }
 0x113   : > { %v183_v13 = vpop.f32.mrf.mxu0 }
 0x114   : > { %v245_v24 = vsel %vm159_vm1, -1e+09, %v244_v23 }
 0x115   : > { %v246_v26 = vsel %vm165_vm0, %v245_v24, -inf }
 0x116   : > { %247 = vmax.xlane.f32.xlu2 %v246_v26 }
 0x119   : > { %v242_v29 = vpop.f32.mrf.mxu2 }
 0x11b   : > { %v356_v32 = vpop.f32.mrf.mxu0 }
 0x11c   : > { %v360_v33 = vmul.f32 0.35355338, %v356_v32 }
 0x11e   : > { %v361_v34 = vsel %vm159_vm1, -1e+09, %v360_v33 }
 0x11f   : > { %v362_v36 = vsel %vm165_vm0, %v361_v34, -inf }
 0x123   : > { %v358_v37 = vpop.f32.mrf.mxu0 }
 0x183   : > { %v189_v25 = vpop.xlane.xlu0 %188 }
 0x184   : > { %v190_v27 = vsub.f32 %v186_v11, %v189_v25 }
 0x186   : > { %v191_v28 = vmul.f32 1.442695, %v190_v27 }
 0x188   : > { %520 = vpow2.f32 %v191_v28 }
 0x189   : > { %v248_v42 = vpop.xlane.xlu2 %247 }
 0x18a   : > { %v249_v44 = vsub.f32 %v245_v24, %v248_v42 }
 0x18c   : > { %v250_v45 = vmul.f32 1.442695, %v249_v44 }
 0x18e   : > { %v521_v30 = vpop.eup %520 }
 0x18f   : > { %v193_v31 = vsel %vm165_vm0, %v521_v30, 0.0 }
 0x190   : > { %194 = vadd.xlane.f32.xlu1 %v193_v31 }
 0x198   : > { %363 = vmax.xlane.f32.xlu1 %v362_v36 }
 0x1b1   : > { %258 = vrot.lane.b32.xlu1 %v589_v2, %s552_s27 }
 0x1b9   : > { %374 = vrot.lane.b32.xlu1 %v589_v2, %s553_s28 }
 0x203   : > { %v195_v35 = vpop.xlane.xlu1 %194 }
 0x204   : > { %522 = vrcp.f32 %v195_v35 }
 0x205   : > { %524 = vpow2.f32 %v250_v45 }
 0x20a   : > { %v523_v38 = vpop.eup %522 }
 0x20b   : > { %v197_v39 = vmul.f32 %v523_v38, %v521_v30  ;;  %v364_v46 = vpop.xlane.xlu1 %363  ;;  %v525_v54 = vpop.eup %524 }
 0x20c   : > { %v365_v49 = vsub.f32 %v361_v34, %v364_v46  ;;  %v252_v55 = vsel %vm165_vm0, %v525_v54, 0.0 }
 0x20d   : > { %v198_v40 = vpack.c.bf16 %v197_v39, %v197_v39 }
 0x20e   : > { %v366_v52 = vmul.f32 1.442695, %v365_v49 }
 0x20f   : > { %489 = vmatmul.msk.bf16.vlgmr.msra.gmra.mxu1 %vm165_vm0, %v198_v40 }
 0x210   : > { %526 = vpow2.f32 %v366_v52 }
 0x216   : > { %v527_v56 = vpop.eup %526 }
 0x217   : > { %v368_v57 = vsel %vm165_vm0, %v527_v56, 0.0 }
 0x21f   : > { %492 = vmatmul.msk.bf16.vlgmr.msrb.gmra.mxu1 %vm165_vm0, %v280_v20 }
 0x223   : > { %v259_v58 = vpop.permute.xlu1 %258 }
 0x224   : > { %v264_v59 = vsel %vm204_vm2, %v259_v58, 0 }
 0x225   : > { %273 = vmatpush.bf16.msra.mxu3 %v264_v59 }
 0x22b   : > { %v375_v60 = vpop.permute.xlu1 %374 }
 0x22c   : > { %v380_v61 = vsel %vm204_vm2, %v375_v60, 0 }
 0x22d   : > { %389 = vmatpush.bf16.msrb.mxu2 %v380_v61 }
 0x28c   : > { %v622_v41 = vpop.f32.mrf.mxu1 }
 0x294   : > { %v219_v43 = vpop.f32.mrf.mxu1 }
 0x29c   : > { %v298_v47 = vpop.f32.mrf.mxu1 }
 0x29d   : > { %v302_v48 = vmul.f32 0.35355338, %v298_v47 }
 0x29f   : > { %v303_v50 = vsel %vm159_vm1, -1e+09, %v302_v48 }
 0x2a0   : > { %v304_v51 = vsel %vm165_vm0, %v303_v50, -inf }
 0x2a1   : > { %305 = vmax.xlane.f32.xlu0 %v304_v51 }
 0x2a4   : > { %v300_v53 = vpop.f32.mrf.mxu1 }
 0x2a9   : > { %253 = vadd.xlane.f32.xlu0 %v252_v55 }
 0x2b1   : > { %369 = vadd.xlane.f32.xlu0 %v368_v57 }
 0x314   : > { %v306_v62 = vpop.xlane.xlu0 %305 }
 0x315   : > { %v307_v63 = vsub.f32 %v303_v50, %v306_v62 }
 0x317   : > { %v308_v0 = vmul.f32 1.442695, %v307_v63 }
 0x319   : > { %528 = vpow2.f32 %v308_v0 }
 0x31c   : > { %v254_v1 = vpop.xlane.xlu0 %253 }
 0x31d   : > { %530 = vrcp.f32 %v254_v1 }
 0x31f   : > { %v529_v3 = vpop.eup %528 }
 0x320   : > { %v310_v4 = vsel %vm165_vm0, %v529_v3, 0.0 }
 0x321   : > { %311 = vadd.xlane.f32.xlu0 %v310_v4 }
 0x323   : > { %v531_v5 = vpop.eup %530 }
 0x324   : > { %v370_v6 = vpop.xlane.xlu0 %369  ;;  %v256_v7 = vmul.f32 %v531_v5, %v525_v54 }
 0x325   : > { %532 = vrcp.f32 %v370_v6 }
 0x326   : > { %v257_v8 = vpack.c.bf16 %v256_v7, %v256_v7 }
 0x328   : > { %491 = vmatmul.msk.bf16.vlgmr.msra.gmra.mxu3 %vm165_vm0, %v257_v8 }
 0x32b   : > { %v533_v9 = vpop.eup %532 }
 0x32c   : > { %v372_v10 = vmul.f32 %v533_v9, %v527_v56 }
 0x32e   : > { %v373_v11 = vpack.c.bf16 %v372_v10, %v372_v10 }
 0x330   : > { %495 = vmatmul.msk.bf16.vlgmr.msrb.gmra.mxu2 %vm165_vm0, %v373_v11 }
 0x335   : > { %316 = vrot.lane.b32.xlu0 %v589_v2, %s554_s29 }
 0x394   : > { %v312_v12 = vpop.xlane.xlu0 %311 }
 0x395   : > { %534 = vrcp.f32 %v312_v12 }
 0x39b   : > { %v535_v13 = vpop.eup %534 }
 0x39c   : > { %v314_v14 = vmul.f32 %v535_v13, %v529_v3 }
 0x39e   : > { %v315_v17 = vpack.c.bf16 %v314_v14, %v314_v14 }
 0x3a7   : > { %v317_v15 = vpop.permute.xlu0 %316 }
 0x3a8   : > { %v322_v16 = vsel %vm204_vm2, %v317_v15, 0 }
 0x3a9   : > { %331 = vmatpush.bf16.msrb.mxu3 %v322_v16 }
 0x3ab   : > { %v275_v18 = vpop.f32.mrf.mxu3 }
 0x3ac   : > { %493 = vmatmul.msk.bf16.vlgmr.msrb.gmra.mxu3 %vm165_vm0, %v315_v17  ;;  %396 = vrot.lane.b32.xlu2 %v275_v18, %s555_s30 }
 0x3b3   : > { %v277_v19 = vpop.f32.mrf.mxu3  ;;  %v391_v20 = vpop.f32.mrf.mxu2 }
 0x3bb   : > { %v393_v21 = vpop.f32.mrf.mxu2 }
 0x406   : > { %v397_v24 = vpop.permute.xlu2 %396 }
 0x407   : > { %v407_v25 = vsel %vm165_vm0, %v622_v41, %v397_v24 }
 0x42f   : > { %v333_v22 = vpop.f32.mrf.mxu3 }
 0x430   : > { %400 = vrot.lane.b32.xlu1 %v333_v22, %s556_s3 }
 0x437   : > { %v335_v2 = vpop.f32.mrf.mxu3 }
 0x438   : > { %404 = vrot.lane.b32.xlu1 %v391_v20, %s557_s4 }
 0x4a2   : > { %v401_v23 = vpop.permute.xlu1 %400 }
 0x4a3   : > { %v409_v26 = vsel %vm408_vm3, %v407_v25, %v401_v23 }
 0x4aa   : > { %v405_v27 = vpop.permute.xlu1 %404 }
 0x4ab   : > { %v411_v28 = vsel %vm410_vm4, %v409_v26, %v405_v27 }
 0x4ac   : > { %v412_v29 = vpack.c.bf16 %v411_v28, %v411_v28 }
 0x4ae   : > { %414 = vst.msk [vmem:[%s155_s7] sm:$0xf] %vm413_vm5, %v412_v29 }
 0x4af PF: > { %s12_s9 = sadd.s32 1, %s542_s9  }
 0x4b0   : > { %p9_p4 = scmp.ge.s32.totalorder %s12_s9, 4  }
 0x4b2   :  { %11 = sbr.rel (!%p9_p4) target bundleno = 1 (0x1), region = 61 }

// kernel: decoder_forward.37
= control target key start
LH: loop header
LB: loop body
LE: loop exit
PB: predicated region body
PF: predicated region fallthrough
CT: control target
= control target key end

     0   :  { %s317_s0 = inlined_call_operand.vmem [shape: bf16[16,64], index: 0, kind: input, shape index: {}]   ;;  %s318_s1 = inlined_call_operand.vmem [shape: bf16[64,32], index: 1, kind: input, shape index: {}]   ;;  %s319_s2 = inlined_call_operand.vmem [shape: f32[1,32], index: 2, kind: input, shape index: {}]   ;;  %s320_s3 = inlined_call_operand.vmem [shape: f32[16,32], index: 3, kind: input, shape index: {}]   ;;  %s321_s4 = inlined_call_operand.vmem [shape: f32[1,32], index: 4, kind: input, shape index: {}]   ;;  %s322_s5 = inlined_call_operand.vmem [shape: f32[1,32], index: 5, kind: input, shape index: {}]   ;;  %s323_s6 = inlined_call_operand.hbm [shape: f32[16,32], index: 6, kind: output, shape index: {}]  }
   0x1   :  { %v199_v0 = vld [vmem:[%s318_s1 + $0x18] sm:$0xff]  ;;  %v198_v1 = vld [vmem:[%s318_s1 + $0x10] sm:$0xff] }
   0x2   :  { %76 = vmatpush.bf16.msra.mxu0 %v199_v0 }
   0x3   :  { %11 = vsyncpa [#allocation3], 0  ;;  %v197_v2 = vld [vmem:[%s318_s1 + $0x8] sm:$0xff]  ;;  %v196_v3 = vld [vmem:[%s318_s1] sm:$0xff]  ;;  %vm68_vm0 = vcmask 523264   ;;  %vm90_vm1 = vcmask 261120  }
   0x4   :  { %v195_v4 = vld [vmem:[%s317_s0] sm:$0xff]  ;;  %v87_v12 = vld [vmem:[%s320_s3 + $0x8] sm:$0xff]  ;;  %v239_v16 = vmov 32.0   ;;  %s162_s16 = sshll.u32 %s323_s6, 4  ;;  %s242_s17 = smov 8   ;;  %s163_s16 = int_to_ptr.hbm [resolvable:$true] %s162_s16 }
   0x5   :  { %v204_v5 = vld [vmem:[%s319_s2] ss:$0 sm:$0xff]  ;;  %207 = vrcp.f32 %v239_v16 }
   0x6   :  { %77 = vmatpush.bf16.msra.mxu0 %v198_v1  ;;  %v86_v7 = vld [vmem:[%s320_s3] sm:$0xff] }
   0x7   :  { %v205_v47 = vld [vmem:[%s321_s4] ss:$0 sm:$0xff]  ;;  %s240_s4 = smov [#allocation2]  }
   0x8   :  { %v206_v51 = vld [vmem:[%s322_s5] ss:$0 sm:$0xff]  ;;  %s160_s13 = sshll.u32 %s240_s4, 4  ;;  %s241_s5 = smov 128   ;;  %s161_s13 = int_to_ptr.vmem [resolvable:$true] %s160_s13 }
   0xa   :  { %78 = vmatpush.bf16.msra.mxu0 %v197_v2 }
   0xb   :  { %v208_v17 = vpop.eup %207 }
   0xc   :  { %v98_v18 = vmul.f32 32.0, %v208_v17  ;;  %vm102_vm2 = vweird.f32 %v208_v17 }
   0xe   :  { %79 = vmatpush.bf16.msra.mxu0 %v196_v3  ;;  %v99_v19 = vsub.f32 1.0, %v98_v18 }
  0x10   :  { %v100_v20 = vmul.f32 %v208_v17, %v99_v19 }
  0x11   :  { %194 = vmatmul.msk.bf16.vlgmr.msra.gmra.mxu0 %vm68_vm0, %v195_v4 }
  0x12   :  { %v101_v21 = vadd.f32 %v208_v17, %v100_v20 }
  0x14   :  { %v103_v22 = vsel %vm102_vm2, %v208_v17, %v101_v21 }
  0x8e   :  { %v81_v6 = vpop.f32.mrf.mxu0 }
  0x8f   :  { %v82_v8 = vadd.f32 %v204_v5, %v81_v6 }
  0x91   :  { %v88_v9 = vadd.f32 %v86_v7, %v82_v8 }
  0x93   :  { %v91_v10 = vsel %vm90_vm1, %v88_v9, 0.0 }
  0x94   :  { %92 = vadd.xlane.f32.xlu0 %v91_v10 }
  0x96   :  { %v83_v11 = vpop.f32.mrf.mxu0 }
  0x97   :  { %v84_v13 = vadd.f32 %v204_v5, %v83_v11 }
  0x99   :  { %v89_v14 = vadd.f32 %v87_v12, %v84_v13 }
  0x9b   :  { %v94_v15 = vsel %vm90_vm1, %v89_v14, 0.0 }
  0x9c   :  { %95 = vadd.xlane.f32.xlu0 %v94_v15 }
 0x107   :  { %v93_v23 = vpop.xlane.xlu0 %92 }
 0x108   :  { %v104_v24 = vmul.f32 %v103_v22, %v93_v23 }
 0x10a   :  { %v106_v25 = vsub.f32 %v88_v9, %v104_v24 }
 0x10c   :  { %v108_v26 = vmul.f32 %v106_v25, %v106_v25 }
 0x10e   :  { %v110_v27 = vsel %vm90_vm1, %v108_v26, 0.0 }
 0x10f   :  { %111 = vadd.xlane.f32.xlu1 %v110_v27  ;;  %v96_v28 = vpop.xlane.xlu0 %95 }
 0x110   :  { %v105_v29 = vmul.f32 %v103_v22, %v96_v28 }
 0x112   :  { %v107_v30 = vsub.f32 %v89_v14, %v105_v29 }
 0x114   :  { %v109_v31 = vmul.f32 %v107_v30, %v107_v30 }
 0x116   :  { %v113_v32 = vsel %vm90_vm1, %v109_v31, 0.0 }
 0x117   :  { %114 = vadd.xlane.f32.xlu1 %v113_v32 }
 0x182   :  { %v112_v33 = vpop.xlane.xlu1 %111 }
 0x183   :  { %v116_v34 = vmul.f32 %v112_v33, %v103_v22 }
 0x185   :  { %v118_v35 = vadd.f32 1e-06, %v116_v34 }
 0x187   :  { %209 = vrsqrt.f32 %v118_v35  ;;  %vm126_vm4 = vweird.f32 %v118_v35 }
 0x18a   :  { %v115_v36 = vpop.xlane.xlu1 %114 }
 0x18b   :  { %v117_v37 = vmul.f32 %v115_v36, %v103_v22 }
 0x18d   :  { %v210_v38 = vpop.eup %209  ;;  %v119_v39 = vadd.f32 1e-06, %v117_v37 }
 0x18e   :  { %v121_v40 = vmul.f32 %v210_v38, %v118_v35  ;;  %vm127_vm3 = vweird.f32 %v210_v38 }
 0x18f   :  { %211 = vrsqrt.f32 %v119_v39  ;;  %vm128_vm5 = vmor %vm126_vm4, %vm127_vm3  ;;  %vm136_vm7 = vweird.f32 %v119_v39 }
 0x190   :  { %v122_v41 = vmul.f32 %v210_v38, %v121_v40 }
 0x192   :  { %v123_v42 = vmul.f32 0.5, %v122_v41 }
 0x194   :  { %v124_v43 = vsub.f32 1.5, %v123_v42 }
 0x195   :  { %v212_v44 = vpop.eup %211 }
 0x196   :  { %v125_v45 = vmul.f32 %v210_v38, %v124_v43  ;;  %v131_v46 = vmul.f32 %v212_v44, %v119_v39  ;;  %vm137_vm6 = vweird.f32 %v212_v44 }
 0x197   :  { %vm138_vm8 = vmor %vm136_vm7, %vm137_vm6 }
 0x198   :  { %v129_v48 = vsel %vm128_vm5, %v210_v38, %v125_v45  ;;  %v132_v49 = vmul.f32 %v212_v44, %v131_v46 }
 0x199   :  { %v140_v50 = vmul.f32 %v129_v48, %v106_v25 }
 0x19a   :  { %v133_v52 = vmul.f32 0.5, %v132_v49 }
 0x19b   :  { %v146_v53 = vmul.f32 %v205_v47, %v140_v50 }
 0x19c   :  { %v134_v54 = vsub.f32 1.5, %v133_v52 }
 0x19d   :  { %v152_v55 = vadd.f32 %v206_v51, %v146_v53 }
 0x19e   :  { %v135_v56 = vmul.f32 %v212_v44, %v134_v54 }
 0x19f   :  { %154 = vst.msk [vmem:[#allocation2] sm:$0xff] %vm90_vm1, %v152_v55 }
 0x1a0   :  { %v139_v57 = vsel %vm138_vm8, %v212_v44, %v135_v56 }
 0x1a1   :  { %v141_v58 = vmul.f32 %v139_v57, %v107_v30 }
 0x1a3   :  { %v147_v59 = vmul.f32 %v205_v47, %v141_v58 }
 0x1a5   :  { %v153_v60 = vadd.f32 %v206_v51, %v147_v59 }
 0x1a7   :  { %155 = vst.msk [vmem:[#allocation2 + $0x8] sm:$0xff] %vm90_vm1, %v153_v60 }
 0x1a8   :  { %168 = dma.vmem_to_hbm [thread:$0]  %s161_s13, 256, %s163_s16, [#allocation3], %s241_s5, %s241_s5, %s242_s17  }
 0x1a9   :  { %237 = dma.done.wait [#allocation3], 256  }
 0x1aa   :  { %238 = vsyncadd [#allocation3], 4294967040 }
 0x1ab   :  { %173 = vsyncpa [#allocation3], 1 }

// kernel: decoder_forward.35
= control target key start
LH: loop header
LB: loop body
LE: loop exit
PB: predicated region body
PF: predicated region fallthrough
CT: control target
= control target key end

     0   :  { %10 = vsyncpa [#allocation3], 0  ;;  %s351_s0 = inlined_call_operand.vmem [shape: bf16[16,32], index: 0, kind: input, shape index: {}]   ;;  %s352_s1 = inlined_call_operand.hbm [shape: bf16[32,32], index: 1, kind: input, shape index: {}]   ;;  %s353_s2 = inlined_call_operand.vmem [shape: f32[16,32], index: 2, kind: input, shape index: {}]   ;;  %s354_s3 = inlined_call_operand.hbm [shape: f32[1,32], index: 3, kind: input, shape index: {}]   ;;  %s355_s4 = inlined_call_operand.hbm [shape: f32[1,32], index: 4, kind: input, shape index: {}]   ;;  %s356_s5 = inlined_call_operand.vmem [shape: f32[16,32], index: 5, kind: output, shape index: {}]  }
   0x1   :  { %11 = vsyncpa [#allocation5], 0  ;;  %s34_s20 = sshll.u32 %s354_s3, 4  ;;  %s284_s21 = smov [#allocation4]   ;;  %s35_s20 = int_to_ptr.hbm [resolvable:$true] %s34_s20 }
   0x2   :  { %s36_s22 = sshll.u32 %s284_s21, 4  ;;  %s18_s25 = sshll.u32 %s352_s1, 4  ;;  %s37_s22 = int_to_ptr.vmem [resolvable:$true] %s36_s22  ;;  %s19_s25 = int_to_ptr.hbm [resolvable:$true] %s18_s25 }
   0x3   :  { %39 = dma.hbm_to_vmem [thread:$0]  %s35_s20, 16, %s37_s22, [#allocation5]  }
   0x4   :  { %s285_s26 = smov [#allocation2]   ;;  %s286_s28 = smov 64  }
   0x5   :  { %s20_s27 = sshll.u32 %s285_s26, 4  ;;  %s287_s29 = smov 4   ;;  %s21_s27 = int_to_ptr.vmem [resolvable:$true] %s20_s27 }
   0x6   :  { %26 = dma.hbm_to_vmem [thread:$0]  %s19_s25, 256, %s21_s27, [#allocation3], %s286_s28, %s286_s28, %s287_s29  }
   0x7   :  { %s45_s3 = sshll.u32 %s355_s4, 4  ;;  %s288_s7 = smov [#allocation6]   ;;  %s46_s3 = int_to_ptr.hbm [resolvable:$true] %s45_s3 }
   0x8   :  { %s47_s8 = sshll.u32 %s288_s7, 4  ;;  %s48_s8 = int_to_ptr.vmem [resolvable:$true] %s47_s8 }
   0x9   :  { %50 = dma.hbm_to_vmem [thread:$0]  %s46_s3, 16, %s48_s8, [#allocation5]  }
   0xa   :  { %280 = dma.done.wait [#allocation3], 256  }
   0xb   :  { %281 = vsyncadd [#allocation3], 4294967040 }
   0xc   :  { %282 = dma.done.wait [#allocation5], 32  }
   0xd   :  { %283 = vsyncadd [#allocation5], 4294967264  ;;  %v193_v0 = vld [vmem:[#allocation2 + $0x8] sm:$0xff]  ;;  %v192_v1 = vld [vmem:[#allocation2] sm:$0xff]  ;;  %vm89_vm0 = vcmask 261120   ;;  %v289_v11 = vmov 32.0  }
   0xe   :  { %99 = vmatpush.bf16.msra.mxu0 %v193_v0  ;;  %v191_v2 = vld [vmem:[%s351_s0] sm:$0xff]  ;;  %v71_v7 = vld [vmem:[%s353_s2 + $0x8] sm:$0xff]  ;;  %202 = vrcp.f32 %v289_v11  ;;  %v200_v42 = vld [vmem:[#allocation4] ss:$0 sm:$0xff] }
   0xf   :  { %v70_v3 = vld [vmem:[%s353_s2] sm:$0xff]  ;;  %v201_v45 = vld [vmem:[#allocation6] ss:$0 sm:$0xff] }
  0x12   :  { %100 = vmatpush.bf16.msra.mxu0 %v192_v1 }
  0x14   :  { %v203_v12 = vpop.eup %202 }
  0x15   :  { %190 = vmatmul.msk.bf16.vlgmr.msra.gmra.mxu0 %vm89_vm0, %v191_v2  ;;  %v114_v13 = vmul.f32 32.0, %v203_v12  ;;  %vm118_vm1 = vweird.f32 %v203_v12 }
  0x17   :  { %v115_v14 = vsub.f32 1.0, %v114_v13 }
  0x19   :  { %v116_v15 = vmul.f32 %v203_v12, %v115_v14 }
  0x1b   :  { %v117_v16 = vadd.f32 %v203_v12, %v116_v15 }
  0x1d   :  { %v119_v17 = vsel %vm118_vm1, %v203_v12, %v117_v16 }
  0x92   :  { %v102_v4 = vpop.f32.mrf.mxu0 }
  0x93   :  { %v103_v5 = vadd.f32 %v102_v4, %v70_v3 }
  0x95   :  { %v107_v6 = vsel %vm89_vm0, %v103_v5, 0.0 }
  0x96   :  { %108 = vadd.xlane.f32.xlu0 %v107_v6 }
  0x9a   :  { %v104_v8 = vpop.f32.mrf.mxu0 }
  0x9b   :  { %v105_v9 = vadd.f32 %v104_v8, %v71_v7 }
  0x9d   :  { %v110_v10 = vsel %vm89_vm0, %v105_v9, 0.0 }
  0x9e   :  { %111 = vadd.xlane.f32.xlu0 %v110_v10 }
 0x109   :  { %v109_v18 = vpop.xlane.xlu0 %108 }
 0x10a   :  { %v120_v19 = vmul.f32 %v119_v17, %v109_v18 }
 0x10c   :  { %v122_v20 = vsub.f32 %v103_v5, %v120_v19 }
 0x10e   :  { %v124_v21 = vmul.f32 %v122_v20, %v122_v20 }
 0x110   :  { %v126_v22 = vsel %vm89_vm0, %v124_v21, 0.0 }
 0x111   :  { %127 = vadd.xlane.f32.xlu1 %v126_v22  ;;  %v112_v23 = vpop.xlane.xlu0 %111 }
 0x112   :  { %v121_v24 = vmul.f32 %v119_v17, %v112_v23 }
 0x114   :  { %v123_v25 = vsub.f32 %v105_v9, %v121_v24 }
 0x116   :  { %v125_v26 = vmul.f32 %v123_v25, %v123_v25 }
 0x118   :  { %v129_v27 = vsel %vm89_vm0, %v125_v26, 0.0 }
 0x119   :  { %130 = vadd.xlane.f32.xlu1 %v129_v27 }
 0x184   :  { %v128_v28 = vpop.xlane.xlu1 %127 }
 0x185   :  { %v132_v29 = vmul.f32 %v128_v28, %v119_v17 }
 0x187   :  { %v134_v30 = vadd.f32 1e-06, %v132_v29 }
 0x189   :  { %204 = vrsqrt.f32 %v134_v30  ;;  %vm142_vm3 = vweird.f32 %v134_v30 }
 0x18c   :  { %v131_v31 = vpop.xlane.xlu1 %130 }
 0x18d   :  { %v133_v32 = vmul.f32 %v131_v31, %v119_v17 }
 0x18f   :  { %v205_v33 = vpop.eup %204  ;;  %v135_v34 = vadd.f32 1e-06, %v133_v32 }
 0x190   :  { %v137_v35 = vmul.f32 %v205_v33, %v134_v30  ;;  %vm143_vm2 = vweird.f32 %v205_v33 }
 0x191   :  { %206 = vrsqrt.f32 %v135_v34  ;;  %vm144_vm4 = vmor %vm142_vm3, %vm143_vm2  ;;  %vm152_vm6 = vweird.f32 %v135_v34 }
 0x192   :  { %v138_v36 = vmul.f32 %v205_v33, %v137_v35 }
 0x194   :  { %v139_v37 = vmul.f32 0.5, %v138_v36 }
 0x196   :  { %v140_v38 = vsub.f32 1.5, %v139_v37 }
 0x197   :  { %v207_v39 = vpop.eup %206 }
 0x198   :  { %v141_v40 = vmul.f32 %v205_v33, %v140_v38  ;;  %v147_v41 = vmul.f32 %v207_v39, %v135_v34  ;;  %vm153_vm5 = vweird.f32 %v207_v39 }
 0x199   :  { %vm154_vm7 = vmor %vm152_vm6, %vm153_vm5 }
 0x19a   :  { %v145_v43 = vsel %vm144_vm4, %v205_v33, %v141_v40  ;;  %v148_v44 = vmul.f32 %v207_v39, %v147_v41 }
 0x19b   :  { %v156_v46 = vmul.f32 %v145_v43, %v122_v20 }
 0x19c   :  { %v149_v47 = vmul.f32 0.5, %v148_v44 }
 0x19d   :  { %v162_v48 = vmul.f32 %v200_v42, %v156_v46 }
 0x19e   :  { %v150_v49 = vsub.f32 1.5, %v149_v47 }
 0x19f   :  { %v168_v50 = vadd.f32 %v201_v45, %v162_v48 }
 0x1a0   :  { %v151_v51 = vmul.f32 %v207_v39, %v150_v49 }
 0x1a1   :  { %170 = vst.msk [vmem:[%s356_s5] sm:$0xff] %vm89_vm0, %v168_v50 }
 0x1a2   :  { %v155_v52 = vsel %vm154_vm7, %v207_v39, %v151_v51 }
 0x1a3   :  { %v157_v53 = vmul.f32 %v155_v52, %v123_v25 }
 0x1a5   :  { %v163_v54 = vmul.f32 %v200_v42, %v157_v53 }
 0x1a7   :  { %v169_v55 = vadd.f32 %v201_v45, %v163_v54 }
 0x1a9   :  { %171 = vst.msk [vmem:[%s356_s5 + $0x8] sm:$0xff] %vm89_vm0, %v169_v55 }
 0x1aa   :  { %176 = vsyncpa [#allocation3], 1 }
 0x1ab   :  { %177 = vsyncpa [#allocation5], 1 }

</bundles_post_ra>
